<compile_context>
chip_gen: v7x
topology: tpu7x:2x2x1
jax: 0.10.0
libtpu: 0.0.40
codegen_flags: <defaults>
</compile_context>

<pallas_src>
import jax
import jax.numpy as jnp
from jax.experimental import pallas as pl
from jax.experimental.pallas import tpu as pltpu

D_IN = 28 * 28            # 784
D_IN_PAD = 896            # 7 * 128: lane-aligned K for the first matmul
LAYER_SIZES = [1024, 512, 256]
D_OUT = 1
D_OUT_PAD = 128           # lane-dense output tile; real logit lives in column 0
NEG_SLOPE = 0.2


def _leaky_relu(x):
    return jnp.where(x > 0, x, NEG_SLOPE * x)


def _round_up(x, m):
    return (x + m - 1) // m * m


def discriminator_kernel(x_ref,
                         w1_ref, b1_ref,
                         w2_ref, b2_ref,
                         w3_ref, b3_ref,
                         w4_ref, b4_ref,
                         o_ref):
    # x tile: (TB, 896) bf16; weights bf16 (VMEM-resident); biases f32.
    # All dots accumulate in f32; bias-add / LeakyReLU in f32, re-cast to bf16
    # only for the next MXU pass.
    h = jnp.dot(x_ref[...], w1_ref[...], preferred_element_type=jnp.float32)
    h = _leaky_relu(h + b1_ref[...]).astype(jnp.bfloat16)          # (TB, 1024)

    h = jnp.dot(h, w2_ref[...], preferred_element_type=jnp.float32)
    h = _leaky_relu(h + b2_ref[...]).astype(jnp.bfloat16)          # (TB, 512)

    h = jnp.dot(h, w3_ref[...], preferred_element_type=jnp.float32)
    h = _leaky_relu(h + b3_ref[...]).astype(jnp.bfloat16)          # (TB, 256)

    logit = jnp.dot(h, w4_ref[...], preferred_element_type=jnp.float32)
    o_ref[...] = (logit + b4_ref[...]).astype(o_ref.dtype)         # (TB, 128)


def prepare_params(params):
    """Cast weights to bf16 (f32 accumulation happens in-kernel), pad W1's K-dim
    to 896 (zero rows) and the final layer's N-dim to 128 (zero columns)."""
    (w1, b1), (w2, b2), (w3, b3), (w4, b4) = params
    w1p = jnp.pad(w1, ((0, D_IN_PAD - D_IN), (0, 0))).astype(jnp.bfloat16)
    w4p = jnp.pad(w4, ((0, 0), (0, D_OUT_PAD - D_OUT))).astype(jnp.bfloat16)
    b4p = jnp.pad(b4, ((0, 0), (0, D_OUT_PAD - D_OUT))).astype(jnp.float32)
    return (w1p, b1.astype(jnp.float32),
            w2.astype(jnp.bfloat16), b2.astype(jnp.float32),
            w3.astype(jnp.bfloat16), b3.astype(jnp.float32),
            w4p, b4p)


def discriminator_forward(x, params, *, block_b=256):
    """x: (B, 1, 28, 28) or (B, 784). Returns f32 logits of shape (B, 1).
    block_b must be a multiple of 8 (128-512 recommended)."""
    B = x.shape[0]
    x_flat = x.reshape(B, -1)
    assert x_flat.shape[1] == D_IN

    # Batch tile: multiple of 8, capped at block_b; round B up so tiles are full.
    tb = min(block_b, _round_up(B, 8))
    b_pad = _round_up(B, tb)

    # bf16 input halves the x DMA; zero-pad batch and feature dims.
    x_p = jnp.pad(x_flat.astype(jnp.bfloat16),
                  ((0, b_pad - B), (0, D_IN_PAD - D_IN)))

    w1, b1, w2, b2, w3, b3, w4, b4 = prepare_params(params)

    def resident(arr):
        # Constant block index -> stays in VMEM across all grid steps.
        return pl.BlockSpec(arr.shape, lambda i: (0,) * arr.ndim)

    flops = 2 * b_pad * (D_IN_PAD * 1024 + 1024 * 512 + 512 * 256 + 256 * D_OUT_PAD)
    weight_bytes = sum(int(a.size) * a.dtype.itemsize
                       for a in (w1, b1, w2, b2, w3, b3, w4, b4))
    bytes_accessed = int(x_p.size) * 2 + b_pad * D_OUT_PAD * 4 + weight_bytes

    out = pl.pallas_call(
        discriminator_kernel,
        out_shape=jax.ShapeDtypeStruct((b_pad, D_OUT_PAD), jnp.float32),
        grid=(b_pad // tb,),
        in_specs=[
            pl.BlockSpec((tb, D_IN_PAD), lambda i: (i, 0)),
            resident(w1), resident(b1),
            resident(w2), resident(b2),
            resident(w3), resident(b3),
            resident(w4), resident(b4),
        ],
        out_specs=pl.BlockSpec((tb, D_OUT_PAD), lambda i: (i, 0)),
        compiler_params=pltpu.CompilerParams(
            dimension_semantics=("parallel",),
            vmem_limit_bytes=32 << 20,
        ),
        cost_estimate=pl.CostEstimate(flops=flops,
                                      transcendentals=0,
                                      bytes_accessed=bytes_accessed),
    )(x_p, w1, b1, w2, b2, w3, b3, w4, b4)

    # Strip batch padding and the 128-wide lane padding of the final layer.
    return out[:B, :D_OUT]


def init_params(key):
    """Deterministic synthetic init mirroring weights_init:
       Linear weights ~ N(0, 0.02); biases ~ PyTorch default U(-1/sqrt(fan_in), ...)."""
    dims = [D_IN] + LAYER_SIZES + [D_OUT]
    params = []
    for d_in, d_out in zip(dims[:-1], dims[1:]):
        key, kw, kb = jax.random.split(key, 3)
        # Stored as (in, out) == transpose of PyTorch's (out, in) weight.
        w = 0.02 * jax.random.normal(kw, (d_in, d_out), dtype=jnp.float32)
        bound = 1.0 / jnp.sqrt(d_in)
        b = jax.random.uniform(kb, (1, d_out), dtype=jnp.float32,
                               minval=-bound, maxval=bound)
        params.append((w, b))
    return params


def reference_forward(x, params):
    """Pure-JAX f32 reference (matches the PyTorch module's math)."""
    h = x.reshape(x.shape[0], -1)
    for i, (w, b) in enumerate(params):
        h = h @ w + b
        if i < len(params) - 1:
            h = jnp.where(h > 0, h, NEG_SLOPE * h)
    return h


if __name__ == "__main__":
    key = jax.random.PRNGKey(0)
    key, kx1, kx2 = jax.random.split(key, 3)
    params = init_params(key)

    # Small case (matches PyTorch usage: NCHW MNIST-like images).
    B = 2
    x = jax.random.normal(kx1, (B, 1, 28, 28), dtype=jnp.float32)
    out = jax.block_until_ready(discriminator_forward(x, params))
    ref = reference_forward(x, params)
    assert out.shape == (B, D_OUT), out.shape
    assert jnp.allclose(out, ref, atol=2e-2, rtol=2e-2), (out, ref)

    # Multi-tile case: exercises the batch grid, ragged-batch padding and
    # resident-weight path (b_pad = 384, grid = (3,) with block_b=128).
    B2 = 300
    x2 = jax.random.normal(kx2, (B2, 1, 28, 28), dtype=jnp.float32)
    out2 = jax.block_until_ready(discriminator_forward(x2, params, block_b=128))
    ref2 = reference_forward(x2, params)
    assert out2.shape == (B2, D_OUT), out2.shape
    assert jnp.allclose(out2, ref2, atol=2e-2, rtol=2e-2)

    print("KERNEL_OK")
</pallas_src>

<mosaic_0001>
module attributes {stable_mosaic.version = 11 : i64} {
  func.func @discriminator_kernel(%arg0: i32, %arg1: memref<8x896xbf16, #tpu.memory_space<vmem>>, %arg2: memref<896x1024xbf16, #tpu.memory_space<vmem>>, %arg3: memref<1x1024xf32, #tpu.memory_space<vmem>>, %arg4: memref<1024x512xbf16, #tpu.memory_space<vmem>>, %arg5: memref<1x512xf32, #tpu.memory_space<vmem>>, %arg6: memref<512x256xbf16, #tpu.memory_space<vmem>>, %arg7: memref<1x256xf32, #tpu.memory_space<vmem>>, %arg8: memref<256x128xbf16, #tpu.memory_space<vmem>>, %arg9: memref<1x128xf32, #tpu.memory_space<vmem>>, %arg10: memref<8x128xf32, #tpu.memory_space<vmem>>) attributes {dimension_semantics = [#tpu.dimension_semantics<parallel>], iteration_bounds = array<i64: 1>, scalar_prefetch = 0 : i64, scratch_operands = 0 : i64, tpu.core_type = #tpu.core_type<tc>, window_params = [{transform_indices = @transform_0, window_bounds = array<i64: 8, 896>}, {pipeline_mode = #tpu.pipeline_mode<synchronous>, transform_indices = @transform_1, window_bounds = array<i64: 896, 1024>}, {pipeline_mode = #tpu.pipeline_mode<synchronous>, transform_indices = @transform_2, window_bounds = array<i64: 1, 1024>}, {pipeline_mode = #tpu.pipeline_mode<synchronous>, transform_indices = @transform_3, window_bounds = array<i64: 1024, 512>}, {pipeline_mode = #tpu.pipeline_mode<synchronous>, transform_indices = @transform_4, window_bounds = array<i64: 1, 512>}, {pipeline_mode = #tpu.pipeline_mode<synchronous>, transform_indices = @transform_5, window_bounds = array<i64: 512, 256>}, {pipeline_mode = #tpu.pipeline_mode<synchronous>, transform_indices = @transform_6, window_bounds = array<i64: 1, 256>}, {pipeline_mode = #tpu.pipeline_mode<synchronous>, transform_indices = @transform_7, window_bounds = array<i64: 256, 128>}, {pipeline_mode = #tpu.pipeline_mode<synchronous>, transform_indices = @transform_8, window_bounds = array<i64: 1, 128>}, {transform_indices = @transform_9, window_bounds = array<i64: 8, 128>}]} {
    %c0 = arith.constant 0 : index
    %c0_0 = arith.constant 0 : index
    %0 = vector.load %arg1[%c0, %c0_0] : memref<8x896xbf16, #tpu.memory_space<vmem>>, vector<8x896xbf16>
    %c0_1 = arith.constant 0 : index
    %c0_2 = arith.constant 0 : index
    %1 = vector.load %arg2[%c0_1, %c0_2] : memref<896x1024xbf16, #tpu.memory_space<vmem>>, vector<896x1024xbf16>
    %cst = arith.constant dense<0.000000e+00> : vector<8x1024xf32>
    %2 = tpu.matmul %0, %1, %cst {dimension_numbers = #tpu.dot_dimension_numbers<[1], [0], [0], [1], [0, 0, 1, 1], [], []>} : vector<8x896xbf16>, vector<896x1024xbf16>, vector<8x1024xf32> -> vector<8x1024xf32>
    %c0_3 = arith.constant 0 : index
    %c0_4 = arith.constant 0 : index
    %3 = vector.load %arg3[%c0_3, %c0_4] : memref<1x1024xf32, #tpu.memory_space<vmem>>, vector<1x1024xf32>
    %4 = vector.broadcast %3 : vector<1x1024xf32> to vector<8x1024xf32>
    %5 = arith.addf %2, %4 : vector<8x1024xf32>
    %cst_5 = arith.constant 0.000000e+00 : f32
    %6 = vector.broadcast %cst_5 : f32 to vector<8x1024xf32>
    %7 = arith.cmpf ogt, %5, %6 : vector<8x1024xf32>
    %cst_6 = arith.constant 2.000000e-01 : f32
    %8 = vector.broadcast %cst_6 : f32 to vector<8x1024xf32>
    %9 = arith.mulf %8, %5 : vector<8x1024xf32>
    %10 = arith.select %7, %5, %9 : vector<8x1024xi1>, vector<8x1024xf32>
    %11 = arith.truncf %10 : vector<8x1024xf32> to vector<8x1024xbf16>
    %c0_7 = arith.constant 0 : index
    %c0_8 = arith.constant 0 : index
    %12 = vector.load %arg4[%c0_7, %c0_8] : memref<1024x512xbf16, #tpu.memory_space<vmem>>, vector<1024x512xbf16>
    %cst_9 = arith.constant dense<0.000000e+00> : vector<8x512xf32>
    %13 = tpu.matmul %11, %12, %cst_9 {dimension_numbers = #tpu.dot_dimension_numbers<[1], [0], [0], [1], [0, 0, 1, 1], [], []>} : vector<8x1024xbf16>, vector<1024x512xbf16>, vector<8x512xf32> -> vector<8x512xf32>
    %c0_10 = arith.constant 0 : index
    %c0_11 = arith.constant 0 : index
    %14 = vector.load %arg5[%c0_10, %c0_11] : memref<1x512xf32, #tpu.memory_space<vmem>>, vector<1x512xf32>
    %15 = vector.broadcast %14 : vector<1x512xf32> to vector<8x512xf32>
    %16 = arith.addf %13, %15 : vector<8x512xf32>
    %cst_12 = arith.constant 0.000000e+00 : f32
    %17 = vector.broadcast %cst_12 : f32 to vector<8x512xf32>
    %18 = arith.cmpf ogt, %16, %17 : vector<8x512xf32>
    %cst_13 = arith.constant 2.000000e-01 : f32
    %19 = vector.broadcast %cst_13 : f32 to vector<8x512xf32>
    %20 = arith.mulf %19, %16 : vector<8x512xf32>
    %21 = arith.select %18, %16, %20 : vector<8x512xi1>, vector<8x512xf32>
    %22 = arith.truncf %21 : vector<8x512xf32> to vector<8x512xbf16>
    %c0_14 = arith.constant 0 : index
    %c0_15 = arith.constant 0 : index
    %23 = vector.load %arg6[%c0_14, %c0_15] : memref<512x256xbf16, #tpu.memory_space<vmem>>, vector<512x256xbf16>
    %cst_16 = arith.constant dense<0.000000e+00> : vector<8x256xf32>
    %24 = tpu.matmul %22, %23, %cst_16 {dimension_numbers = #tpu.dot_dimension_numbers<[1], [0], [0], [1], [0, 0, 1, 1], [], []>} : vector<8x512xbf16>, vector<512x256xbf16>, vector<8x256xf32> -> vector<8x256xf32>
    %c0_17 = arith.constant 0 : index
    %c0_18 = arith.constant 0 : index
    %25 = vector.load %arg7[%c0_17, %c0_18] : memref<1x256xf32, #tpu.memory_space<vmem>>, vector<1x256xf32>
    %26 = vector.broadcast %25 : vector<1x256xf32> to vector<8x256xf32>
    %27 = arith.addf %24, %26 : vector<8x256xf32>
    %cst_19 = arith.constant 0.000000e+00 : f32
    %28 = vector.broadcast %cst_19 : f32 to vector<8x256xf32>
    %29 = arith.cmpf ogt, %27, %28 : vector<8x256xf32>
    %cst_20 = arith.constant 2.000000e-01 : f32
    %30 = vector.broadcast %cst_20 : f32 to vector<8x256xf32>
    %31 = arith.mulf %30, %27 : vector<8x256xf32>
    %32 = arith.select %29, %27, %31 : vector<8x256xi1>, vector<8x256xf32>
    %33 = arith.truncf %32 : vector<8x256xf32> to vector<8x256xbf16>
    %c0_21 = arith.constant 0 : index
    %c0_22 = arith.constant 0 : index
    %34 = vector.load %arg8[%c0_21, %c0_22] : memref<256x128xbf16, #tpu.memory_space<vmem>>, vector<256x128xbf16>
    %cst_23 = arith.constant dense<0.000000e+00> : vector<8x128xf32>
    %35 = tpu.matmul %33, %34, %cst_23 {dimension_numbers = #tpu.dot_dimension_numbers<[1], [0], [0], [1], [0, 0, 1, 1], [], []>} : vector<8x256xbf16>, vector<256x128xbf16>, vector<8x128xf32> -> vector<8x128xf32>
    %c0_24 = arith.constant 0 : index
    %c0_25 = arith.constant 0 : index
    %36 = vector.load %arg9[%c0_24, %c0_25] : memref<1x128xf32, #tpu.memory_space<vmem>>, vector<1x128xf32>
    %37 = vector.broadcast %36 : vector<1x128xf32> to vector<8x128xf32>
    %38 = arith.addf %35, %37 : vector<8x128xf32>
    %c0_26 = arith.constant 0 : index
    %c0_27 = arith.constant 0 : index
    %39 = vector.load %arg10[%c0_26, %c0_27] : memref<8x128xf32, #tpu.memory_space<vmem>>, vector<8x128xf32>
    tpu.vector_store %arg10[%c0_26, %c0_27], %38 {strides = array<i32>} : memref<8x128xf32, #tpu.memory_space<vmem>>, vector<8x128xf32>,
    return
  }
  func.func @transform_0(%arg0: i32) -> (i32, i32) {
    %c0_i32 = arith.constant 0 : i32
    %c0_i32_0 = arith.constant 0 : i32
    return %arg0, %c0_i32 : i32, i32
  }
  func.func @transform_1(%arg0: i32) -> (i32, i32) {
    %c0_i32 = arith.constant 0 : i32
    %c0_i32_0 = arith.constant 0 : i32
    %c0_i32_1 = arith.constant 0 : i32
    return %c0_i32, %c0_i32_0 : i32, i32
  }
  func.func @transform_2(%arg0: i32) -> (i32, i32) {
    %c0_i32 = arith.constant 0 : i32
    %c0_i32_0 = arith.constant 0 : i32
    %c0_i32_1 = arith.constant 0 : i32
    return %c0_i32, %c0_i32_0 : i32, i32
  }
  func.func @transform_3(%arg0: i32) -> (i32, i32) {
    %c0_i32 = arith.constant 0 : i32
    %c0_i32_0 = arith.constant 0 : i32
    %c0_i32_1 = arith.constant 0 : i32
    return %c0_i32, %c0_i32_0 : i32, i32
  }
  func.func @transform_4(%arg0: i32) -> (i32, i32) {
    %c0_i32 = arith.constant 0 : i32
    %c0_i32_0 = arith.constant 0 : i32
    %c0_i32_1 = arith.constant 0 : i32
    return %c0_i32, %c0_i32_0 : i32, i32
  }
  func.func @transform_5(%arg0: i32) -> (i32, i32) {
    %c0_i32 = arith.constant 0 : i32
    %c0_i32_0 = arith.constant 0 : i32
    %c0_i32_1 = arith.constant 0 : i32
    return %c0_i32, %c0_i32_0 : i32, i32
  }
  func.func @transform_6(%arg0: i32) -> (i32, i32) {
    %c0_i32 = arith.constant 0 : i32
    %c0_i32_0 = arith.constant 0 : i32
    %c0_i32_1 = arith.constant 0 : i32
    return %c0_i32, %c0_i32_0 : i32, i32
  }
  func.func @transform_7(%arg0: i32) -> (i32, i32) {
    %c0_i32 = arith.constant 0 : i32
    %c0_i32_0 = arith.constant 0 : i32
    %c0_i32_1 = arith.constant 0 : i32
    return %c0_i32, %c0_i32_0 : i32, i32
  }
  func.func @transform_8(%arg0: i32) -> (i32, i32) {
    %c0_i32 = arith.constant 0 : i32
    %c0_i32_0 = arith.constant 0 : i32
    %c0_i32_1 = arith.constant 0 : i32
    return %c0_i32, %c0_i32_0 : i32, i32
  }
  func.func @transform_9(%arg0: i32) -> (i32, i32) {
    %c0_i32 = arith.constant 0 : i32
    %c0_i32_0 = arith.constant 0 : i32
    return %arg0, %c0_i32 : i32, i32
  }
}

</mosaic_0001>

<bundles_post_ra>
// kernel: tpu_custom_call.1
= control target key start
LH: loop header
LB: loop body
LE: loop exit
PB: predicated region body
PF: predicated region fallthrough
CT: control target
= control target key end

     0   :  { %14 = vsyncpa [#allocation3], 0  ;;  %s8171_s0 = inlined_call_operand.hbm [shape: bf16[8,896], index: 0, kind: input, shape index: {}]   ;;  %s8172_s1 = inlined_call_operand.hbm [shape: bf16[896,1024], index: 1, kind: input, shape index: {}]   ;;  %s8173_s2 = inlined_call_operand.hbm [shape: f32[1,1024], index: 2, kind: input, shape index: {}]   ;;  %s8174_s3 = inlined_call_operand.hbm [shape: bf16[1024,512], index: 3, kind: input, shape index: {}]   ;;  %s8175_s4 = inlined_call_operand.hbm [shape: f32[1,512], index: 4, kind: input, shape index: {}]   ;;  %s8176_s5 = inlined_call_operand.hbm [shape: bf16[512,256], index: 5, kind: input, shape index: {}]   ;;  %s8177_s6 = inlined_call_operand.hbm [shape: f32[1,256], index: 6, kind: input, shape index: {}]   ;;  %s8178_s7 = inlined_call_operand.hbm [shape: bf16[256,128], index: 7, kind: input, shape index: {}]   ;;  %s8179_s8 = inlined_call_operand.hbm [shape: f32[1,128], index: 8, kind: input, shape index: {}]   ;;  %s8180_s9 = inlined_call_operand.hbm [shape: f32[8,128], index: 9, kind: output, shape index: {}]  }
   0x1   :  { %15 = vsyncpa [#allocation6], 0 }
   0x2   :  { %16 = vsyncpa [#allocation9], 0 }
   0x3   :  { %17 = vsyncpa [#allocation12], 0 }
   0x4   :  { %18 = vsyncpa [#allocation15], 0 }
   0x5   :  { %19 = vsyncpa [#allocation4], 0  ;;  %s7835_s30 = smov [#allocation5]   ;;  %s7603_s13 = scalar_lea.hbm %s8172_s1, 57344 }
   0x6   :  { %s35_s10 = sshll.u32 %s7835_s30, 4  ;;  %p7604_p0 = scmp.ne.s32.totalorder %s8172_s1, %s7603_s13  ;;  %s36_s10 = int_to_ptr.vmem [resolvable:$true] %s35_s10 }
   0x7   :  { %p7607_p1 = scmp.lt.u32.totalorder %s7603_s13, %s8172_s1 }
   0x9   :  { %p7609_p2 = pnand %p7607_p1, %p7604_p0 }
   0xb   :  { %7612 = shalt.err (!%p7609_p2)
}
   0xc   :  { %s7613_s18 = scalar_lea.vmem %s36_s10, 57344  ;;  %p7618_p4 = scmp.lt.s32.totalorder %s36_s10, %s36_s10 }
   0xd   :  { %p7614_p3 = scmp.ne.s32.totalorder %s36_s10, %s7613_s18  ;;  %p7619_p5 = scmp.lt.s32.totalorder %s7613_s18, %s7613_s18 }
   0xf   :  { %p7620_p6 = por %p7619_p5, %p7618_p4 }
  0x11   :  { %p7621_p7 = pnand %p7620_p6, %p7614_p3 }
  0x13   :  { %7624 = shalt.err (!%p7621_p7)
}
  0x14   :  { %s7836_s19 = smov 512   ;;  %s7837_s20 = smov 32  }
  0x15   :  { %41 = dma.hbm_to_vmem [thread:$0]  %s8172_s1, 57344, %s36_s10, [#allocation6], %s7836_s19, %s7836_s19, %s7837_s20  }
  0x16   :  { %s7838_s23 = smov [#allocation8]   ;;  %s7625_s27 = scalar_lea.hbm %s8174_s3, 32768 }
  0x17   :  { %s57_s24 = sshll.u32 %s7838_s23, 4  ;;  %p7626_p8 = scmp.ne.s32.totalorder %s8174_s3, %s7625_s27  ;;  %s58_s24 = int_to_ptr.vmem [resolvable:$true] %s57_s24 }
  0x18   :  { %p7629_p9 = scmp.lt.u32.totalorder %s7625_s27, %s8174_s3 }
  0x1a   :  { %p7631_p10 = pnand %p7629_p9, %p7626_p8 }
  0x1c   :  { %7634 = shalt.err (!%p7631_p10)
}
  0x1d   :  { %s7635_s12 = scalar_lea.vmem %s58_s24, 32768  ;;  %p7640_p12 = scmp.lt.s32.totalorder %s58_s24, %s58_s24 }
  0x1e   :  { %p7636_p11 = scmp.ne.s32.totalorder %s58_s24, %s7635_s12  ;;  %p7641_p13 = scmp.lt.s32.totalorder %s7635_s12, %s7635_s12 }
  0x20   :  { %p7642_p0 = por %p7641_p13, %p7640_p12 }
  0x22   :  { %p7643_p1 = pnand %p7642_p0, %p7636_p11 }
  0x24   :  { %7646 = shalt.err (!%p7643_p1)
}
  0x25   :  { %s7839_s1 = smov 256   ;;  %s7840_s10 = smov 16  }
  0x26   :  { %63 = dma.hbm_to_vmem [thread:$0]  %s8174_s3, 32768, %s58_s24, [#allocation9], %s7839_s1, %s7839_s1, %s7840_s10  }
  0x27   :  { %s7841_s15 = smov [#allocation11]   ;;  %s7647_s19 = scalar_lea.hbm %s8176_s5, 8192 }
  0x28   :  { %s79_s16 = sshll.u32 %s7841_s15, 4  ;;  %p7648_p2 = scmp.ne.s32.totalorder %s8176_s5, %s7647_s19  ;;  %s80_s16 = int_to_ptr.vmem [resolvable:$true] %s79_s16 }
  0x29   :  { %p7651_p3 = scmp.lt.u32.totalorder %s7647_s19, %s8176_s5 }
  0x2b   :  { %p7653_p4 = pnand %p7651_p3, %p7648_p2 }
  0x2d   :  { %7656 = shalt.err (!%p7653_p4)
}
  0x2e   :  { %s7657_s25 = scalar_lea.vmem %s80_s16, 8192  ;;  %p7662_p6 = scmp.lt.s32.totalorder %s80_s16, %s80_s16 }
  0x2f   :  { %p7658_p5 = scmp.ne.s32.totalorder %s80_s16, %s7657_s25  ;;  %p7663_p7 = scmp.lt.s32.totalorder %s7657_s25, %s7657_s25 }
  0x31   :  { %p7664_p8 = por %p7663_p7, %p7662_p6 }
  0x33   :  { %p7665_p9 = pnand %p7664_p8, %p7658_p5 }
  0x35   :  { %7668 = shalt.err (!%p7665_p9)
}
  0x36   :  { %s7842_s3 = smov 128   ;;  %s7843_s24 = smov 8  }
  0x37   :  { %85 = dma.hbm_to_vmem [thread:$0]  %s8176_s5, 8192, %s80_s16, [#allocation12], %s7842_s3, %s7842_s3, %s7843_s24  }
  0x38   :  { %s7844_s28 = smov [#allocation14]   ;;  %s7669_s12 = scalar_lea.hbm %s8178_s7, 2048 }
  0x39   :  { %s101_s29 = sshll.u32 %s7844_s28, 4  ;;  %p7670_p10 = scmp.ne.s32.totalorder %s8178_s7, %s7669_s12  ;;  %s102_s29 = int_to_ptr.vmem [resolvable:$true] %s101_s29 }
  0x3a   :  { %p7673_p11 = scmp.lt.u32.totalorder %s7669_s12, %s8178_s7 }
  0x3c   :  { %p7675_p12 = pnand %p7673_p11, %p7670_p10 }
  0x3e   :  { %7678 = shalt.err (!%p7675_p12)
}
  0x3f   :  { %s7679_s15 = scalar_lea.vmem %s102_s29, 2048  ;;  %p7684_p0 = scmp.lt.s32.totalorder %s102_s29, %s102_s29 }
  0x40   :  { %p7680_p13 = scmp.ne.s32.totalorder %s102_s29, %s7679_s15  ;;  %p7685_p1 = scmp.lt.s32.totalorder %s7679_s15, %s7679_s15 }
  0x42   :  { %p7686_p2 = por %p7685_p1, %p7684_p0 }
  0x44   :  { %p7687_p3 = pnand %p7686_p2, %p7680_p13 }
  0x46   :  { %7690 = shalt.err (!%p7687_p3)
}
  0x47   :  { %s7845_s5 = smov 64   ;;  %s7846_s16 = smov 4  }
  0x48   :  { %107 = dma.hbm_to_vmem [thread:$0]  %s8178_s7, 2048, %s102_s29, [#allocation15], %s7845_s5, %s7845_s5, %s7846_s16  }
  0x49   :  { %s7847_s19 = smov [#allocation2]   ;;  %s7848_s21 = smov [#allocation7]  }
  0x4a   :  { %s26_s20 = sshll.u32 %s7847_s19, 4  ;;  %s48_s22 = sshll.u32 %s7848_s21, 4  ;;  %s27_s20 = int_to_ptr.vmem [resolvable:$true] %s26_s20  ;;  %s49_s22 = int_to_ptr.vmem [resolvable:$true] %s48_s22 }
  0x4b   :  { %s7691_s3 = scalar_lea.hbm %s8171_s0, 448 }
  0x4c   :  { %p7692_p4 = scmp.ne.s32.totalorder %s8171_s0, %s7691_s3  ;;  %p7695_p5 = scmp.lt.u32.totalorder %s7691_s3, %s8171_s0 }
  0x4e   :  { %p7697_p6 = pnand %p7695_p5, %p7692_p4 }
  0x50   :  { %7700 = shalt.err (!%p7697_p6)
}
  0x51   :  { %s7701_s7 = scalar_lea.vmem %s27_s20, 448  ;;  %p7706_p8 = scmp.lt.s32.totalorder %s27_s20, %s27_s20 }
  0x52   :  { %p7702_p7 = scmp.ne.s32.totalorder %s27_s20, %s7701_s7  ;;  %p7707_p9 = scmp.lt.s32.totalorder %s7701_s7, %s7701_s7 }
  0x54   :  { %p7708_p10 = por %p7707_p9, %p7706_p8 }
  0x56   :  { %p7709_p11 = pnand %p7708_p10, %p7702_p7 }
  0x58   :  { %7712 = shalt.err (!%p7709_p11)
}
  0x59   :  { %29 = dma.hbm_to_vmem [thread:$0]  %s8171_s0, 448, %s27_s20, [#allocation3]  }
  0x5a   :  { %s7713_s1 = scalar_lea.hbm %s8173_s2, 128 }
  0x5b   :  { %p7714_p12 = scmp.ne.s32.totalorder %s8173_s2, %s7713_s1  ;;  %p7717_p13 = scmp.lt.u32.totalorder %s7713_s1, %s8173_s2 }
  0x5d   :  { %p7719_p0 = pnand %p7717_p13, %p7714_p12 }
  0x5f   :  { %7722 = shalt.err (!%p7719_p0)
}
  0x60   :  { %s7723_s5 = scalar_lea.vmem %s49_s22, 128  ;;  %p7728_p2 = scmp.lt.s32.totalorder %s49_s22, %s49_s22 }
  0x61   :  { %p7724_p1 = scmp.ne.s32.totalorder %s49_s22, %s7723_s5  ;;  %p7729_p3 = scmp.lt.s32.totalorder %s7723_s5, %s7723_s5 }
  0x63   :  { %p7730_p4 = por %p7729_p3, %p7728_p2 }
  0x65   :  { %p7731_p5 = pnand %p7730_p4, %p7724_p1 }
  0x67   :  { %7734 = shalt.err (!%p7731_p5)
}
  0x68   :  { %51 = dma.hbm_to_vmem [thread:$0]  %s8173_s2, 128, %s49_s22, [#allocation6]  }
  0x69   :  { %s7849_s17 = smov [#allocation10]   ;;  %s7850_s19 = smov [#allocation13]  }
  0x6a   :  { %s70_s18 = sshll.u32 %s7849_s17, 4  ;;  %s92_s20 = sshll.u32 %s7850_s19, 4  ;;  %s71_s18 = int_to_ptr.vmem [resolvable:$true] %s70_s18  ;;  %s93_s20 = int_to_ptr.vmem [resolvable:$true] %s92_s20 }
  0x6b   :  { %s7735_s25 = scalar_lea.hbm %s8175_s4, 64 }
  0x6c   :  { %p7736_p6 = scmp.ne.s32.totalorder %s8175_s4, %s7735_s25  ;;  %p7739_p7 = scmp.lt.u32.totalorder %s7735_s25, %s8175_s4 }
  0x6e   :  { %p7741_p8 = pnand %p7739_p7, %p7736_p6 }
  0x70   :  { %7744 = shalt.err (!%p7741_p8)
}
  0x71   :  { %s7745_s2 = scalar_lea.vmem %s71_s18, 64  ;;  %p7750_p10 = scmp.lt.s32.totalorder %s71_s18, %s71_s18 }
  0x72   :  { %p7746_p9 = scmp.ne.s32.totalorder %s71_s18, %s7745_s2  ;;  %p7751_p11 = scmp.lt.s32.totalorder %s7745_s2, %s7745_s2 }
  0x74   :  { %p7752_p12 = por %p7751_p11, %p7750_p10 }
  0x76   :  { %p7753_p13 = pnand %p7752_p12, %p7746_p9 }
  0x78   :  { %7756 = shalt.err (!%p7753_p13)
}
  0x79   :  { %73 = dma.hbm_to_vmem [thread:$0]  %s8175_s4, 64, %s71_s18, [#allocation9]  }
  0x7a   :  { %s7757_s30 = scalar_lea.hbm %s8177_s6, 32 }
  0x7b   :  { %p7758_p0 = scmp.ne.s32.totalorder %s8177_s6, %s7757_s30  ;;  %p7761_p1 = scmp.lt.u32.totalorder %s7757_s30, %s8177_s6 }
  0x7d   :  { %p7763_p2 = pnand %p7761_p1, %p7758_p0 }
  0x7f   :  { %7766 = shalt.err (!%p7763_p2)
}
  0x80   :  { %s7767_s13 = scalar_lea.vmem %s93_s20, 32  ;;  %p7772_p4 = scmp.lt.s32.totalorder %s93_s20, %s93_s20 }
  0x81   :  { %p7768_p3 = scmp.ne.s32.totalorder %s93_s20, %s7767_s13  ;;  %p7773_p5 = scmp.lt.s32.totalorder %s7767_s13, %s7767_s13 }
  0x83   :  { %p7774_p6 = por %p7773_p5, %p7772_p4 }
  0x85   :  { %p7775_p7 = pnand %p7774_p6, %p7768_p3 }
  0x87   :  { %7778 = shalt.err (!%p7775_p7)
}
  0x88   :  { %95 = dma.hbm_to_vmem [thread:$0]  %s8177_s6, 32, %s93_s20, [#allocation12]  }
  0x89   :  { %s7851_s15 = smov [#allocation16]   ;;  %s7779_s17 = scalar_lea.hbm %s8179_s8, 16 }
  0x8a   :  { %s114_s5 = sshll.u32 %s7851_s15, 4  ;;  %p7780_p8 = scmp.ne.s32.totalorder %s8179_s8, %s7779_s17  ;;  %s115_s5 = int_to_ptr.vmem [resolvable:$true] %s114_s5 }
  0x8b   :  { %p7783_p9 = scmp.lt.u32.totalorder %s7779_s17, %s8179_s8 }
  0x8d   :  { %p7785_p10 = pnand %p7783_p9, %p7780_p8 }
  0x8f   :  { %7788 = shalt.err (!%p7785_p10)
}
  0x90   :  { %s7789_s25 = scalar_lea.vmem %s115_s5, 16  ;;  %s7793_s6 = scalar_lea.vmem %s115_s5, 32 }
  0x91   :  { %p7790_p11 = scmp.ne.s32.totalorder %s115_s5, %s7789_s25  ;;  %p7794_p12 = scmp.lt.s32.totalorder %s115_s5, %s115_s5 }
  0x92   :  { %p7795_p13 = scmp.lt.s32.totalorder %s7793_s6, %s7789_s25 }
  0x94   :  { %p7796_p0 = por %p7795_p13, %p7794_p12 }
  0x96   :  { %p7797_p1 = pnand %p7796_p0, %p7790_p11 }
  0x98   :  { %7800 = shalt.err (!%p7797_p1)
}
  0x99   :  { %117 = dma.hbm_to_vmem [thread:$0]  %s8179_s8, 16, %s115_s5, [#allocation15]  }
  0x9a   :  { %7823 = dma.done.wait [#allocation3], 448  }
  0x9b   :  { %7824 = vsyncadd [#allocation3], 4294966848 }
  0x9c   :  { %7825 = dma.done.wait [#allocation6], 57472  }
  0x9d   :  { %7826 = vsyncadd [#allocation6], 4294909824 }
  0x9e   :  { %7827 = dma.done.wait [#allocation9], 32832  }
  0x9f   :  { %7828 = vsyncadd [#allocation9], 4294934464 }
  0xa0   :  { %7829 = dma.done.wait [#allocation12], 8224  }
  0xa1   :  { %7830 = vsyncadd [#allocation12], 4294959072 }
  0xa2   :  { %7831 = dma.done.wait [#allocation15], 2064  }
  0xa3   :  { %7832 = vsyncadd [#allocation15], 4294965232  ;;  %v150_v0 = vld [vmem:[#allocation5] sm:$0xff]  ;;  %v8014_v54 = vld [vmem:[#allocation2 + $0x8] sm:$0xff]  ;;  %s7853_s8 = smov [#allocation17]  }
  0xa4   :  { %v154_v1 = vld [vmem:[#allocation5 + $0x20] sm:$0xff]  ;;  %v8022_v61 = vcombine.high %v8014_v54, %v8014_v54  ;;  %s6163_s24 = sshll.u32 %s7853_s8, 4  ;;  %s6164_s24 = int_to_ptr.vmem [resolvable:$true] %s6163_s24 }
  0xa5   :  { %v278_v2 = vld [vmem:[#allocation5 + $0x400] sm:$0xff]  ;;  %v6184_v3 = vcombine.high %v150_v0, %v154_v1  ;;  %v6183_v5 = vcombine.low %v150_v0, %v154_v1  ;;  %s7801_s26 = scalar_lea.vmem %s6164_s24, 128  ;;  %p7806_p3 = scmp.lt.s32.totalorder %s6164_s24, %s6164_s24 }
  0xa6   :  { %v282_v4 = vld [vmem:[#allocation5 + $0x420] sm:$0xff]  ;;  %2978 = vmatprep.mubr.bf16.mxu0 %v8022_v61  ;;  %p7802_p2 = scmp.ne.s32.totalorder %s6164_s24, %s7801_s26  ;;  %p7807_p4 = scmp.lt.s32.totalorder %s7801_s26, %s7801_s26 }
  0xa7   :  { %v158_v6 = vld [vmem:[#allocation5 + $0x40] sm:$0xff]  ;;  %v6312_v8 = vcombine.high %v278_v2, %v282_v4  ;;  %v6311_v9 = vcombine.low %v278_v2, %v282_v4  ;;  %2905 = vmatprep.subr.bf16.mxu1 %v6184_v3 }
  0xa8   :  { %v162_v7 = vld [vmem:[#allocation5 + $0x60] sm:$0xff]  ;;  %2906 = vmatpush1.bf16.msra.mxu1 %v6183_v5  ;;  %p7808_p5 = por %p7807_p4, %p7806_p3 }
  0xa9   :  { %v6192_v10 = vcombine.high %v158_v6, %v162_v7  ;;  %v286_v11 = vld [vmem:[#allocation5 + $0x440] sm:$0xff]  ;;  %2946 = vmatprep.subr.bf16.mxu0 %v6312_v8  ;;  %v6191_v18 = vcombine.low %v158_v6, %v162_v7 }
  0xaa   :  { %v290_v12 = vld [vmem:[#allocation5 + $0x460] sm:$0xff]  ;;  %2947 = vmatpush1.bf16.msra.mxu0 %v6311_v9  ;;  %p7809_p6 = pnand %p7808_p5, %p7802_p2 }
  0xab   :  { %v166_v13 = vld [vmem:[#allocation5 + $0x80] sm:$0xff]  ;;  %v6320_v14 = vcombine.high %v286_v11, %v290_v12  ;;  %2907 = vmatprep.subr.bf16.mxu1 %v6192_v10  ;;  %v6319_v19 = vcombine.low %v286_v11, %v290_v12 }
  0xac   :  { %v170_v15 = vld [vmem:[#allocation5 + $0xa0] sm:$0xff]  ;;  %2908 = vmatpush1.bf16.msra.mxu1 %v6191_v18 }
  0xad   :  { %v294_v16 = vld [vmem:[#allocation5 + $0x480] sm:$0xff]  ;;  %v6200_v20 = vcombine.high %v166_v13, %v170_v15  ;;  %2948 = vmatprep.subr.bf16.mxu0 %v6320_v14  ;;  %v6199_v26 = vcombine.low %v166_v13, %v170_v15 }
  0xae   :  { %v298_v17 = vld [vmem:[#allocation5 + $0x4a0] sm:$0xff]  ;;  %2949 = vmatpush1.bf16.msra.mxu0 %v6319_v19 }
  0xaf   :  { %v6328_v21 = vcombine.high %v294_v16, %v298_v17  ;;  %v174_v22 = vld [vmem:[#allocation5 + $0xc0] sm:$0xff]  ;;  %2909 = vmatprep.subr.bf16.mxu1 %v6200_v20  ;;  %v6327_v27 = vcombine.low %v294_v16, %v298_v17 }
  0xb0   :  { %v178_v23 = vld [vmem:[#allocation5 + $0xe0] sm:$0xff]  ;;  %2910 = vmatpush1.bf16.msra.mxu1 %v6199_v26 }
  0xb1   :  { %v302_v24 = vld [vmem:[#allocation5 + $0x4c0] sm:$0xff]  ;;  %v6208_v28 = vcombine.high %v174_v22, %v178_v23  ;;  %2950 = vmatprep.subr.bf16.mxu0 %v6328_v21  ;;  %v6207_v34 = vcombine.low %v174_v22, %v178_v23 }
  0xb2   :  { %v306_v25 = vld [vmem:[#allocation5 + $0x4e0] sm:$0xff]  ;;  %2951 = vmatpush1.bf16.msra.mxu0 %v6327_v27 }
  0xb3   :  { %v6336_v29 = vcombine.high %v302_v24, %v306_v25  ;;  %v182_v30 = vld [vmem:[#allocation5 + $0x100] sm:$0xff]  ;;  %2911 = vmatprep.subr.bf16.mxu1 %v6208_v28  ;;  %v6335_v35 = vcombine.low %v302_v24, %v306_v25 }
  0xb4   :  { %v186_v31 = vld [vmem:[#allocation5 + $0x120] sm:$0xff]  ;;  %2912 = vmatpush1.bf16.msra.mxu1 %v6207_v34 }
  0xb5   :  { %v310_v32 = vld [vmem:[#allocation5 + $0x500] sm:$0xff]  ;;  %v6216_v36 = vcombine.high %v182_v30, %v186_v31  ;;  %2952 = vmatprep.subr.bf16.mxu0 %v6336_v29  ;;  %v6215_v42 = vcombine.low %v182_v30, %v186_v31 }
  0xb6   :  { %v314_v33 = vld [vmem:[#allocation5 + $0x520] sm:$0xff]  ;;  %2953 = vmatpush1.bf16.msra.mxu0 %v6335_v35 }
  0xb7   :  { %v6344_v37 = vcombine.high %v310_v32, %v314_v33  ;;  %v190_v38 = vld [vmem:[#allocation5 + $0x140] sm:$0xff]  ;;  %2913 = vmatprep.subr.bf16.mxu1 %v6216_v36  ;;  %v6343_v43 = vcombine.low %v310_v32, %v314_v33 }
  0xb8   :  { %v194_v39 = vld [vmem:[#allocation5 + $0x160] sm:$0xff]  ;;  %2914 = vmatpush1.bf16.msra.mxu1 %v6215_v42 }
  0xb9   :  { %v318_v40 = vld [vmem:[#allocation5 + $0x540] sm:$0xff]  ;;  %v6224_v44 = vcombine.high %v190_v38, %v194_v39  ;;  %2954 = vmatprep.subr.bf16.mxu0 %v6344_v37  ;;  %v6223_v50 = vcombine.low %v190_v38, %v194_v39 }
  0xba   :  { %v322_v41 = vld [vmem:[#allocation5 + $0x560] sm:$0xff]  ;;  %2955 = vmatpush1.bf16.msra.mxu0 %v6343_v43 }
  0xbb   :  { %v6352_v45 = vcombine.high %v318_v40, %v322_v41  ;;  %v198_v46 = vld [vmem:[#allocation5 + $0x180] sm:$0xff]  ;;  %2915 = vmatprep.subr.bf16.mxu1 %v6224_v44  ;;  %v6351_v51 = vcombine.low %v318_v40, %v322_v41 }
  0xbc   :  { %v202_v47 = vld [vmem:[#allocation5 + $0x1a0] sm:$0xff]  ;;  %2916 = vmatpush1.bf16.msra.mxu1 %v6223_v50 }
  0xbd   :  { %v326_v48 = vld [vmem:[#allocation5 + $0x580] sm:$0xff]  ;;  %v6232_v52 = vcombine.high %v198_v46, %v202_v47  ;;  %2956 = vmatprep.subr.bf16.mxu0 %v6352_v45  ;;  %v6231_v62 = vcombine.low %v198_v46, %v202_v47 }
  0xbe   :  { %v330_v49 = vld [vmem:[#allocation5 + $0x5a0] sm:$0xff]  ;;  %2957 = vmatpush1.bf16.msra.mxu0 %v6351_v51 }
  0xbf   :  { %v8012_v53 = vld [vmem:[#allocation2] sm:$0xff]  ;;  %v6360_v55 = vcombine.high %v326_v48, %v330_v49  ;;  %2917 = vmatprep.subr.bf16.mxu1 %v6232_v52  ;;  %v6359_v63 = vcombine.low %v326_v48, %v330_v49 }
  0xc0   :  { %v206_v56 = vld [vmem:[#allocation5 + $0x1c0] sm:$0xff]  ;;  %v8018_v58 = vcombine.high %v8012_v53, %v8012_v53  ;;  %2918 = vmatpush1.bf16.msra.mxu1 %v6231_v62 }
  0xc1   :  { %v210_v57 = vld [vmem:[#allocation5 + $0x1e0] sm:$0xff]  ;;  %2958 = vmatprep.subr.bf16.mxu0 %v6360_v55 }
  0xc2   :  { %v334_v59 = vld [vmem:[#allocation5 + $0x5c0] sm:$0xff]  ;;  %2937 = vmatprep.mubr.bf16.mxu1 %v8018_v58  ;;  %v6240_v0 = vcombine.high %v206_v56, %v210_v57  ;;  %v6239_v6 = vcombine.low %v206_v56, %v210_v57  ;;  %2959 = vmatpush1.bf16.msra.mxu0 %v6359_v63 }
  0xc3   :  { %v338_v60 = vld [vmem:[#allocation5 + $0x5e0] sm:$0xff] }
  0xc4   :  { %v6368_v1 = vcombine.high %v334_v59, %v338_v60  ;;  %v214_v2 = vld [vmem:[#allocation5 + $0x200] sm:$0xff]  ;;  %2919 = vmatprep.subr.bf16.mxu1 %v6240_v0  ;;  %v6367_v7 = vcombine.low %v334_v59, %v338_v60 }
  0xc5   :  { %v218_v3 = vld [vmem:[#allocation5 + $0x220] sm:$0xff]  ;;  %2920 = vmatpush1.bf16.msra.mxu1 %v6239_v6  ;;  %v151_v6 = vld [vmem:[#allocation5 + $0x8] sm:$0xff] }
  0xc6   :  { %v342_v4 = vld [vmem:[#allocation5 + $0x600] sm:$0xff]  ;;  %v6248_v8 = vcombine.high %v214_v2, %v218_v3  ;;  %2960 = vmatprep.subr.bf16.mxu0 %v6368_v1  ;;  %v6247_v14 = vcombine.low %v214_v2, %v218_v3 }
  0xc7   :  { %v346_v5 = vld [vmem:[#allocation5 + $0x620] sm:$0xff]  ;;  %2961 = vmatpush1.bf16.msra.mxu0 %v6367_v7  ;;  %v155_v7 = vld [vmem:[#allocation5 + $0x28] sm:$0xff] }
  0xc8   :  { %v6376_v9 = vcombine.high %v342_v4, %v346_v5  ;;  %v222_v10 = vld [vmem:[#allocation5 + $0x240] sm:$0xff]  ;;  %2921 = vmatprep.subr.bf16.mxu1 %v6248_v8  ;;  %v6375_v15 = vcombine.low %v342_v4, %v346_v5 }
  0xc9   :  { %v226_v11 = vld [vmem:[#allocation5 + $0x260] sm:$0xff]  ;;  %2922 = vmatpush1.bf16.msra.mxu1 %v6247_v14  ;;  %v159_v14 = vld [vmem:[#allocation5 + $0x48] sm:$0xff] }
  0xca   :  { %v350_v12 = vld [vmem:[#allocation5 + $0x640] sm:$0xff]  ;;  %v6256_v16 = vcombine.high %v222_v10, %v226_v11  ;;  %2962 = vmatprep.subr.bf16.mxu0 %v6376_v9  ;;  %v6255_v22 = vcombine.low %v222_v10, %v226_v11 }
  0xcb   :  { %v354_v13 = vld [vmem:[#allocation5 + $0x660] sm:$0xff]  ;;  %2963 = vmatpush1.bf16.msra.mxu0 %v6375_v15  ;;  %v163_v15 = vld [vmem:[#allocation5 + $0x68] sm:$0xff] }
  0xcc   :  { %v6384_v17 = vcombine.high %v350_v12, %v354_v13  ;;  %v230_v18 = vld [vmem:[#allocation5 + $0x280] sm:$0xff]  ;;  %2923 = vmatprep.subr.bf16.mxu1 %v6256_v16  ;;  %v6383_v23 = vcombine.low %v350_v12, %v354_v13  ;;  %v6186_v12 = vcombine.high %v151_v6, %v155_v7  ;;  %v8028_v16 = vcombine.low %v8012_v53, %v8012_v53  ;;  %v167_v53 = vld [vmem:[#allocation5 + $0x88] sm:$0xff] }
  0xcd   :  { %v234_v19 = vld [vmem:[#allocation5 + $0x2a0] sm:$0xff]  ;;  %2924 = vmatpush1.bf16.msra.mxu1 %v6255_v22 }
  0xce   :  { %v358_v20 = vld [vmem:[#allocation5 + $0x680] sm:$0xff]  ;;  %v6264_v24 = vcombine.high %v230_v18, %v234_v19  ;;  %2964 = vmatprep.subr.bf16.mxu0 %v6384_v17  ;;  %v6263_v30 = vcombine.low %v230_v18, %v234_v19  ;;  %v8030_v19 = vld [vmem:[#allocation2 + $0x10] sm:$0xff] }
  0xcf   :  { %v362_v21 = vld [vmem:[#allocation5 + $0x6a0] sm:$0xff]  ;;  %2965 = vmatpush1.bf16.msra.mxu0 %v6383_v23  ;;  %v6194_v23 = vcombine.high %v159_v14, %v163_v15 }
  0xd0   :  { %v6392_v25 = vcombine.high %v358_v20, %v362_v21  ;;  %v238_v26 = vld [vmem:[#allocation5 + $0x2c0] sm:$0xff]  ;;  %2925 = vmatprep.subr.bf16.mxu1 %v6264_v24  ;;  %v6391_v31 = vcombine.low %v358_v20, %v362_v21  ;;  %v6185_v20 = vcombine.low %v151_v6, %v155_v7  ;;  %v8034_v21 = vcombine.low %v8014_v54, %v8014_v54  ;;  %v211_v7 = vld [vmem:[#allocation5 + $0x1e8] sm:$0xff] }
  0xd1   :  { %v242_v27 = vld [vmem:[#allocation5 + $0x2e0] sm:$0xff]  ;;  %2926 = vmatpush1.bf16.msra.mxu1 %v6263_v30  ;;  %v6193_v54 = vcombine.low %v159_v14, %v163_v15  ;;  %v219_v15 = vld [vmem:[#allocation5 + $0x228] sm:$0xff] }
  0xd2   :  { %v366_v28 = vld [vmem:[#allocation5 + $0x6c0] sm:$0xff]  ;;  %v6272_v32 = vcombine.high %v238_v26, %v242_v27  ;;  %2966 = vmatprep.subr.bf16.mxu0 %v6392_v25  ;;  %v6271_v38 = vcombine.low %v238_v26, %v242_v27  ;;  %v171_v27 = vld [vmem:[#allocation5 + $0xa8] sm:$0xff] }
  0xd3   :  { %v370_v29 = vld [vmem:[#allocation5 + $0x6e0] sm:$0xff]  ;;  %2967 = vmatpush1.bf16.msra.mxu0 %v6391_v31  ;;  %v6202_v30 = vcombine.high %v167_v53, %v171_v27 }
  0xd4   :  { %v6400_v33 = vcombine.high %v366_v28, %v370_v29  ;;  %v246_v34 = vld [vmem:[#allocation5 + $0x300] sm:$0xff]  ;;  %2927 = vmatprep.subr.bf16.mxu1 %v6272_v32  ;;  %v6399_v39 = vcombine.low %v366_v28, %v370_v29  ;;  %v8038_v28 = vcombine.high %v8030_v19, %v8030_v19 }
  0xd5   :  { %v250_v35 = vld [vmem:[#allocation5 + $0x320] sm:$0xff]  ;;  %2928 = vmatpush1.bf16.msra.mxu1 %v6271_v38 }
  0xd6   :  { %v374_v36 = vld [vmem:[#allocation5 + $0x700] sm:$0xff]  ;;  %v6280_v40 = vcombine.high %v246_v34, %v250_v35  ;;  %2968 = vmatprep.subr.bf16.mxu0 %v6400_v33  ;;  %v6279_v46 = vcombine.low %v246_v34, %v250_v35  ;;  %v175_v33 = vld [vmem:[#allocation5 + $0xc8] sm:$0xff] }
  0xd7   :  { %v378_v37 = vld [vmem:[#allocation5 + $0x720] sm:$0xff]  ;;  %2969 = vmatpush1.bf16.msra.mxu0 %v6399_v39  ;;  %v179_v35 = vld [vmem:[#allocation5 + $0xe8] sm:$0xff] }
  0xd8   :  { %v6408_v41 = vcombine.high %v374_v36, %v378_v37  ;;  %v254_v42 = vld [vmem:[#allocation5 + $0x340] sm:$0xff]  ;;  %2929 = vmatprep.subr.bf16.mxu1 %v6280_v40  ;;  %v6407_v47 = vcombine.low %v374_v36, %v378_v37  ;;  %v6201_v36 = vcombine.low %v167_v53, %v171_v27  ;;  %v6210_v38 = vcombine.high %v175_v33, %v179_v35 }
  0xd9   :  { %v258_v43 = vld [vmem:[#allocation5 + $0x360] sm:$0xff]  ;;  %2930 = vmatpush1.bf16.msra.mxu1 %v6279_v46 }
  0xda   :  { %v382_v44 = vld [vmem:[#allocation5 + $0x740] sm:$0xff]  ;;  %v6288_v48 = vcombine.high %v254_v42, %v258_v43  ;;  %2970 = vmatprep.subr.bf16.mxu0 %v6408_v41  ;;  %v6287_v56 = vcombine.low %v254_v42, %v258_v43  ;;  %v183_v41 = vld [vmem:[#allocation5 + $0x108] sm:$0xff] }
  0xdb   :  { %v386_v45 = vld [vmem:[#allocation5 + $0x760] sm:$0xff]  ;;  %2971 = vmatpush1.bf16.msra.mxu0 %v6407_v47  ;;  %v187_v43 = vld [vmem:[#allocation5 + $0x128] sm:$0xff] }
  0xdc   :  { %v6416_v49 = vcombine.high %v382_v44, %v386_v45  ;;  %v262_v50 = vld [vmem:[#allocation5 + $0x380] sm:$0xff]  ;;  %2931 = vmatprep.subr.bf16.mxu1 %v6288_v48  ;;  %v6415_v57 = vcombine.low %v382_v44, %v386_v45  ;;  %v6209_v44 = vcombine.low %v175_v33, %v179_v35  ;;  %v6218_v46 = vcombine.high %v183_v41, %v187_v43  ;;  %v235_v33 = vld [vmem:[#allocation5 + $0x2a8] sm:$0xff] }
  0xdd   :  { %v266_v51 = vld [vmem:[#allocation5 + $0x3a0] sm:$0xff]  ;;  %2932 = vmatpush1.bf16.msra.mxu1 %v6287_v56 }
  0xde   :  { %v390_v52 = vld [vmem:[#allocation5 + $0x780] sm:$0xff]  ;;  %v6296_v59 = vcombine.high %v262_v50, %v266_v51  ;;  %2972 = vmatprep.subr.bf16.mxu0 %v6416_v49  ;;  %v6295_v2 = vcombine.low %v262_v50, %v266_v51  ;;  %v191_v49 = vld [vmem:[#allocation5 + $0x148] sm:$0xff] }
  0xdf   :  { %v394_v55 = vld [vmem:[#allocation5 + $0x7a0] sm:$0xff]  ;;  %2973 = vmatpush1.bf16.msra.mxu0 %v6415_v57  ;;  %v195_v51 = vld [vmem:[#allocation5 + $0x168] sm:$0xff] }
  0xe0   :  { %v6424_v60 = vcombine.high %v390_v52, %v394_v55  ;;  %v270_v62 = vld [vmem:[#allocation5 + $0x3c0] sm:$0xff]  ;;  %2933 = vmatprep.subr.bf16.mxu1 %v6296_v59  ;;  %v6423_v3 = vcombine.low %v390_v52, %v394_v55  ;;  %v6217_v52 = vcombine.low %v183_v41, %v187_v43  ;;  %v6226_v56 = vcombine.high %v191_v49, %v195_v51  ;;  %v243_v41 = vld [vmem:[#allocation5 + $0x2e8] sm:$0xff] }
  0xe1   :  { %v274_v63 = vld [vmem:[#allocation5 + $0x3e0] sm:$0xff]  ;;  %2934 = vmatpush1.bf16.msra.mxu1 %v6295_v2 }
  0xe2   :  { %v398_v0 = vld [vmem:[#allocation5 + $0x7c0] sm:$0xff]  ;;  %v6304_v4 = vcombine.high %v270_v62, %v274_v63  ;;  %2974 = vmatprep.subr.bf16.mxu0 %v6424_v60  ;;  %v6303_v10 = vcombine.low %v270_v62, %v274_v63  ;;  %v199_v60 = vld [vmem:[#allocation5 + $0x188] sm:$0xff] }
  0xe3   :  { %v402_v1 = vld [vmem:[#allocation5 + $0x7e0] sm:$0xff]  ;;  %2975 = vmatpush1.bf16.msra.mxu0 %v6423_v3  ;;  %v203_v63 = vld [vmem:[#allocation5 + $0x1a8] sm:$0xff] }
  0xe4   :  { %v6432_v5 = vcombine.high %v398_v0, %v402_v1  ;;  %v406_v8 = vld [vmem:[#allocation5 + $0x800] sm:$0xff]  ;;  %2935 = vmatprep.subr.bf16.mxu1 %v6304_v4  ;;  %v6431_v11 = vcombine.low %v398_v0, %v402_v1  ;;  %v6225_v0 = vcombine.low %v191_v49, %v195_v51  ;;  %v6234_v2 = vcombine.high %v199_v60, %v203_v63  ;;  %v251_v49 = vld [vmem:[#allocation5 + $0x328] sm:$0xff] }
  0xe5   :  { %v410_v9 = vld [vmem:[#allocation5 + $0x820] sm:$0xff]  ;;  %2936 = vmatpush1.bf16.msra.mxu1 %v6303_v10 }
  0xe6   :  { %2976 = vmatprep.subr.bf16.mxu0 %v6432_v5  ;;  %v6440_v13 = vcombine.high %v406_v8, %v410_v9  ;;  %v414_v17 = vld [vmem:[#allocation5 + $0x840] sm:$0xff]  ;;  %v6439_v22 = vcombine.low %v406_v8, %v410_v9  ;;  %3069 = vmatprep.subr.bf16.mxu1 %v6186_v12  ;;  %v207_v5 = vld [vmem:[#allocation5 + $0x1c8] sm:$0xff]  ;;  %v6233_v8 = vcombine.low %v199_v60, %v203_v63 }
  0xe7   :  { %v418_v18 = vld [vmem:[#allocation5 + $0x860] sm:$0xff]  ;;  %2977 = vmatpush1.bf16.msra.mxu0 %v6431_v11  ;;  %v6242_v10 = vcombine.high %v207_v5, %v211_v7  ;;  %v259_v60 = vld [vmem:[#allocation5 + $0x368] sm:$0xff] }
  0xe8   :  { %v422_v24 = vld [vmem:[#allocation5 + $0x880] sm:$0xff]  ;;  %2987 = vmatprep.subr.bf16.mxu0 %v6440_v13  ;;  %v6448_v25 = vcombine.high %v414_v17, %v418_v18  ;;  %2938 = vmatmul.mubr.bf16.vlgmr.msra.gmra.mrb[0].mxu1 %v8028_v16  ;;  %v6447_v29 = vcombine.low %v414_v17, %v418_v18  ;;  %v215_v13 = vld [vmem:[#allocation5 + $0x208] sm:$0xff]  ;;  %v6241_v17 = vcombine.low %v207_v5, %v211_v7 }
  0xe9   :  { %v426_v26 = vld [vmem:[#allocation5 + $0x8a0] sm:$0xff]  ;;  %3070 = vmatpush1.bf16.msra.mxu1 %v6185_v20  ;;  %3101 = vmatprep.mubr.bf16.mxu1 %v8018_v58  ;;  %v6250_v20 = vcombine.high %v215_v13, %v219_v15  ;;  %v6249_v53 = vcombine.low %v215_v13, %v219_v15  ;;  %v267_v5 = vld [vmem:[#allocation5 + $0x3a8] sm:$0xff] }
  0xea   :  { %2979 = vmatmul.mubr.bf16.vlgmr.msra.gmra.mrb[0].mxu0 %v8034_v21  ;;  %3071 = vmatprep.subr.bf16.mxu1 %v6194_v23  ;;  %v430_v31 = vld [vmem:[#allocation5 + $0x8c0] sm:$0xff]  ;;  %v6456_v34 = vcombine.high %v422_v24, %v426_v26  ;;  %v6455_v37 = vcombine.low %v422_v24, %v426_v26  ;;  %v223_v24 = vld [vmem:[#allocation5 + $0x248] sm:$0xff] }
  0xeb   :  { %2988 = vmatpush1.bf16.msra.mxu0 %v6439_v22  ;;  %v434_v32 = vld [vmem:[#allocation5 + $0x8e0] sm:$0xff]  ;;  %3019 = vmatprep.mubr.bf16.mxu0 %v8038_v28  ;;  %v227_v26 = vld [vmem:[#allocation5 + $0x268] sm:$0xff] }
  0xec   :  { %2989 = vmatprep.subr.bf16.mxu0 %v6448_v25  ;;  %v438_v39 = vld [vmem:[#allocation5 + $0x900] sm:$0xff]  ;;  %v6464_v42 = vcombine.high %v430_v31, %v434_v32  ;;  %v6463_v45 = vcombine.low %v430_v31, %v434_v32  ;;  %v231_v31 = vld [vmem:[#allocation5 + $0x288] sm:$0xff] }
  0xed   :  { %3072 = vmatpush1.bf16.msra.mxu1 %v6193_v54  ;;  %v442_v40 = vld [vmem:[#allocation5 + $0x920] sm:$0xff]  ;;  %v6258_v54 = vcombine.high %v223_v24, %v227_v26  ;;  %v275_v13 = vld [vmem:[#allocation5 + $0x3e8] sm:$0xff] }
  0xee   :  { %3073 = vmatprep.subr.bf16.mxu1 %v6202_v30  ;;  %v446_v47 = vld [vmem:[#allocation5 + $0x940] sm:$0xff]  ;;  %v6472_v50 = vcombine.high %v438_v39, %v442_v40  ;;  %v6471_v55 = vcombine.low %v438_v39, %v442_v40  ;;  %v239_v39 = vld [vmem:[#allocation5 + $0x2c8] sm:$0xff] }
  0xef   :  { %2990 = vmatpush1.bf16.msra.mxu0 %v6447_v29  ;;  %v450_v48 = vld [vmem:[#allocation5 + $0x960] sm:$0xff] }
  0xf0   :  { %2991 = vmatprep.subr.bf16.mxu0 %v6456_v34  ;;  %v454_v57 = vld [vmem:[#allocation5 + $0x980] sm:$0xff]  ;;  %v6480_v62 = vcombine.high %v446_v47, %v450_v48  ;;  %v6479_v1 = vcombine.low %v446_v47, %v450_v48  ;;  %v6257_v34 = vcombine.low %v223_v24, %v227_v26  ;;  %v247_v47 = vld [vmem:[#allocation5 + $0x308] sm:$0xff] }
  0xf1   :  { %3074 = vmatpush1.bf16.msra.mxu1 %v6201_v36  ;;  %v458_v59 = vld [vmem:[#allocation5 + $0x9a0] sm:$0xff]  ;;  %v6266_v36 = vcombine.high %v231_v31, %v235_v33  ;;  %v283_v24 = vld [vmem:[#allocation5 + $0x428] sm:$0xff] }
  0xf2   :  { %3075 = vmatprep.subr.bf16.mxu1 %v6210_v38  ;;  %v462_v3 = vld [vmem:[#allocation5 + $0x9c0] sm:$0xff]  ;;  %v6488_v6 = vcombine.high %v454_v57, %v458_v59  ;;  %v6487_v9 = vcombine.low %v454_v57, %v458_v59  ;;  %v255_v57 = vld [vmem:[#allocation5 + $0x348] sm:$0xff] }
  0xf3   :  { %2992 = vmatpush1.bf16.msra.mxu0 %v6455_v37  ;;  %v466_v4 = vld [vmem:[#allocation5 + $0x9e0] sm:$0xff] }
  0xf4   :  { %2993 = vmatprep.subr.bf16.mxu0 %v6464_v42  ;;  %v470_v11 = vld [vmem:[#allocation5 + $0xa00] sm:$0xff]  ;;  %v6496_v14 = vcombine.high %v462_v3, %v466_v4  ;;  %v6495_v18 = vcombine.low %v462_v3, %v466_v4  ;;  %v6265_v42 = vcombine.low %v231_v31, %v235_v33  ;;  %v263_v3 = vld [vmem:[#allocation5 + $0x388] sm:$0xff]  ;;  %v8046_v33 = vcombine.low %v8030_v19, %v8030_v19 }
  0xf5   :  { %3076 = vmatpush1.bf16.msra.mxu1 %v6209_v44  ;;  %v474_v12 = vld [vmem:[#allocation5 + $0xa20] sm:$0xff]  ;;  %v6274_v44 = vcombine.high %v239_v39, %v243_v41  ;;  %v291_v31 = vld [vmem:[#allocation5 + $0x468] sm:$0xff] }
  0xf6   :  { %3077 = vmatprep.subr.bf16.mxu1 %v6218_v46  ;;  %v478_v22 = vld [vmem:[#allocation5 + $0xa40] sm:$0xff]  ;;  %v6504_v25 = vcombine.high %v470_v11, %v474_v12  ;;  %v6503_v27 = vcombine.low %v470_v11, %v474_v12  ;;  %v271_v11 = vld [vmem:[#allocation5 + $0x3c8] sm:$0xff] }
  0xf7   :  { %2994 = vmatpush1.bf16.msra.mxu0 %v6463_v45  ;;  %v482_v23 = vld [vmem:[#allocation5 + $0xa60] sm:$0xff] }
  0xf8   :  { %2995 = vmatprep.subr.bf16.mxu0 %v6472_v50  ;;  %v486_v29 = vld [vmem:[#allocation5 + $0xa80] sm:$0xff]  ;;  %v6512_v32 = vcombine.high %v478_v22, %v482_v23  ;;  %v6511_v35 = vcombine.low %v478_v22, %v482_v23  ;;  %v6273_v50 = vcombine.low %v239_v39, %v243_v41  ;;  %v279_v22 = vld [vmem:[#allocation5 + $0x408] sm:$0xff] }
  0xf9   :  { %3078 = vmatpush1.bf16.msra.mxu1 %v6217_v52  ;;  %v490_v30 = vld [vmem:[#allocation5 + $0xaa0] sm:$0xff]  ;;  %v6282_v52 = vcombine.high %v247_v47, %v251_v49 }
  0xfa   :  { %3079 = vmatprep.subr.bf16.mxu1 %v6226_v56  ;;  %v494_v37 = vld [vmem:[#allocation5 + $0xac0] sm:$0xff]  ;;  %v6520_v40 = vcombine.high %v486_v29, %v490_v30  ;;  %v6519_v43 = vcombine.low %v486_v29, %v490_v30  ;;  %v287_v29 = vld [vmem:[#allocation5 + $0x448] sm:$0xff] }
  0xfb   :  { %2996 = vmatpush1.bf16.msra.mxu0 %v6471_v55  ;;  %v498_v38 = vld [vmem:[#allocation5 + $0xae0] sm:$0xff]  ;;  %v6321_v41 = vcombine.low %v287_v29, %v291_v31 }
  0xfc   :  { %2997 = vmatprep.subr.bf16.mxu0 %v6480_v62  ;;  %v502_v45 = vld [vmem:[#allocation5 + $0xb00] sm:$0xff]  ;;  %v6528_v48 = vcombine.high %v494_v37, %v498_v38  ;;  %v6527_v51 = vcombine.low %v494_v37, %v498_v38  ;;  %v6281_v62 = vcombine.low %v247_v47, %v251_v49  ;;  %v295_v38 = vld [vmem:[#allocation5 + $0x488] sm:$0xff] }
  0xfd   :  { %3080 = vmatpush1.bf16.msra.mxu1 %v6225_v0  ;;  %v506_v46 = vld [vmem:[#allocation5 + $0xb20] sm:$0xff]  ;;  %v6290_v0 = vcombine.high %v255_v57, %v259_v60  ;;  %v307_v47 = vld [vmem:[#allocation5 + $0x4e8] sm:$0xff] }
  0xfe   :  { %3081 = vmatprep.subr.bf16.mxu1 %v6234_v2  ;;  %v510_v55 = vld [vmem:[#allocation5 + $0xb40] sm:$0xff]  ;;  %v6536_v59 = vcombine.high %v502_v45, %v506_v46  ;;  %v6535_v63 = vcombine.low %v502_v45, %v506_v46  ;;  %v303_v45 = vld [vmem:[#allocation5 + $0x4c8] sm:$0xff] }
  0xff   :  { %2998 = vmatpush1.bf16.msra.mxu0 %v6479_v1  ;;  %v514_v56 = vld [vmem:[#allocation5 + $0xb60] sm:$0xff] }
 0x100   :  { %2999 = vmatprep.subr.bf16.mxu0 %v6488_v6  ;;  %v518_v1 = vld [vmem:[#allocation5 + $0xb80] sm:$0xff]  ;;  %v6544_v4 = vcombine.high %v510_v55, %v514_v56  ;;  %v6289_v6 = vcombine.low %v255_v57, %v259_v60  ;;  %v6543_v7 = vcombine.low %v510_v55, %v514_v56  ;;  %v311_v56 = vld [vmem:[#allocation5 + $0x508] sm:$0xff]  ;;  %v6337_v60 = vcombine.low %v303_v45, %v307_v47 }
 0x101   :  { %3082 = vmatpush1.bf16.msra.mxu1 %v6233_v8  ;;  %v522_v2 = vld [vmem:[#allocation5 + $0xba0] sm:$0xff]  ;;  %v6298_v8 = vcombine.high %v263_v3, %v267_v5 }
 0x102   :  { %3083 = vmatprep.subr.bf16.mxu1 %v6242_v10  ;;  %v530_v10 = vld [vmem:[#allocation5 + $0xbe0] sm:$0xff]  ;;  %v6552_v12 = vcombine.high %v518_v1, %v522_v2  ;;  %v6551_v15 = vcombine.low %v518_v1, %v522_v2  ;;  %v319_v2 = vld [vmem:[#allocation5 + $0x548] sm:$0xff] }
 0x103   :  { %3000 = vmatpush1.bf16.msra.mxu0 %v6487_v9  ;;  %v526_v9 = vld [vmem:[#allocation5 + $0xbc0] sm:$0xff] }
 0x104   :  { %3001 = vmatprep.subr.bf16.mxu0 %v6496_v14  ;;  %v6297_v14 = vcombine.low %v263_v3, %v267_v5  ;;  %v6560_v23 = vcombine.high %v526_v9, %v530_v10  ;;  %v6559_v26 = vcombine.low %v526_v9, %v530_v10  ;;  %v554_v37 = vld [vmem:[#allocation5 + $0xca0] sm:$0xff]  ;;  %v327_v10 = vld [vmem:[#allocation5 + $0x588] sm:$0xff] }
 0x105   :  { %3084 = vmatpush1.bf16.msra.mxu1 %v6241_v17  ;;  %v6306_v17 = vcombine.high %v271_v11, %v275_v13  ;;  %v570_v55 = vld [vmem:[#allocation5 + $0xd20] sm:$0xff] }
 0x106   :  { %3085 = vmatprep.subr.bf16.mxu1 %v6250_v20  ;;  %v538_v20 = vld [vmem:[#allocation5 + $0xc20] sm:$0xff] }
 0x107   :  { %3002 = vmatpush1.bf16.msra.mxu0 %v6495_v18  ;;  %v534_v18 = vld [vmem:[#allocation5 + $0xc00] sm:$0xff] }
 0x108   :  { %3003 = vmatprep.subr.bf16.mxu0 %v6504_v25  ;;  %v6305_v25 = vcombine.low %v271_v11, %v275_v13  ;;  %v6568_v30 = vcombine.high %v534_v18, %v538_v20  ;;  %v578_v1 = vld [vmem:[#allocation5 + $0xd60] sm:$0xff] }
 0x109   :  { %3086 = vmatpush1.bf16.msra.mxu1 %v6249_v53  ;;  %v6314_v53 = vcombine.high %v279_v22, %v283_v24  ;;  %v586_v9 = vld [vmem:[#allocation5 + $0xda0] sm:$0xff] }
 0x10a   :  { %3087 = vmatprep.subr.bf16.mxu1 %v6258_v54  ;;  %v546_v54 = vld [vmem:[#allocation5 + $0xc60] sm:$0xff] }
 0x10b   :  { %3004 = vmatpush1.bf16.msra.mxu0 %v6503_v27  ;;  %v542_v27 = vld [vmem:[#allocation5 + $0xc40] sm:$0xff] }
 0x10c   :  { %3005 = vmatprep.subr.bf16.mxu0 %v6512_v32  ;;  %v6313_v32 = vcombine.low %v279_v22, %v283_v24  ;;  %v6576_v39 = vcombine.high %v542_v27, %v546_v54  ;;  %v335_v22 = vld [vmem:[#allocation5 + $0x5c8] sm:$0xff] }
 0x10d   :  { %3088 = vmatpush1.bf16.msra.mxu1 %v6257_v34  ;;  %v6567_v34 = vcombine.low %v534_v18, %v538_v20  ;;  %v594_v18 = vld [vmem:[#allocation5 + $0xde0] sm:$0xff] }
 0x10e   :  { %3089 = vmatprep.subr.bf16.mxu1 %v6266_v36  ;;  %v550_v36 = vld [vmem:[#allocation5 + $0xc80] sm:$0xff] }
 0x10f   :  { %3006 = vmatpush1.bf16.msra.mxu0 %v6511_v35  ;;  %v6322_v35 = vcombine.high %v287_v29, %v291_v31  ;;  %v6584_v46 = vcombine.high %v550_v36, %v554_v37 }
 0x110   :  { %3007 = vmatprep.subr.bf16.mxu0 %v6520_v40  ;;  %v299_v40 = vld [vmem:[#allocation5 + $0x4a8] sm:$0xff] }
 0x111   :  { %3090 = vmatpush1.bf16.msra.mxu1 %v6265_v42  ;;  %v6575_v42 = vcombine.low %v542_v27, %v546_v54  ;;  %v6330_v19 = vcombine.high %v295_v38, %v299_v40  ;;  %v6329_v49 = vcombine.low %v295_v38, %v299_v40  ;;  %v347_v27 = vld [vmem:[#allocation5 + $0x628] sm:$0xff]  ;;  %v152_v54 = vld [vmem:[#allocation5 + $0x10] sm:$0xff]  ;;  %v7103_v38 = vld [vmem:[#allocation2 + $0x18] ss:$0 sps:$4 sm:$0xff]  }
 0x112   :  { %3091 = vmatprep.subr.bf16.mxu1 %v6274_v44  ;;  %v562_v44 = vld [vmem:[#allocation5 + $0xce0] sm:$0xff]  ;;  %v164_v40 = vld [vmem:[#allocation5 + $0x70] sm:$0xff] }
 0x113   :  { %3008 = vmatpush1.bf16.msra.mxu0 %v6519_v43  ;;  %v558_v43 = vld [vmem:[#allocation5 + $0xcc0] sm:$0xff] }
 0x114   :  { %3009 = vmatprep.subr.bf16.mxu0 %v6528_v48  ;;  %v7852_v48 = vmov 0   ;;  %v6592_v57 = vcombine.high %v558_v43, %v562_v44 }
 0x115   :  { %3092 = vmatpush1.bf16.msra.mxu1 %v6273_v50  ;;  %v6583_v50 = vcombine.low %v550_v36, %v554_v37  ;;  %v355_v36 = vld [vmem:[#allocation5 + $0x668] sm:$0xff]  ;;  %v160_v37 = vld [vmem:[#allocation5 + $0x50] sm:$0xff] }
 0x116   :  { %3093 = vmatprep.subr.bf16.mxu1 %v6282_v52  ;;  %v566_v52 = vld [vmem:[#allocation5 + $0xd00] sm:$0xff] }
 0x117   :  { %3010 = vmatpush1.bf16.msra.mxu0 %v6527_v51  ;;  %v6338_v51 = vcombine.high %v303_v45, %v307_v47  ;;  %v6600_v3 = vcombine.high %v566_v52, %v570_v55  ;;  %v168_v45 = vld [vmem:[#allocation5 + $0x90] sm:$0xff] }
 0x118   :  { %3011 = vmatprep.subr.bf16.mxu0 %v6536_v59  ;;  %v315_v59 = vld [vmem:[#allocation5 + $0x528] sm:$0xff]  ;;  %v172_v47 = vld [vmem:[#allocation5 + $0xb0] sm:$0xff] }
 0x119   :  { %3094 = vmatpush1.bf16.msra.mxu1 %v6281_v62  ;;  %v6591_v62 = vcombine.low %v558_v43, %v562_v44  ;;  %v6345_v5 = vcombine.low %v311_v56, %v315_v59  ;;  %v359_v43 = vld [vmem:[#allocation5 + $0x688] sm:$0xff] }
 0x11a   :  { %3095 = vmatprep.subr.bf16.mxu1 %v6290_v0  ;;  %v574_v0 = vld [vmem:[#allocation5 + $0xd40] sm:$0xff]  ;;  %v363_v44 = vld [vmem:[#allocation5 + $0x6a8] sm:$0xff] }
 0x11b   :  { %3012 = vmatpush1.bf16.msra.mxu0 %v6535_v63  ;;  %v6346_v63 = vcombine.high %v311_v56, %v315_v59  ;;  %v6608_v11 = vcombine.high %v574_v0, %v578_v1  ;;  %v176_v56 = vld [vmem:[#allocation5 + $0xd0] sm:$0xff] }
 0x11c   :  { %3013 = vmatprep.subr.bf16.mxu0 %v6544_v4  ;;  %v323_v4 = vld [vmem:[#allocation5 + $0x568] sm:$0xff]  ;;  %v180_v59 = vld [vmem:[#allocation5 + $0xf0] sm:$0xff] }
 0x11d   :  { %3096 = vmatpush1.bf16.msra.mxu1 %v6289_v6  ;;  %v6599_v6 = vcombine.low %v566_v52, %v570_v55  ;;  %v6353_v13 = vcombine.low %v319_v2, %v323_v4  ;;  %v367_v52 = vld [vmem:[#allocation5 + $0x6c8] sm:$0xff] }
 0x11e   :  { %3097 = vmatprep.subr.bf16.mxu1 %v6298_v8  ;;  %v582_v8 = vld [vmem:[#allocation5 + $0xd80] sm:$0xff]  ;;  %v371_v55 = vld [vmem:[#allocation5 + $0x6e8] sm:$0xff] }
 0x11f   :  { %3014 = vmatpush1.bf16.msra.mxu0 %v6543_v7  ;;  %v6354_v7 = vcombine.high %v319_v2, %v323_v4  ;;  %v6616_v20 = vcombine.high %v582_v8, %v586_v9  ;;  %v184_v2 = vld [vmem:[#allocation5 + $0x110] sm:$0xff] }
 0x120   :  { %3015 = vmatprep.subr.bf16.mxu0 %v6552_v12  ;;  %v331_v12 = vld [vmem:[#allocation5 + $0x5a8] sm:$0xff]  ;;  %v188_v4 = vld [vmem:[#allocation5 + $0x130] sm:$0xff] }
 0x121   :  { %3098 = vmatpush1.bf16.msra.mxu1 %v6297_v14  ;;  %v6607_v14 = vcombine.low %v574_v0, %v578_v1  ;;  %v6361_v24 = vcombine.low %v327_v10, %v331_v12  ;;  %v375_v0 = vld [vmem:[#allocation5 + $0x708] sm:$0xff] }
 0x122   :  { %3099 = vmatprep.subr.bf16.mxu1 %v6306_v17  ;;  %v590_v17 = vld [vmem:[#allocation5 + $0xdc0] sm:$0xff]  ;;  %v379_v1 = vld [vmem:[#allocation5 + $0x728] sm:$0xff] }
 0x123   :  { %3016 = vmatpush1.bf16.msra.mxu0 %v6551_v15  ;;  %v6362_v15 = vcombine.high %v327_v10, %v331_v12  ;;  %v6624_v29 = vcombine.high %v590_v17, %v594_v18  ;;  %v192_v10 = vld [vmem:[#allocation5 + $0x150] sm:$0xff] }
 0x124   :  { %3017 = vmatprep.subr.bf16.mxu0 %v6560_v23  ;;  %v339_v23 = vld [vmem:[#allocation5 + $0x5e8] sm:$0xff]  ;;  %v196_v12 = vld [vmem:[#allocation5 + $0x170] sm:$0xff] }
 0x125   :  { %3100 = vmatpush1.bf16.msra.mxu1 %v6305_v25  ;;  %v6615_v25 = vcombine.low %v582_v8, %v586_v9  ;;  %v6369_v31 = vcombine.low %v335_v22, %v339_v23  ;;  %v383_v8 = vld [vmem:[#allocation5 + $0x748] sm:$0xff] }
 0x126   :  { %3110 = vmatprep.subr.bf16.mxu1 %v6314_v53  ;;  %v343_v53 = vld [vmem:[#allocation5 + $0x608] sm:$0xff] }
 0x127   :  { %3018 = vmatpush1.bf16.msra.mxu0 %v6559_v26  ;;  %v6370_v26 = vcombine.high %v335_v22, %v339_v23  ;;  %v387_v9 = vld [vmem:[#allocation5 + $0x768] sm:$0xff]  ;;  %v6228_v22 = vcombine.high %v192_v10, %v196_v12  ;;  %v204_v23 = vld [vmem:[#allocation5 + $0x1b0] sm:$0xff] }
 0x128   :  { %3028 = vmatprep.subr.bf16.mxu0 %v6568_v30  ;;  %3102 = vmatmul.mubr.bf16.vlgmr.msra.gmra.mrb[4].mxu1 %v8028_v16  ;;  %v156_v30 = vld [vmem:[#allocation5 + $0x30] sm:$0xff] }
 0x129   :  { %3111 = vmatpush1.bf16.msra.mxu1 %v6313_v32  ;;  %3142 = vmatprep.mubr.bf16.mxu1 %v8022_v61  ;;  %v6623_v32 = vcombine.low %v590_v17, %v594_v18  ;;  %v391_v17 = vld [vmem:[#allocation5 + $0x788] sm:$0xff] }
 0x12a   :  { %3020 = vmatmul.mubr.bf16.vlgmr.msra.gmra.mrb[0].mxu0 %v8046_v33  ;;  %3112 = vmatprep.subr.bf16.mxu1 %v6322_v35  ;;  %v351_v35 = vld [vmem:[#allocation5 + $0x648] sm:$0xff] }
 0x12b   :  { %3029 = vmatpush1.bf16.msra.mxu0 %v6567_v34  ;;  %3060 = vmatprep.mubr.bf16.mxu0 %v7852_v48  ;;  %v6378_v34 = vcombine.high %v343_v53, %v347_v27  ;;  %v395_v18 = vld [vmem:[#allocation5 + $0x7a8] sm:$0xff] }
 0x12c   :  { %3030 = vmatprep.subr.bf16.mxu0 %v6576_v39  ;;  %v6188_v39 = vcombine.high %v152_v54, %v156_v30 }
 0x12d   :  { %3113 = vmatpush1.bf16.msra.mxu1 %v6321_v41  ;;  %v6377_v41 = vcombine.low %v343_v53, %v347_v27  ;;  %v399_v53 = vld [vmem:[#allocation5 + $0x7c8] sm:$0xff] }
 0x12e   :  { %3114 = vmatprep.subr.bf16.mxu1 %v6330_v19  ;;  %v6386_v19 = vcombine.high %v351_v35, %v355_v36  ;;  %v403_v27 = vld [vmem:[#allocation5 + $0x7e8] sm:$0xff] }
 0x12f   :  { %3031 = vmatpush1.bf16.msra.mxu0 %v6575_v42  ;;  %v6187_v42 = vcombine.low %v152_v54, %v156_v30  ;;  %v208_v54 = vld [vmem:[#allocation5 + $0x1d0] sm:$0xff] }
 0x130   :  { %3032 = vmatprep.subr.bf16.mxu0 %v6584_v46  ;;  %v6196_v46 = vcombine.high %v160_v37, %v164_v40  ;;  %v212_v30 = vld [vmem:[#allocation5 + $0x1f0] sm:$0xff] }
 0x131   :  { %3115 = vmatpush1.bf16.msra.mxu1 %v6329_v49  ;;  %v6385_v49 = vcombine.low %v351_v35, %v355_v36  ;;  %v407_v35 = vld [vmem:[#allocation5 + $0x808] sm:$0xff] }
 0x132   :  { %3116 = vmatprep.subr.bf16.mxu1 %v6338_v51  ;;  %v6394_v51 = vcombine.high %v359_v43, %v363_v44  ;;  %v411_v36 = vld [vmem:[#allocation5 + $0x828] sm:$0xff] }
 0x133   :  { %3033 = vmatpush1.bf16.msra.mxu0 %v6583_v50  ;;  %v6195_v50 = vcombine.low %v160_v37, %v164_v40  ;;  %v216_v37 = vld [vmem:[#allocation5 + $0x210] sm:$0xff]  ;;  %v6433_v40 = vcombine.low %v399_v53, %v403_v27 }
 0x134   :  { %3034 = vmatprep.subr.bf16.mxu0 %v6592_v57  ;;  %v6204_v57 = vcombine.high %v168_v45, %v172_v47 }
 0x135   :  { %3117 = vmatpush1.bf16.msra.mxu1 %v6337_v60  ;;  %v6393_v60 = vcombine.low %v359_v43, %v363_v44  ;;  %v419_v43 = vld [vmem:[#allocation5 + $0x868] sm:$0xff]  ;;  %v224_v44 = vld [vmem:[#allocation5 + $0x250] sm:$0xff] }
 0x136   :  { %3118 = vmatprep.subr.bf16.mxu1 %v6346_v63  ;;  %v6402_v63 = vcombine.high %v367_v52, %v371_v55 }
 0x137   :  { %3035 = vmatpush1.bf16.msra.mxu0 %v6591_v62  ;;  %v6203_v62 = vcombine.low %v168_v45, %v172_v47  ;;  %v6441_v47 = vcombine.low %v407_v35, %v411_v36 }
 0x138   :  { %3036 = vmatprep.subr.bf16.mxu0 %v6600_v3  ;;  %v6212_v3 = vcombine.high %v176_v56, %v180_v59 }
 0x139   :  { %3119 = vmatpush1.bf16.msra.mxu1 %v6345_v5  ;;  %v6401_v5 = vcombine.low %v367_v52, %v371_v55  ;;  %v427_v52 = vld [vmem:[#allocation5 + $0x8a8] sm:$0xff]  ;;  %v232_v55 = vld [vmem:[#allocation5 + $0x290] sm:$0xff] }
 0x13a   :  { %3120 = vmatprep.subr.bf16.mxu1 %v6354_v7  ;;  %v6410_v7 = vcombine.high %v375_v0, %v379_v1 }
 0x13b   :  { %3037 = vmatpush1.bf16.msra.mxu0 %v6599_v6  ;;  %v6211_v6 = vcombine.low %v176_v56, %v180_v59 }
 0x13c   :  { %3038 = vmatprep.subr.bf16.mxu0 %v6608_v11  ;;  %v6220_v11 = vcombine.high %v184_v2, %v188_v4 }
 0x13d   :  { %3121 = vmatpush1.bf16.msra.mxu1 %v6353_v13  ;;  %v6409_v13 = vcombine.low %v375_v0, %v379_v1  ;;  %v435_v0 = vld [vmem:[#allocation5 + $0x8e8] sm:$0xff]  ;;  %v240_v1 = vld [vmem:[#allocation5 + $0x2d0] sm:$0xff] }
 0x13e   :  { %3122 = vmatprep.subr.bf16.mxu1 %v6362_v15  ;;  %v6418_v15 = vcombine.high %v383_v8, %v387_v9 }
 0x13f   :  { %3039 = vmatpush1.bf16.msra.mxu0 %v6607_v14  ;;  %v6219_v14 = vcombine.low %v184_v2, %v188_v4 }
 0x140   :  { %3040 = vmatprep.subr.bf16.mxu0 %v6616_v20  ;;  %v200_v20 = vld [vmem:[#allocation5 + $0x190] sm:$0xff] }
 0x141   :  { %3123 = vmatpush1.bf16.msra.mxu1 %v6361_v24  ;;  %v6417_v24 = vcombine.low %v383_v8, %v387_v9  ;;  %v443_v8 = vld [vmem:[#allocation5 + $0x928] sm:$0xff]  ;;  %v248_v9 = vld [vmem:[#allocation5 + $0x310] sm:$0xff] }
 0x142   :  { %3124 = vmatprep.subr.bf16.mxu1 %v6370_v26  ;;  %v6426_v26 = vcombine.high %v391_v17, %v395_v18 }
 0x143   :  { %3041 = vmatpush1.bf16.msra.mxu0 %v6615_v25  ;;  %v6227_v25 = vcombine.low %v192_v10, %v196_v12 }
 0x144   :  { %3042 = vmatprep.subr.bf16.mxu0 %v6624_v29  ;;  %v6236_v29 = vcombine.high %v200_v20, %v204_v23 }
 0x145   :  { %3125 = vmatpush1.bf16.msra.mxu1 %v6369_v31  ;;  %v6425_v31 = vcombine.low %v391_v17, %v395_v18  ;;  %v451_v17 = vld [vmem:[#allocation5 + $0x968] sm:$0xff]  ;;  %v256_v18 = vld [vmem:[#allocation5 + $0x350] sm:$0xff] }
 0x146   :  { %3126 = vmatprep.subr.bf16.mxu1 %v6378_v34  ;;  %v6434_v34 = vcombine.high %v399_v53, %v403_v27  ;;  %v459_v53 = vld [vmem:[#allocation5 + $0x9a8] sm:$0xff]  ;;  %v264_v27 = vld [vmem:[#allocation5 + $0x390] sm:$0xff] }
 0x147   :  { %3043 = vmatpush1.bf16.msra.mxu0 %v6623_v32  ;;  %v6235_v32 = vcombine.low %v200_v20, %v204_v23 }
 0x148   :  { %3233 = vmatprep.subr.bf16.mxu0 %v6188_v39  ;;  %v220_v39 = vld [vmem:[#allocation5 + $0x230] sm:$0xff] }
 0x149   :  { %3127 = vmatpush1.bf16.msra.mxu1 %v6377_v41  ;;  %v6243_v41 = vcombine.low %v208_v54, %v212_v30  ;;  %v6252_v45 = vcombine.high %v216_v37, %v220_v39 }
 0x14a   :  { %3061 = vmatmul.mubr.bf16.vlgmr.msra.gmra.mrb[0].mxu0 %v7103_v38  ;;  %3128 = vmatprep.subr.bf16.mxu1 %v6386_v19  ;;  %v6244_v38 = vcombine.high %v208_v54, %v212_v30  ;;  %v415_v19 = vld [vmem:[#allocation5 + $0x848] sm:$0xff] }
 0x14b   :  { %3234 = vmatpush1.bf16.msra.mxu0 %v6187_v42  ;;  %3265 = vmatprep.mubr.bf16.mxu0 %v8018_v58  ;;  %v6442_v42 = vcombine.high %v407_v35, %v411_v36  ;;  %v6449_v59 = vcombine.low %v415_v19, %v419_v43  ;;  %v467_v35 = vld [vmem:[#allocation5 + $0x9e8] sm:$0xff]  ;;  %v272_v36 = vld [vmem:[#allocation5 + $0x3d0] sm:$0xff] }
 0x14c   :  { %3235 = vmatprep.subr.bf16.mxu0 %v6196_v46  ;;  %v228_v46 = vld [vmem:[#allocation5 + $0x270] sm:$0xff] }
 0x14d   :  { %3129 = vmatpush1.bf16.msra.mxu1 %v6385_v49  ;;  %v6251_v49 = vcombine.low %v216_v37, %v220_v39  ;;  %v6260_v56 = vcombine.high %v224_v44, %v228_v46 }
 0x14e   :  { %3130 = vmatprep.subr.bf16.mxu1 %v6394_v51  ;;  %v423_v51 = vld [vmem:[#allocation5 + $0x888] sm:$0xff] }
 0x14f   :  { %3236 = vmatpush1.bf16.msra.mxu0 %v6195_v50  ;;  %v6450_v50 = vcombine.high %v415_v19, %v419_v43  ;;  %v6457_v4 = vcombine.low %v423_v51, %v427_v52  ;;  %v475_v19 = vld [vmem:[#allocation5 + $0xa28] sm:$0xff]  ;;  %v280_v43 = vld [vmem:[#allocation5 + $0x410] sm:$0xff] }
 0x150   :  { %3237 = vmatprep.subr.bf16.mxu0 %v6204_v57  ;;  %v236_v57 = vld [vmem:[#allocation5 + $0x2b0] sm:$0xff] }
 0x151   :  { %3131 = vmatpush1.bf16.msra.mxu1 %v6393_v60  ;;  %v6259_v60 = vcombine.low %v224_v44, %v228_v46  ;;  %v6268_v2 = vcombine.high %v232_v55, %v236_v57 }
 0x152   :  { %3132 = vmatprep.subr.bf16.mxu1 %v6402_v63  ;;  %v431_v63 = vld [vmem:[#allocation5 + $0x8c8] sm:$0xff] }
 0x153   :  { %3238 = vmatpush1.bf16.msra.mxu0 %v6203_v62  ;;  %v6458_v62 = vcombine.high %v423_v51, %v427_v52  ;;  %v6465_v12 = vcombine.low %v431_v63, %v435_v0  ;;  %v483_v51 = vld [vmem:[#allocation5 + $0xa68] sm:$0xff]  ;;  %v288_v52 = vld [vmem:[#allocation5 + $0x450] sm:$0xff] }
 0x154   :  { %3239 = vmatprep.subr.bf16.mxu0 %v6212_v3  ;;  %v244_v3 = vld [vmem:[#allocation5 + $0x2f0] sm:$0xff] }
 0x155   :  { %3133 = vmatpush1.bf16.msra.mxu1 %v6401_v5  ;;  %v6267_v5 = vcombine.low %v232_v55, %v236_v57  ;;  %v6276_v10 = vcombine.high %v240_v1, %v244_v3 }
 0x156   :  { %3134 = vmatprep.subr.bf16.mxu1 %v6410_v7  ;;  %v439_v7 = vld [vmem:[#allocation5 + $0x908] sm:$0xff] }
 0x157   :  { %3240 = vmatpush1.bf16.msra.mxu0 %v6211_v6  ;;  %v6466_v6 = vcombine.high %v431_v63, %v435_v0  ;;  %v6473_v23 = vcombine.low %v439_v7, %v443_v8  ;;  %v491_v63 = vld [vmem:[#allocation5 + $0xaa8] sm:$0xff]  ;;  %v296_v0 = vld [vmem:[#allocation5 + $0x490] sm:$0xff] }
 0x158   :  { %3241 = vmatprep.subr.bf16.mxu0 %v6220_v11  ;;  %v252_v11 = vld [vmem:[#allocation5 + $0x330] sm:$0xff] }
 0x159   :  { %3135 = vmatpush1.bf16.msra.mxu1 %v6409_v13  ;;  %v6275_v13 = vcombine.low %v240_v1, %v244_v3  ;;  %v6284_v20 = vcombine.high %v248_v9, %v252_v11 }
 0x15a   :  { %3136 = vmatprep.subr.bf16.mxu1 %v6418_v15  ;;  %v447_v15 = vld [vmem:[#allocation5 + $0x948] sm:$0xff] }
 0x15b   :  { %3242 = vmatpush1.bf16.msra.mxu0 %v6219_v14  ;;  %v6474_v14 = vcombine.high %v439_v7, %v443_v8  ;;  %v6481_v30 = vcombine.low %v447_v15, %v451_v17  ;;  %v499_v7 = vld [vmem:[#allocation5 + $0xae8] sm:$0xff]  ;;  %v304_v8 = vld [vmem:[#allocation5 + $0x4d0] sm:$0xff] }
 0x15c   :  { %3243 = vmatprep.subr.bf16.mxu0 %v6228_v22  ;;  %v260_v22 = vld [vmem:[#allocation5 + $0x370] sm:$0xff] }
 0x15d   :  { %3137 = vmatpush1.bf16.msra.mxu1 %v6417_v24  ;;  %v6283_v24 = vcombine.low %v248_v9, %v252_v11  ;;  %v6292_v54 = vcombine.high %v256_v18, %v260_v22 }
 0x15e   :  { %3138 = vmatprep.subr.bf16.mxu1 %v6426_v26  ;;  %v455_v26 = vld [vmem:[#allocation5 + $0x988] sm:$0xff] }
 0x15f   :  { %3244 = vmatpush1.bf16.msra.mxu0 %v6227_v25  ;;  %v6482_v25 = vcombine.high %v447_v15, %v451_v17  ;;  %v6489_v39 = vcombine.low %v455_v26, %v459_v53  ;;  %v507_v15 = vld [vmem:[#allocation5 + $0xb28] sm:$0xff]  ;;  %v312_v17 = vld [vmem:[#allocation5 + $0x510] sm:$0xff] }
 0x160   :  { %3245 = vmatprep.subr.bf16.mxu0 %v6236_v29  ;;  %v268_v29 = vld [vmem:[#allocation5 + $0x3b0] sm:$0xff] }
 0x161   :  { %3139 = vmatpush1.bf16.msra.mxu1 %v6425_v31  ;;  %v6291_v31 = vcombine.low %v256_v18, %v260_v22  ;;  %v6300_v37 = vcombine.high %v264_v27, %v268_v29 }
 0x162   :  { %3140 = vmatprep.subr.bf16.mxu1 %v6434_v34  ;;  %v463_v34 = vld [vmem:[#allocation5 + $0x9c8] sm:$0xff] }
 0x163   :  { %3246 = vmatpush1.bf16.msra.mxu0 %v6235_v32  ;;  %v6490_v32 = vcombine.high %v455_v26, %v459_v53  ;;  %v6497_v46 = vcombine.low %v463_v34, %v467_v35  ;;  %v515_v26 = vld [vmem:[#allocation5 + $0xb68] sm:$0xff]  ;;  %v320_v53 = vld [vmem:[#allocation5 + $0x550] sm:$0xff] }
 0x164   :  { %3247 = vmatprep.subr.bf16.mxu0 %v6244_v38  ;;  %v276_v38 = vld [vmem:[#allocation5 + $0x3f0] sm:$0xff] }
 0x165   :  { %3141 = vmatpush1.bf16.msra.mxu1 %v6433_v40  ;;  %v6299_v40 = vcombine.low %v264_v27, %v268_v29  ;;  %v6308_v44 = vcombine.high %v272_v36, %v276_v38 }
 0x166   :  { %3151 = vmatprep.subr.bf16.mxu1 %v6442_v42  ;;  %v471_v42 = vld [vmem:[#allocation5 + $0xa08] sm:$0xff] }
 0x167   :  { %3248 = vmatpush1.bf16.msra.mxu0 %v6243_v41  ;;  %v6498_v41 = vcombine.high %v463_v34, %v467_v35  ;;  %v6505_v57 = vcombine.low %v471_v42, %v475_v19  ;;  %v523_v35 = vld [vmem:[#allocation5 + $0xba8] sm:$0xff] }
 0x168   :  { %3249 = vmatprep.subr.bf16.mxu0 %v6252_v45  ;;  %3143 = vmatmul.mubr.bf16.vlgmr.msra.gmra.mrb[4].mxu1 %v8034_v21  ;;  %v284_v45 = vld [vmem:[#allocation5 + $0x430] sm:$0xff] }
 0x169   :  { %3152 = vmatpush1.bf16.msra.mxu1 %v6441_v47  ;;  %3183 = vmatprep.mubr.bf16.mxu1 %v8038_v28  ;;  %v6307_v47 = vcombine.low %v272_v36, %v276_v38  ;;  %v6316_v55 = vcombine.high %v280_v43, %v284_v45  ;;  %v328_v36 = vld [vmem:[#allocation5 + $0x590] sm:$0xff] }
 0x16a   :  { %3153 = vmatprep.subr.bf16.mxu1 %v6450_v50  ;;  %v479_v50 = vld [vmem:[#allocation5 + $0xa48] sm:$0xff] }
 0x16b   :  { %3250 = vmatpush1.bf16.msra.mxu0 %v6251_v49  ;;  %v6506_v49 = vcombine.high %v471_v42, %v475_v19  ;;  %v6513_v3 = vcombine.low %v479_v50, %v483_v51  ;;  %v527_v42 = vld [vmem:[#allocation5 + $0xbc8] sm:$0xff] }
 0x16c   :  { %3251 = vmatprep.subr.bf16.mxu0 %v6260_v56  ;;  %v292_v56 = vld [vmem:[#allocation5 + $0x470] sm:$0xff]  ;;  %v531_v19 = vld [vmem:[#allocation5 + $0xbe8] sm:$0xff] }
 0x16d   :  { %3154 = vmatpush1.bf16.msra.mxu1 %v6449_v59  ;;  %v6315_v59 = vcombine.low %v280_v43, %v284_v45  ;;  %v6324_v1 = vcombine.high %v288_v52, %v292_v56  ;;  %v336_v43 = vld [vmem:[#allocation5 + $0x5d0] sm:$0xff] }
 0x16e   :  { %3155 = vmatprep.subr.bf16.mxu1 %v6458_v62  ;;  %v487_v62 = vld [vmem:[#allocation5 + $0xa88] sm:$0xff] }
 0x16f   :  { %3252 = vmatpush1.bf16.msra.mxu0 %v6259_v60  ;;  %v6514_v60 = vcombine.high %v479_v50, %v483_v51  ;;  %v6521_v11 = vcombine.low %v487_v62, %v491_v63  ;;  %v535_v50 = vld [vmem:[#allocation5 + $0xc08] sm:$0xff] }
 0x170   :  { %3253 = vmatprep.subr.bf16.mxu0 %v6268_v2  ;;  %v300_v2 = vld [vmem:[#allocation5 + $0x4b0] sm:$0xff]  ;;  %v539_v51 = vld [vmem:[#allocation5 + $0xc28] sm:$0xff] }
 0x171   :  { %3156 = vmatpush1.bf16.msra.mxu1 %v6457_v4  ;;  %v6323_v4 = vcombine.low %v288_v52, %v292_v56  ;;  %v6332_v9 = vcombine.high %v296_v0, %v300_v2  ;;  %v344_v52 = vld [vmem:[#allocation5 + $0x610] sm:$0xff]  ;;  %v6561_v56 = vcombine.low %v527_v42, %v531_v19 }
 0x172   :  { %3157 = vmatprep.subr.bf16.mxu1 %v6466_v6  ;;  %v495_v6 = vld [vmem:[#allocation5 + $0xac8] sm:$0xff] }
 0x173   :  { %3254 = vmatpush1.bf16.msra.mxu0 %v6267_v5  ;;  %v6522_v5 = vcombine.high %v487_v62, %v491_v63  ;;  %v6529_v22 = vcombine.low %v495_v6, %v499_v7  ;;  %v543_v62 = vld [vmem:[#allocation5 + $0xc48] sm:$0xff] }
 0x174   :  { %3255 = vmatprep.subr.bf16.mxu0 %v6276_v10  ;;  %v308_v10 = vld [vmem:[#allocation5 + $0x4f0] sm:$0xff]  ;;  %v547_v63 = vld [vmem:[#allocation5 + $0xc68] sm:$0xff] }
 0x175   :  { %3158 = vmatpush1.bf16.msra.mxu1 %v6465_v12  ;;  %v6331_v12 = vcombine.low %v296_v0, %v300_v2  ;;  %v6340_v18 = vcombine.high %v304_v8, %v308_v10  ;;  %v352_v0 = vld [vmem:[#allocation5 + $0x650] sm:$0xff]  ;;  %v6569_v2 = vcombine.low %v535_v50, %v539_v51 }
 0x176   :  { %3159 = vmatprep.subr.bf16.mxu1 %v6474_v14  ;;  %v503_v14 = vld [vmem:[#allocation5 + $0xb08] sm:$0xff] }
 0x177   :  { %3256 = vmatpush1.bf16.msra.mxu0 %v6275_v13  ;;  %v6530_v13 = vcombine.high %v495_v6, %v499_v7  ;;  %v6537_v29 = vcombine.low %v503_v14, %v507_v15  ;;  %v551_v6 = vld [vmem:[#allocation5 + $0xc88] sm:$0xff] }
 0x178   :  { %3257 = vmatprep.subr.bf16.mxu0 %v6284_v20  ;;  %v316_v20 = vld [vmem:[#allocation5 + $0x530] sm:$0xff]  ;;  %v555_v7 = vld [vmem:[#allocation5 + $0xca8] sm:$0xff] }
 0x179   :  { %3160 = vmatpush1.bf16.msra.mxu1 %v6473_v23  ;;  %v6339_v23 = vcombine.low %v304_v8, %v308_v10  ;;  %v6348_v27 = vcombine.high %v312_v17, %v316_v20  ;;  %v360_v8 = vld [vmem:[#allocation5 + $0x690] sm:$0xff]  ;;  %v6577_v10 = vcombine.low %v543_v62, %v547_v63 }
 0x17a   :  { %3161 = vmatprep.subr.bf16.mxu1 %v6482_v25  ;;  %v511_v25 = vld [vmem:[#allocation5 + $0xb48] sm:$0xff] }
 0x17b   :  { %3258 = vmatpush1.bf16.msra.mxu0 %v6283_v24  ;;  %v6538_v24 = vcombine.high %v503_v14, %v507_v15  ;;  %v6545_v38 = vcombine.low %v511_v25, %v515_v26  ;;  %v559_v14 = vld [vmem:[#allocation5 + $0xcc8] sm:$0xff] }
 0x17c   :  { %3259 = vmatprep.subr.bf16.mxu0 %v6292_v54  ;;  %v324_v54 = vld [vmem:[#allocation5 + $0x570] sm:$0xff]  ;;  %v563_v15 = vld [vmem:[#allocation5 + $0xce8] sm:$0xff] }
 0x17d   :  { %3162 = vmatpush1.bf16.msra.mxu1 %v6481_v30  ;;  %v6347_v30 = vcombine.low %v312_v17, %v316_v20  ;;  %v6356_v34 = vcombine.high %v320_v53, %v324_v54  ;;  %v368_v17 = vld [vmem:[#allocation5 + $0x6d0] sm:$0xff]  ;;  %v6585_v20 = vcombine.low %v551_v6, %v555_v7 }
 0x17e   :  { %3163 = vmatprep.subr.bf16.mxu1 %v6490_v32  ;;  %v519_v32 = vld [vmem:[#allocation5 + $0xb88] sm:$0xff] }
 0x17f   :  { %3260 = vmatpush1.bf16.msra.mxu0 %v6291_v31  ;;  %v6546_v31 = vcombine.high %v511_v25, %v515_v26  ;;  %v6553_v45 = vcombine.low %v519_v32, %v523_v35  ;;  %v567_v25 = vld [vmem:[#allocation5 + $0xd08] sm:$0xff] }
 0x180   :  { %3261 = vmatprep.subr.bf16.mxu0 %v6300_v37  ;;  %v332_v37 = vld [vmem:[#allocation5 + $0x5b0] sm:$0xff]  ;;  %v571_v26 = vld [vmem:[#allocation5 + $0xd28] sm:$0xff] }
 0x181   :  { %3164 = vmatpush1.bf16.msra.mxu1 %v6489_v39  ;;  %v6355_v39 = vcombine.low %v320_v53, %v324_v54  ;;  %v376_v53 = vld [vmem:[#allocation5 + $0x710] sm:$0xff]  ;;  %v6593_v54 = vcombine.low %v559_v14, %v563_v15 }
 0x182   :  { %3165 = vmatprep.subr.bf16.mxu1 %v6498_v41  ;;  %v6364_v41 = vcombine.high %v328_v36, %v332_v37 }
 0x183   :  { %3262 = vmatpush1.bf16.msra.mxu0 %v6299_v40  ;;  %v6554_v40 = vcombine.high %v519_v32, %v523_v35  ;;  %v575_v32 = vld [vmem:[#allocation5 + $0xd48] sm:$0xff]  ;;  %v384_v35 = vld [vmem:[#allocation5 + $0x750] sm:$0xff] }
 0x184   :  { %3263 = vmatprep.subr.bf16.mxu0 %v6308_v44  ;;  %v340_v44 = vld [vmem:[#allocation5 + $0x5f0] sm:$0xff] }
 0x185   :  { %3166 = vmatpush1.bf16.msra.mxu1 %v6497_v46  ;;  %v6363_v46 = vcombine.low %v328_v36, %v332_v37  ;;  %v388_v36 = vld [vmem:[#allocation5 + $0x770] sm:$0xff]  ;;  %v6601_v37 = vcombine.low %v567_v25, %v571_v26 }
 0x186   :  { %3167 = vmatprep.subr.bf16.mxu1 %v6506_v49  ;;  %v6372_v49 = vcombine.high %v336_v43, %v340_v44 }
 0x187   :  { %3264 = vmatpush1.bf16.msra.mxu0 %v6307_v47  ;;  %v6562_v47 = vcombine.high %v527_v42, %v531_v19  ;;  %v587_v42 = vld [vmem:[#allocation5 + $0xda8] sm:$0xff]  ;;  %v392_v19 = vld [vmem:[#allocation5 + $0x790] sm:$0xff] }
 0x188   :  { %3274 = vmatprep.subr.bf16.mxu0 %v6316_v55  ;;  %v348_v55 = vld [vmem:[#allocation5 + $0x630] sm:$0xff] }
 0x189   :  { %3168 = vmatpush1.bf16.msra.mxu1 %v6505_v57  ;;  %v6371_v57 = vcombine.low %v336_v43, %v340_v44  ;;  %v396_v43 = vld [vmem:[#allocation5 + $0x7b0] sm:$0xff] }
 0x18a   :  { %3266 = vmatmul.mubr.bf16.vlgmr.msra.gmra.mrb[4].mxu0 %v8028_v16  ;;  %3169 = vmatprep.subr.bf16.mxu1 %v6514_v60  ;;  %v6380_v60 = vcombine.high %v344_v52, %v348_v55 }
 0x18b   :  { %3275 = vmatpush1.bf16.msra.mxu0 %v6315_v59  ;;  %3306 = vmatprep.mubr.bf16.mxu0 %v8022_v61  ;;  %v6570_v59 = vcombine.high %v535_v50, %v539_v51  ;;  %v591_v50 = vld [vmem:[#allocation5 + $0xdc8] sm:$0xff] }
 0x18c   :  { %3276 = vmatprep.subr.bf16.mxu0 %v6324_v1  ;;  %v356_v1 = vld [vmem:[#allocation5 + $0x670] sm:$0xff]  ;;  %v595_v51 = vld [vmem:[#allocation5 + $0xde8] sm:$0xff] }
 0x18d   :  { %3170 = vmatpush1.bf16.msra.mxu1 %v6513_v3  ;;  %v6379_v3 = vcombine.low %v344_v52, %v348_v55  ;;  %v400_v55 = vld [vmem:[#allocation5 + $0x7d0] sm:$0xff] }
 0x18e   :  { %3171 = vmatprep.subr.bf16.mxu1 %v6522_v5  ;;  %v6388_v5 = vcombine.high %v352_v0, %v356_v1 }
 0x18f   :  { %3277 = vmatpush1.bf16.msra.mxu0 %v6323_v4  ;;  %v6578_v4 = vcombine.high %v543_v62, %v547_v63  ;;  %v6427_v62 = vcombine.low %v392_v19, %v396_v43  ;;  %v6626_v63 = vcombine.high %v591_v50, %v595_v51 }
 0x190   :  { %3278 = vmatprep.subr.bf16.mxu0 %v6332_v9  ;;  %v364_v9 = vld [vmem:[#allocation5 + $0x6b0] sm:$0xff] }
 0x191   :  { %3172 = vmatpush1.bf16.msra.mxu1 %v6521_v11  ;;  %v6387_v11 = vcombine.low %v352_v0, %v356_v1  ;;  %v153_v1 = vld [vmem:[#allocation5 + $0x18] sm:$0xff] }
 0x192   :  { %3173 = vmatprep.subr.bf16.mxu1 %v6530_v13  ;;  %v6396_v13 = vcombine.high %v360_v8, %v364_v9 }
 0x193   :  { %3279 = vmatpush1.bf16.msra.mxu0 %v6331_v12  ;;  %v6586_v12 = vcombine.high %v551_v6, %v555_v7 }
 0x194   :  { %3280 = vmatprep.subr.bf16.mxu0 %v6340_v18  ;;  %v372_v18 = vld [vmem:[#allocation5 + $0x6f0] sm:$0xff] }
 0x195   :  { %3174 = vmatpush1.bf16.msra.mxu1 %v6529_v22  ;;  %v6395_v22 = vcombine.low %v360_v8, %v364_v9  ;;  %v161_v9 = vld [vmem:[#allocation5 + $0x58] sm:$0xff] }
 0x196   :  { %3175 = vmatprep.subr.bf16.mxu1 %v6538_v24  ;;  %v6404_v24 = vcombine.high %v368_v17, %v372_v18 }
 0x197   :  { %3281 = vmatpush1.bf16.msra.mxu0 %v6339_v23  ;;  %v6594_v23 = vcombine.high %v559_v14, %v563_v15 }
 0x198   :  { %3282 = vmatprep.subr.bf16.mxu0 %v6348_v27  ;;  %v380_v27 = vld [vmem:[#allocation5 + $0x730] sm:$0xff] }
 0x199   :  { %3176 = vmatpush1.bf16.msra.mxu1 %v6537_v29  ;;  %v6403_v29 = vcombine.low %v368_v17, %v372_v18  ;;  %v169_v18 = vld [vmem:[#allocation5 + $0x98] sm:$0xff] }
 0x19a   :  { %3177 = vmatprep.subr.bf16.mxu1 %v6546_v31  ;;  %v6412_v31 = vcombine.high %v376_v53, %v380_v27 }
 0x19b   :  { %3283 = vmatpush1.bf16.msra.mxu0 %v6347_v30  ;;  %v6602_v30 = vcombine.high %v567_v25, %v571_v26 }
 0x19c   :  { %3284 = vmatprep.subr.bf16.mxu0 %v6356_v34  ;;  %v579_v34 = vld [vmem:[#allocation5 + $0xd68] sm:$0xff] }
 0x19d   :  { %3178 = vmatpush1.bf16.msra.mxu1 %v6545_v38  ;;  %v6411_v38 = vcombine.low %v376_v53, %v380_v27  ;;  %v6609_v44 = vcombine.low %v575_v32, %v579_v34 }
 0x19e   :  { %3179 = vmatprep.subr.bf16.mxu1 %v6554_v40  ;;  %v6420_v40 = vcombine.high %v384_v35, %v388_v36 }
 0x19f   :  { %3285 = vmatpush1.bf16.msra.mxu0 %v6355_v39  ;;  %v6610_v39 = vcombine.high %v575_v32, %v579_v34 }
 0x1a0   :  { %3286 = vmatprep.subr.bf16.mxu0 %v6364_v41  ;;  %v583_v41 = vld [vmem:[#allocation5 + $0xd88] sm:$0xff] }
 0x1a1   :  { %3180 = vmatpush1.bf16.msra.mxu1 %v6553_v45  ;;  %v6419_v45 = vcombine.low %v384_v35, %v388_v36 }
 0x1a2   :  { %3181 = vmatprep.subr.bf16.mxu1 %v6562_v47 }
 0x1a3   :  { %3287 = vmatpush1.bf16.msra.mxu0 %v6363_v46  ;;  %v6618_v46 = vcombine.high %v583_v41, %v587_v42 }
 0x1a4   :  { %3288 = vmatprep.subr.bf16.mxu0 %v6372_v49  ;;  %v6428_v49 = vcombine.high %v392_v19, %v396_v43  ;;  %v193_v43 = vld [vmem:[#allocation5 + $0x158] sm:$0xff] }
 0x1a5   :  { %3182 = vmatpush1.bf16.msra.mxu1 %v6561_v56  ;;  %v404_v56 = vld [vmem:[#allocation5 + $0x7f0] sm:$0xff] }
 0x1a6   :  { %3192 = vmatprep.subr.bf16.mxu1 %v6570_v59  ;;  %v6617_v59 = vcombine.low %v583_v41, %v587_v42  ;;  %v6436_v0 = vcombine.high %v400_v55, %v404_v56  ;;  %v6435_v6 = vcombine.low %v400_v55, %v404_v56  ;;  %v201_v56 = vld [vmem:[#allocation5 + $0x198] sm:$0xff] }
 0x1a7   :  { %3289 = vmatpush1.bf16.msra.mxu0 %v6371_v57 }
 0x1a8   :  { %3290 = vmatprep.subr.bf16.mxu0 %v6380_v60  ;;  %3184 = vmatmul.mubr.bf16.vlgmr.msra.gmra.mrb[4].mxu1 %v8046_v33 }
 0x1a9   :  { %3193 = vmatpush1.bf16.msra.mxu1 %v6569_v2  ;;  %3224 = vmatprep.mubr.bf16.mxu1 %v7852_v48  ;;  %v157_v2 = vld [vmem:[#allocation5 + $0x38] sm:$0xff] }
 0x1aa   :  { %3194 = vmatprep.subr.bf16.mxu1 %v6578_v4  ;;  %v412_v4 = vld [vmem:[#allocation5 + $0x830] sm:$0xff]  ;;  %v6190_v7 = vcombine.high %v153_v1, %v157_v2 }
 0x1ab   :  { %3291 = vmatpush1.bf16.msra.mxu0 %v6379_v3  ;;  %v408_v3 = vld [vmem:[#allocation5 + $0x810] sm:$0xff] }
 0x1ac   :  { %3292 = vmatprep.subr.bf16.mxu0 %v6388_v5  ;;  %v6625_v5 = vcombine.low %v591_v50, %v595_v51  ;;  %v6444_v8 = vcombine.high %v408_v3, %v412_v4  ;;  %v6443_v14 = vcombine.low %v408_v3, %v412_v4  ;;  %v213_v3 = vld [vmem:[#allocation5 + $0x1f8] sm:$0xff]  ;;  %v464_v4 = vld [vmem:[#allocation5 + $0x9d0] sm:$0xff] }
 0x1ad   :  { %3195 = vmatpush1.bf16.msra.mxu1 %v6577_v10  ;;  %v165_v10 = vld [vmem:[#allocation5 + $0x78] sm:$0xff] }
 0x1ae   :  { %3196 = vmatprep.subr.bf16.mxu1 %v6586_v12  ;;  %v420_v12 = vld [vmem:[#allocation5 + $0x870] sm:$0xff]  ;;  %v6198_v15 = vcombine.high %v161_v9, %v165_v10  ;;  %v6197_v25 = vcombine.low %v161_v9, %v165_v10  ;;  %v217_v10 = vld [vmem:[#allocation5 + $0x218] sm:$0xff] }
 0x1af   :  { %3293 = vmatpush1.bf16.msra.mxu0 %v6387_v11  ;;  %v416_v11 = vld [vmem:[#allocation5 + $0x850] sm:$0xff] }
 0x1b0   :  { %3294 = vmatprep.subr.bf16.mxu0 %v6396_v13  ;;  %v6189_v13 = vcombine.low %v153_v1, %v157_v2  ;;  %v6452_v17 = vcombine.high %v416_v11, %v420_v12  ;;  %v6451_v26 = vcombine.low %v416_v11, %v420_v12  ;;  %v209_v2 = vld [vmem:[#allocation5 + $0x1d8] sm:$0xff]  ;;  %v472_v12 = vld [vmem:[#allocation5 + $0xa10] sm:$0xff] }
 0x1b1   :  { %3197 = vmatpush1.bf16.msra.mxu1 %v6585_v20  ;;  %v173_v20 = vld [vmem:[#allocation5 + $0xb8] sm:$0xff] }
 0x1b2   :  { %3198 = vmatprep.subr.bf16.mxu1 %v6594_v23  ;;  %v424_v23 = vld [vmem:[#allocation5 + $0x890] sm:$0xff]  ;;  %v6206_v53 = vcombine.high %v169_v18, %v173_v20  ;;  %v6205_v32 = vcombine.low %v169_v18, %v173_v20  ;;  %v221_v11 = vld [vmem:[#allocation5 + $0x238] sm:$0xff] }
 0x1b3   :  { %3295 = vmatpush1.bf16.msra.mxu0 %v6395_v22  ;;  %v8063_v22 = vld [vmem:[#allocation2 + $0x18] ss:$0 sps:$4 sm:$0xff]  }
 0x1b4   :  { %3296 = vmatprep.subr.bf16.mxu0 %v6404_v24  ;;  %v428_v24 = vld [vmem:[#allocation5 + $0x8b0] sm:$0xff]  ;;  %v225_v20 = vld [vmem:[#allocation5 + $0x258] sm:$0xff] }
 0x1b5   :  { %3199 = vmatpush1.bf16.msra.mxu1 %v6593_v54  ;;  %v6460_v27 = vcombine.high %v424_v23, %v428_v24  ;;  %v177_v54 = vld [vmem:[#allocation5 + $0xd8] sm:$0xff]  ;;  %v6459_v34 = vcombine.low %v424_v23, %v428_v24  ;;  %v480_v24 = vld [vmem:[#allocation5 + $0xa50] sm:$0xff] }
 0x1b6   :  { %3200 = vmatprep.subr.bf16.mxu1 %v6602_v30  ;;  %v432_v30 = vld [vmem:[#allocation5 + $0x8d0] sm:$0xff]  ;;  %v229_v23 = vld [vmem:[#allocation5 + $0x278] sm:$0xff] }
 0x1b7   :  { %3297 = vmatpush1.bf16.msra.mxu0 %v6403_v29  ;;  %v181_v29 = vld [vmem:[#allocation5 + $0xf8] sm:$0xff] }
 0x1b8   :  { %3298 = vmatprep.subr.bf16.mxu0 %v6412_v31  ;;  %v436_v31 = vld [vmem:[#allocation5 + $0x8f0] sm:$0xff]  ;;  %v6214_v35 = vcombine.high %v177_v54, %v181_v29  ;;  %v6213_v41 = vcombine.low %v177_v54, %v181_v29  ;;  %v233_v29 = vld [vmem:[#allocation5 + $0x298] sm:$0xff] }
 0x1b9   :  { %3201 = vmatpush1.bf16.msra.mxu1 %v6601_v37  ;;  %v6468_v36 = vcombine.high %v432_v30, %v436_v31  ;;  %v185_v37 = vld [vmem:[#allocation5 + $0x118] sm:$0xff]  ;;  %v6467_v42 = vcombine.low %v432_v30, %v436_v31  ;;  %v488_v31 = vld [vmem:[#allocation5 + $0xa90] sm:$0xff] }
 0x1ba   :  { %3202 = vmatprep.subr.bf16.mxu1 %v6610_v39  ;;  %v440_v39 = vld [vmem:[#allocation5 + $0x910] sm:$0xff]  ;;  %v237_v30 = vld [vmem:[#allocation5 + $0x2b8] sm:$0xff] }
 0x1bb   :  { %3299 = vmatpush1.bf16.msra.mxu0 %v6411_v38  ;;  %v8059_v47 = vpop.f32.mrb[0].mxu1  ;;  %v189_v38 = vld [vmem:[#allocation5 + $0x138] sm:$0xff] }
 0x1bc   :  { %3300 = vmatprep.subr.bf16.mxu0 %v6420_v40  ;;  %v8061_v52 = vpop.f32.mrb[1].mxu1  ;;  %v444_v40 = vld [vmem:[#allocation5 + $0x930] sm:$0xff]  ;;  %v6222_v19 = vcombine.high %v185_v37, %v189_v38 }
 0x1bd   :  { %v2943_v57 = vpop.f32.mrb[2].mxu1  ;;  %3203 = vmatpush1.bf16.msra.mxu1 %v6609_v44  ;;  %v197_v44 = vld [vmem:[#allocation5 + $0x178] sm:$0xff]  ;;  %v6475_v50 = vcombine.low %v440_v39, %v444_v40 }
 0x1be   :  { %v2944_v60 = vpop.f32.mrb[3].mxu1  ;;  %3204 = vmatprep.subr.bf16.mxu1 %v6618_v46  ;;  %v452_v46 = vld [vmem:[#allocation5 + $0x970] sm:$0xff]  ;;  %v6230_v51 = vcombine.high %v193_v43, %v197_v44  ;;  %v205_v57 = vld [vmem:[#allocation5 + $0x1b8] sm:$0xff] }
 0x1bf   :  { %3301 = vmatpush1.bf16.msra.mxu0 %v6419_v45  ;;  %v448_v45 = vld [vmem:[#allocation5 + $0x950] sm:$0xff] }
 0x1c0   :  { %3302 = vmatprep.subr.bf16.mxu0 %v6428_v49  ;;  %v6221_v49 = vcombine.low %v185_v37, %v189_v38  ;;  %v6484_v55 = vcombine.high %v448_v45, %v452_v46  ;;  %v460_v60 = vld [vmem:[#allocation5 + $0x9b0] sm:$0xff]  ;;  %v241_v38 = vld [vmem:[#allocation5 + $0x2d8] sm:$0xff] }
 0x1c1   :  { %3205 = vmatpush1.bf16.msra.mxu1 %v6617_v59  ;;  %v456_v59 = vld [vmem:[#allocation5 + $0x990] sm:$0xff] }
 0x1c2   :  { %3206 = vmatprep.subr.bf16.mxu1 %v6626_v63  ;;  %v6483_v63 = vcombine.low %v448_v45, %v452_v46  ;;  %v6492_v1 = vcombine.high %v456_v59, %v460_v60  ;;  %v253_v45 = vld [vmem:[#allocation5 + $0x338] sm:$0xff]  ;;  %v504_v46 = vld [vmem:[#allocation5 + $0xb10] sm:$0xff] }
 0x1c3   :  { %3303 = vmatpush1.bf16.msra.mxu0 %v6427_v62  ;;  %v6229_v62 = vcombine.low %v193_v43, %v197_v44  ;;  %v249_v44 = vld [vmem:[#allocation5 + $0x318] sm:$0xff] }
 0x1c4   :  { %3304 = vmatprep.subr.bf16.mxu0 %v6436_v0  ;;  %v6238_v0 = vcombine.high %v201_v56, %v205_v57 }
 0x1c5   :  { %3207 = vmatpush1.bf16.msra.mxu1 %v6625_v5  ;;  %v468_v5 = vld [vmem:[#allocation5 + $0x9f0] sm:$0xff] }
 0x1c6   :  { %3397 = vmatprep.subr.bf16.mxu1 %v6190_v7  ;;  %v6491_v7 = vcombine.low %v456_v59, %v460_v60  ;;  %v6500_v9 = vcombine.high %v464_v4, %v468_v5  ;;  %v261_v59 = vld [vmem:[#allocation5 + $0x378] sm:$0xff]  ;;  %v512_v60 = vld [vmem:[#allocation5 + $0xb50] sm:$0xff] }
 0x1c7   :  { %3305 = vmatpush1.bf16.msra.mxu0 %v6435_v6  ;;  %v6237_v6 = vcombine.low %v201_v56, %v205_v57  ;;  %v257_v57 = vld [vmem:[#allocation5 + $0x358] sm:$0xff] }
 0x1c8   :  { %3315 = vmatprep.subr.bf16.mxu0 %v6444_v8  ;;  %3225 = vmatmul.mubr.bf16.vlgmr.msra.gmra.mrb[4].mxu1 %v8063_v22  ;;  %v6246_v8 = vcombine.high %v209_v2, %v213_v3 }
 0x1c9   :  { %3398 = vmatpush1.bf16.msra.mxu1 %v6189_v13  ;;  %3429 = vmatprep.mubr.bf16.mxu1 %v8018_v58  ;;  %v6476_v58 = vcombine.high %v440_v39, %v444_v40  ;;  %v476_v13 = vld [vmem:[#allocation5 + $0xa30] sm:$0xff]  ;;  %v245_v39 = vld [vmem:[#allocation5 + $0x2f8] sm:$0xff] }
 0x1ca   :  { %3307 = vmatmul.mubr.bf16.vlgmr.msra.gmra.mrb[4].mxu0 %v8034_v21  ;;  %3399 = vmatprep.subr.bf16.mxu1 %v6198_v15  ;;  %v6499_v15 = vcombine.low %v464_v4, %v468_v5  ;;  %v6508_v18 = vcombine.high %v472_v12, %v476_v13  ;;  %v496_v40 = vld [vmem:[#allocation5 + $0xad0] sm:$0xff]  ;;  %v269_v4 = vld [vmem:[#allocation5 + $0x3b8] sm:$0xff] }
 0x1cb   :  { %3316 = vmatpush1.bf16.msra.mxu0 %v6443_v14  ;;  %3347 = vmatprep.mubr.bf16.mxu0 %v8038_v28  ;;  %v6245_v14 = vcombine.low %v209_v2, %v213_v3  ;;  %v265_v3 = vld [vmem:[#allocation5 + $0x398] sm:$0xff]  ;;  %v520_v5 = vld [vmem:[#allocation5 + $0xb90] sm:$0xff] }
 0x1cc   :  { %3317 = vmatprep.subr.bf16.mxu0 %v6452_v17  ;;  %v6254_v17 = vcombine.high %v217_v10, %v221_v11 }
 0x1cd   :  { %3400 = vmatpush1.bf16.msra.mxu1 %v6197_v25  ;;  %v484_v25 = vld [vmem:[#allocation5 + $0xa70] sm:$0xff] }
 0x1ce   :  { %3401 = vmatprep.subr.bf16.mxu1 %v6206_v53  ;;  %v6507_v53 = vcombine.low %v472_v12, %v476_v13  ;;  %v6516_v54 = vcombine.high %v480_v24, %v484_v25  ;;  %v277_v12 = vld [vmem:[#allocation5 + $0x3f8] sm:$0xff]  ;;  %v528_v13 = vld [vmem:[#allocation5 + $0xbd0] sm:$0xff] }
 0x1cf   :  { %3318 = vmatpush1.bf16.msra.mxu0 %v6451_v26  ;;  %v6253_v26 = vcombine.low %v217_v10, %v221_v11  ;;  %v273_v11 = vld [vmem:[#allocation5 + $0x3d8] sm:$0xff] }
 0x1d0   :  { %3319 = vmatprep.subr.bf16.mxu0 %v6460_v27  ;;  %v6262_v27 = vcombine.high %v225_v20, %v229_v23 }
 0x1d1   :  { %3402 = vmatpush1.bf16.msra.mxu1 %v6205_v32  ;;  %v492_v32 = vld [vmem:[#allocation5 + $0xab0] sm:$0xff] }
 0x1d2   :  { %3403 = vmatprep.subr.bf16.mxu1 %v6214_v35  ;;  %v6515_v35 = vcombine.low %v480_v24, %v484_v25  ;;  %v6524_v37 = vcombine.high %v488_v31, %v492_v32  ;;  %v285_v24 = vld [vmem:[#allocation5 + $0x438] sm:$0xff]  ;;  %v536_v25 = vld [vmem:[#allocation5 + $0xc10] sm:$0xff] }
 0x1d3   :  { %3320 = vmatpush1.bf16.msra.mxu0 %v6459_v34  ;;  %v6261_v34 = vcombine.low %v225_v20, %v229_v23  ;;  %v281_v23 = vld [vmem:[#allocation5 + $0x418] sm:$0xff] }
 0x1d4   :  { %3321 = vmatprep.subr.bf16.mxu0 %v6468_v36  ;;  %v6270_v36 = vcombine.high %v233_v29, %v237_v30 }
 0x1d5   :  { %3404 = vmatpush1.bf16.msra.mxu1 %v6213_v41  ;;  %v500_v41 = vld [vmem:[#allocation5 + $0xaf0] sm:$0xff] }
 0x1d6   :  { %3405 = vmatprep.subr.bf16.mxu1 %v6222_v19  ;;  %v6523_v19 = vcombine.low %v488_v31, %v492_v32  ;;  %v6532_v43 = vcombine.high %v496_v40, %v500_v41  ;;  %v293_v31 = vld [vmem:[#allocation5 + $0x478] sm:$0xff]  ;;  %v544_v32 = vld [vmem:[#allocation5 + $0xc50] sm:$0xff] }
 0x1d7   :  { %3322 = vmatpush1.bf16.msra.mxu0 %v6467_v42  ;;  %v6269_v42 = vcombine.low %v233_v29, %v237_v30  ;;  %v289_v30 = vld [vmem:[#allocation5 + $0x458] sm:$0xff] }
 0x1d8   :  { %3323 = vmatprep.subr.bf16.mxu0 %v6476_v58  ;;  %v6278_v58 = vcombine.high %v241_v38, %v245_v39 }
 0x1d9   :  { %3406 = vmatpush1.bf16.msra.mxu1 %v6221_v49  ;;  %v508_v49 = vld [vmem:[#allocation5 + $0xb30] sm:$0xff] }
 0x1da   :  { %3407 = vmatprep.subr.bf16.mxu1 %v6230_v51  ;;  %v6531_v51 = vcombine.low %v496_v40, %v500_v41  ;;  %v6540_v56 = vcombine.high %v504_v46, %v508_v49  ;;  %v301_v40 = vld [vmem:[#allocation5 + $0x4b8] sm:$0xff]  ;;  %v552_v41 = vld [vmem:[#allocation5 + $0xc90] sm:$0xff] }
 0x1db   :  { %3324 = vmatpush1.bf16.msra.mxu0 %v6475_v50  ;;  %v6277_v50 = vcombine.low %v241_v38, %v245_v39  ;;  %v297_v39 = vld [vmem:[#allocation5 + $0x498] sm:$0xff] }
 0x1dc   :  { %3325 = vmatprep.subr.bf16.mxu0 %v6484_v55  ;;  %v6286_v55 = vcombine.high %v249_v44, %v253_v45 }
 0x1dd   :  { %3408 = vmatpush1.bf16.msra.mxu1 %v6229_v62  ;;  %v516_v62 = vld [vmem:[#allocation5 + $0xb70] sm:$0xff] }
 0x1de   :  { %3409 = vmatprep.subr.bf16.mxu1 %v6238_v0  ;;  %v6539_v0 = vcombine.low %v504_v46, %v508_v49  ;;  %v6548_v2 = vcombine.high %v512_v60, %v516_v62  ;;  %v305_v46 = vld [vmem:[#allocation5 + $0x4d8] sm:$0xff] }
 0x1df   :  { %3326 = vmatpush1.bf16.msra.mxu0 %v6483_v63  ;;  %v6285_v63 = vcombine.low %v249_v44, %v253_v45  ;;  %v600_v44 = vlaneseq  ;;  %v309_v49 = vld [vmem:[#allocation5 + $0x4f8] sm:$0xff] }
 0x1e0   :  { %3327 = vmatprep.subr.bf16.mxu0 %v6492_v1  ;;  %v6294_v1 = vcombine.high %v257_v57, %v261_v59 }
 0x1e1   :  { %3410 = vmatpush1.bf16.msra.mxu1 %v6237_v6  ;;  %v524_v6 = vld [vmem:[#allocation5 + $0xbb0] sm:$0xff] }
 0x1e2   :  { %3411 = vmatprep.subr.bf16.mxu1 %v6246_v8  ;;  %v6547_v8 = vcombine.low %v512_v60, %v516_v62  ;;  %v6556_v10 = vcombine.high %v520_v5, %v524_v6  ;;  %v313_v60 = vld [vmem:[#allocation5 + $0x518] sm:$0xff] }
 0x1e3   :  { %3328 = vmatpush1.bf16.msra.mxu0 %v6491_v7  ;;  %v6293_v7 = vcombine.low %v257_v57, %v261_v59  ;;  %v8073_v57 = vshrl.u32 %v600_v44, 7  ;;  %v317_v62 = vld [vmem:[#allocation5 + $0x538] sm:$0xff] }
 0x1e4   :  { %3329 = vmatprep.subr.bf16.mxu0 %v6500_v9  ;;  %v6302_v9 = vcombine.high %v265_v3, %v269_v4 }
 0x1e5   :  { %3412 = vmatpush1.bf16.msra.mxu1 %v6245_v14  ;;  %v532_v14 = vld [vmem:[#allocation5 + $0xbf0] sm:$0xff] }
 0x1e6   :  { %3413 = vmatprep.subr.bf16.mxu1 %v6254_v17  ;;  %v6555_v17 = vcombine.low %v520_v5, %v524_v6  ;;  %v6564_v20 = vcombine.high %v528_v13, %v532_v14  ;;  %v321_v5 = vld [vmem:[#allocation5 + $0x558] sm:$0xff] }
 0x1e7   :  { %3330 = vmatpush1.bf16.msra.mxu0 %v6499_v15  ;;  %v6301_v15 = vcombine.low %v265_v3, %v269_v4  ;;  %v8076_v3 = vsub.s32 0, %v8073_v57  ;;  %v325_v6 = vld [vmem:[#allocation5 + $0x578] sm:$0xff] }
 0x1e8   :  { %3331 = vmatprep.subr.bf16.mxu0 %v6508_v18  ;;  %v6310_v18 = vcombine.high %v273_v11, %v277_v12 }
 0x1e9   :  { %3414 = vmatpush1.bf16.msra.mxu1 %v6253_v26  ;;  %v540_v26 = vld [vmem:[#allocation5 + $0xc30] sm:$0xff] }
 0x1ea   :  { %3415 = vmatprep.subr.bf16.mxu1 %v6262_v27  ;;  %v6563_v27 = vcombine.low %v528_v13, %v532_v14  ;;  %v6572_v29 = vcombine.high %v536_v25, %v540_v26  ;;  %v6358_v13 = vcombine.high %v321_v5, %v325_v6 }
 0x1eb   :  { %3332 = vmatpush1.bf16.msra.mxu0 %v6507_v53  ;;  %v6309_v53 = vcombine.low %v273_v11, %v277_v12  ;;  %v6349_v11 = vcombine.low %v313_v60, %v317_v62 }
 0x1ec   :  { %3333 = vmatprep.subr.bf16.mxu0 %v6516_v54  ;;  %v6318_v54 = vcombine.high %v281_v23, %v285_v24 }
 0x1ed   :  { %3416 = vmatpush1.bf16.msra.mxu1 %v6261_v34  ;;  %v548_v34 = vld [vmem:[#allocation5 + $0xc70] sm:$0xff] }
 0x1ee   :  { %3417 = vmatprep.subr.bf16.mxu1 %v6270_v36  ;;  %v6571_v36 = vcombine.low %v536_v25, %v540_v26  ;;  %v6580_v38 = vcombine.high %v544_v32, %v548_v34  ;;  %v6357_v25 = vcombine.low %v321_v5, %v325_v6  ;;  %v369_v5 = vld [vmem:[#allocation5 + $0x6d8] sm:$0xff] }
 0x1ef   :  { %3334 = vmatpush1.bf16.msra.mxu0 %v6515_v35  ;;  %v6317_v35 = vcombine.low %v281_v23, %v285_v24  ;;  %v584_v23 = vld [vmem:[#allocation5 + $0xd90] sm:$0xff]  ;;  %v373_v6 = vld [vmem:[#allocation5 + $0x6f8] sm:$0xff] }
 0x1f0   :  { %3335 = vmatprep.subr.bf16.mxu0 %v6524_v37  ;;  %v6326_v37 = vcombine.high %v289_v30, %v293_v31  ;;  %v588_v24 = vld [vmem:[#allocation5 + $0xdb0] sm:$0xff] }
 0x1f1   :  { %3418 = vmatpush1.bf16.msra.mxu1 %v6269_v42  ;;  %v556_v42 = vld [vmem:[#allocation5 + $0xcb0] sm:$0xff] }
 0x1f2   :  { %3419 = vmatprep.subr.bf16.mxu1 %v6278_v58  ;;  %v6579_v58 = vcombine.low %v544_v32, %v548_v34  ;;  %v6588_v45 = vcombine.high %v552_v41, %v556_v42  ;;  %v592_v34 = vld [vmem:[#allocation5 + $0xdd0] sm:$0xff] }
 0x1f3   :  { %3336 = vmatpush1.bf16.msra.mxu0 %v6523_v19  ;;  %v6325_v19 = vcombine.low %v289_v30, %v293_v31  ;;  %v341_v30 = vld [vmem:[#allocation5 + $0x5f8] sm:$0xff] }
 0x1f4   :  { %3337 = vmatprep.subr.bf16.mxu0 %v6532_v43  ;;  %v6334_v43 = vcombine.high %v297_v39, %v301_v40 }
 0x1f5   :  { %3420 = vmatpush1.bf16.msra.mxu1 %v6277_v50  ;;  %v560_v50 = vld [vmem:[#allocation5 + $0xcd0] sm:$0xff] }
 0x1f6   :  { %3421 = vmatprep.subr.bf16.mxu1 %v6286_v55  ;;  %v6587_v55 = vcombine.low %v552_v41, %v556_v42  ;;  %v6619_v41 = vcombine.low %v584_v23, %v588_v24 }
 0x1f7   :  { %3338 = vmatpush1.bf16.msra.mxu0 %v6531_v51  ;;  %v564_v51 = vld [vmem:[#allocation5 + $0xcf0] sm:$0xff] }
 0x1f8   :  { %3339 = vmatprep.subr.bf16.mxu0 %v6540_v56  ;;  %v6342_v56 = vcombine.high %v305_v46, %v309_v49  ;;  %v6596_v59 = vcombine.high %v560_v50, %v564_v51 }
 0x1f9   :  { %3422 = vmatpush1.bf16.msra.mxu1 %v6285_v63  ;;  %v568_v63 = vld [vmem:[#allocation5 + $0xd10] sm:$0xff] }
 0x1fa   :  { %3423 = vmatprep.subr.bf16.mxu1 %v6294_v1  ;;  %v6341_v1 = vcombine.low %v305_v46, %v309_v49  ;;  %v7106_v49 = vld [vmem:[#allocation8 + $0x4] ss:$16 sps:$4 sm:$0xff]  }
 0x1fb   :  { %3340 = vmatpush1.bf16.msra.mxu0 %v6539_v0  ;;  %v572_v0 = vld [vmem:[#allocation5 + $0xd30] sm:$0xff] }
 0x1fc   :  { %3341 = vmatprep.subr.bf16.mxu0 %v6548_v2  ;;  %v6595_v2 = vcombine.low %v560_v50, %v564_v51  ;;  %v6604_v4 = vcombine.high %v568_v63, %v572_v0  ;;  %v6603_v12 = vcombine.low %v568_v63, %v572_v0  ;;  %v353_v50 = vld [vmem:[#allocation5 + $0x658] sm:$0xff] }
 0x1fd   :  { %3424 = vmatpush1.bf16.msra.mxu1 %v6293_v7  ;;  %v8078_v7 = vld [vmem:[#allocation7] sm:$0xff]  ;;  %v357_v51 = vld [vmem:[#allocation5 + $0x678] sm:$0xff] }
 0x1fe   :  { %3425 = vmatprep.subr.bf16.mxu1 %v6302_v9  ;;  %v576_v9 = vld [vmem:[#allocation5 + $0xd50] sm:$0xff]  ;;  %v603_v14 = vrot.slane %v8078_v7, %v8076_v3  ;;  %v365_v63 = vld [vmem:[#allocation5 + $0x6b8] sm:$0xff] }
 0x1ff   :  { %3342 = vmatpush1.bf16.msra.mxu0 %v6547_v8  ;;  %v8081_v8 = vsub.s32 1, %v8073_v57 }
 0x200   :  { %3343 = vmatprep.subr.bf16.mxu0 %v6556_v10  ;;  %v580_v10 = vld [vmem:[#allocation5 + $0xd70] sm:$0xff] }
 0x201   :  { %3426 = vmatpush1.bf16.msra.mxu1 %v6301_v15  ;;  %v6612_v15 = vcombine.high %v576_v9, %v580_v10  ;;  %v6611_v26 = vcombine.low %v576_v9, %v580_v10  ;;  %v7110_v10 = vld [vmem:[#allocation8 + $0x40] ss:$16 sps:$4 sm:$0xff]  }
 0x202   :  { %3427 = vmatprep.subr.bf16.mxu1 %v6310_v18  ;;  %v333_v18 = vld [vmem:[#allocation5 + $0x5b8] sm:$0xff] }
 0x203   :  { %3344 = vmatpush1.bf16.msra.mxu0 %v6555_v17  ;;  %v329_v17 = vld [vmem:[#allocation5 + $0x598] sm:$0xff] }
 0x204   :  { %3345 = vmatprep.subr.bf16.mxu0 %v6564_v20  ;;  %v607_v20 = vrot.slane %v8078_v7, %v8081_v8 }
 0x205   :  { %3428 = vmatpush1.bf16.msra.mxu1 %v6309_v53  ;;  %v6366_v53 = vcombine.high %v329_v17, %v333_v18 }
 0x206   :  { %3438 = vmatprep.subr.bf16.mxu1 %v6318_v54  ;;  %v6620_v54 = vcombine.high %v584_v23, %v588_v24  ;;  %v2942_v31 = vadd.f32 %v8061_v52, %v607_v20  ;;  %v385_v20 = vld [vmem:[#allocation5 + $0x758] sm:$0xff] }
 0x207   :  { %3346 = vmatpush1.bf16.msra.mxu0 %v6563_v27  ;;  %v2940_v27 = vadd.f32 %v8059_v47, %v603_v14  ;;  %v6405_v14 = vcombine.low %v369_v5, %v373_v6  ;;  %v389_v23 = vld [vmem:[#allocation5 + $0x778] sm:$0xff] }
 0x208   :  { %3356 = vmatprep.subr.bf16.mxu0 %v6572_v29  ;;  %3430 = vmatmul.mubr.bf16.vlgmr.msra.gmra.mrb[8].mxu1 %v8028_v16  ;;  %v6333_v16 = vcombine.low %v297_v39, %v301_v40  ;;  %v337_v29 = vld [vmem:[#allocation5 + $0x5d8] sm:$0xff] }
 0x209   :  { %3439 = vmatpush1.bf16.msra.mxu1 %v6317_v35  ;;  %3470 = vmatprep.mubr.bf16.mxu1 %v8022_v61  ;;  %v6350_v61 = vcombine.high %v313_v60, %v317_v62  ;;  %v596_v35 = vld [vmem:[#allocation5 + $0xdf0] sm:$0xff]  ;;  %v6374_v47 = vcombine.high %v337_v29, %v341_v30  ;;  %v6373_v44 = vcombine.low %v337_v29, %v341_v30  ;;  %v7109_v60 = vld [vmem:[#allocation8 + $0x24] ss:$16 sps:$4 sm:$0xff]   ;;  %v7119_v30 = vld [vmem:[#allocation8 + $0xa0] ss:$16 sps:$4 sm:$0xff]  }
 0x20a   :  { %3348 = vmatmul.mubr.bf16.vlgmr.msra.gmra.mrb[4].mxu0 %v8046_v33  ;;  %3440 = vmatprep.subr.bf16.mxu1 %v6326_v37  ;;  %v361_v62 = vld [vmem:[#allocation5 + $0x698] sm:$0xff]  ;;  %v6421_v29 = vcombine.low %v385_v20, %v389_v23 }
 0x20b   :  { %3357 = vmatpush1.bf16.msra.mxu0 %v6571_v36  ;;  %3388 = vmatprep.mubr.bf16.mxu0 %v7852_v48  ;;  %v6397_v9 = vcombine.low %v361_v62, %v365_v63 }
 0x20c   :  { %3358 = vmatprep.subr.bf16.mxu0 %v6580_v38  ;;  %v6365_v38 = vcombine.low %v329_v17, %v333_v18  ;;  %v7118_v18 = vld [vmem:[#allocation8 + $0x84] ss:$16 sps:$4 sm:$0xff]  }
 0x20d   :  { %3441 = vmatpush1.bf16.msra.mxu1 %v6325_v19  ;;  %v6628_v19 = vcombine.high %v592_v34, %v596_v35 }
 0x20e   :  { %3442 = vmatprep.subr.bf16.mxu1 %v6334_v43  ;;  %v349_v43 = vld [vmem:[#allocation5 + $0x638] sm:$0xff] }
 0x20f   :  { %3359 = vmatpush1.bf16.msra.mxu0 %v6579_v58  ;;  %v345_v58 = vld [vmem:[#allocation5 + $0x618] sm:$0xff] }
 0x210   :  { %3360 = vmatprep.subr.bf16.mxu0 %v6588_v45  ;;  %v6627_v45 = vcombine.low %v592_v34, %v596_v35  ;;  %v6382_v46 = vcombine.high %v345_v58, %v349_v43  ;;  %v401_v34 = vld [vmem:[#allocation5 + $0x7d8] sm:$0xff] }
 0x211   :  { %3443 = vmatpush1.bf16.msra.mxu1 %v6333_v16  ;;  %v6381_v16 = vcombine.low %v345_v58, %v349_v43  ;;  %v405_v35 = vld [vmem:[#allocation5 + $0x7f8] sm:$0xff] }
 0x212   :  { %3444 = vmatprep.subr.bf16.mxu1 %v6342_v56  ;;  %v7104_v56 = vld [vmem:[#allocation8] ss:$16 sps:$4 sm:$0xff]   ;;  %v7130_v43 = vld [vmem:[#allocation8 + $0x104] ss:$16 sps:$4 sm:$0xff]  }
 0x213   :  { %3361 = vmatpush1.bf16.msra.mxu0 %v6587_v55 }
 0x214   :  { %3362 = vmatprep.subr.bf16.mxu0 %v6596_v59  ;;  %v6390_v59 = vcombine.high %v353_v50, %v357_v51 }
 0x215   :  { %3445 = vmatpush1.bf16.msra.mxu1 %v6341_v1  ;;  %v6389_v1 = vcombine.low %v353_v50, %v357_v51  ;;  %v7133_v50 = vld [vmem:[#allocation8 + $0x124] ss:$16 sps:$4 sm:$0xff]  }
 0x216   :  { %3446 = vmatprep.subr.bf16.mxu1 %v6350_v61  ;;  %v6398_v61 = vcombine.high %v361_v62, %v365_v63  ;;  %v425_v51 = vld [vmem:[#allocation5 + $0x898] sm:$0xff] }
 0x217   :  { %3363 = vmatpush1.bf16.msra.mxu0 %v6595_v2  ;;  %v7107_v2 = vld [vmem:[#allocation8 + $0x20] ss:$16 sps:$4 sm:$0xff]  }
 0x218   :  { %3364 = vmatprep.subr.bf16.mxu0 %v6604_v4  ;;  %v7112_v4 = vld [vmem:[#allocation8 + $0x44] ss:$16 sps:$4 sm:$0xff]  }
 0x219   :  { %3447 = vmatpush1.bf16.msra.mxu1 %v6349_v11  ;;  %v6406_v11 = vcombine.high %v369_v5, %v373_v6  ;;  %v433_v62 = vld [vmem:[#allocation5 + $0x8d8] sm:$0xff] }
 0x21a   :  { %3448 = vmatprep.subr.bf16.mxu1 %v6358_v13  ;;  %v381_v13 = vld [vmem:[#allocation5 + $0x738] sm:$0xff] }
 0x21b   :  { %3365 = vmatpush1.bf16.msra.mxu0 %v6603_v12  ;;  %v377_v12 = vld [vmem:[#allocation5 + $0x718] sm:$0xff] }
 0x21c   :  { %3366 = vmatprep.subr.bf16.mxu0 %v6612_v15  ;;  %v7113_v15 = vld [vmem:[#allocation8 + $0x60] ss:$16 sps:$4 sm:$0xff]   ;;  %v6414_v17 = vcombine.high %v377_v12, %v381_v13  ;;  %v6413_v24 = vcombine.low %v377_v12, %v381_v13 }
 0x21d   :  { %v3062_v32 = vpop.f32.mrb[0].mxu0  ;;  %3449 = vmatpush1.bf16.msra.mxu1 %v6357_v25  ;;  %v7116_v25 = vld [vmem:[#allocation8 + $0x80] ss:$16 sps:$4 sm:$0xff]  }
 0x21e   :  { %v8089_v36 = vadd.f32 %v3062_v32, %v2940_v27  ;;  %v3064_v37 = vpop.f32.mrb[1].mxu0  ;;  %3450 = vmatprep.subr.bf16.mxu1 %v6366_v53  ;;  %v7121_v53 = vld [vmem:[#allocation8 + $0xa4] ss:$16 sps:$4 sm:$0xff]   ;;  %v7137_v6 = vld [vmem:[#allocation8 + $0x160] ss:$16 sps:$4 sm:$0xff]  }
 0x21f   :  { %v6993_v39 = vadd.f32 %v3064_v37, %v2942_v31  ;;  %v3066_v40 = vpop.f32.mrb[2].mxu0  ;;  %3367 = vmatpush1.bf16.msra.mxu0 %v6611_v26  ;;  %v6422_v26 = vcombine.high %v385_v20, %v389_v23  ;;  %v393_v27 = vld [vmem:[#allocation5 + $0x798] sm:$0xff] }
 0x220   :  { %v3067_v42 = vpop.f32.mrb[3].mxu0  ;;  %3368 = vmatprep.subr.bf16.mxu0 %v6620_v54  ;;  %v397_v54 = vld [vmem:[#allocation5 + $0x7b8] sm:$0xff]  ;;  %vm3561_vm1 = vcmp.gt.f32.partialorder %v8089_v36, 0.0 }
 0x221   :  { %v3570_v52 = vmul.f32 0.2, %v6993_v39  ;;  %3451 = vmatpush1.bf16.msra.mxu1 %v6365_v38  ;;  %vm3562_vm0 = vcmp.gt.f32.partialorder %v6993_v39, 0.0  ;;  %v6430_v31 = vcombine.high %v393_v27, %v397_v54  ;;  %v7124_v32 = vld [vmem:[#allocation8 + $0xc4] ss:$16 sps:$4 sm:$0xff]   ;;  %v6429_v37 = vcombine.low %v393_v27, %v397_v54 }
 0x222   :  { %3452 = vmatprep.subr.bf16.mxu1 %v6374_v47  ;;  %v7122_v38 = vld [vmem:[#allocation8 + $0xc0] ss:$16 sps:$4 sm:$0xff]   ;;  %v7127_v40 = vld [vmem:[#allocation8 + $0xe4] ss:$16 sps:$4 sm:$0xff]   ;;  %v6437_v42 = vcombine.low %v401_v34, %v405_v35 }
 0x223   :  { %3369 = vmatpush1.bf16.msra.mxu0 %v6619_v41  ;;  %v3578_v55 = vsel %vm3562_vm0, %v6993_v39, %v3570_v52  ;;  %v6438_v39 = vcombine.high %v401_v34, %v405_v35  ;;  %v409_v41 = vld [vmem:[#allocation5 + $0x818] sm:$0xff]  ;;  %v3569_v34 = vmul.f32 0.2, %v8089_v36 }
 0x224   :  { %3370 = vmatprep.subr.bf16.mxu0 %v6628_v19  ;;  %v8091_v0 = vpack.c.bf16 %v3578_v55, %v3578_v55  ;;  %v413_v47 = vld [vmem:[#allocation5 + $0x838] sm:$0xff] }
 0x225   :  { %3453 = vmatpush1.bf16.msra.mxu1 %v6373_v44  ;;  %v7125_v19 = vld [vmem:[#allocation8 + $0xe0] ss:$16 sps:$4 sm:$0xff]   ;;  %v6446_v58 = vcombine.high %v409_v41, %v413_v47 }
 0x226   :  { %3454 = vmatprep.subr.bf16.mxu1 %v6382_v46  ;;  %v417_v52 = vld [vmem:[#allocation5 + $0x858] sm:$0xff] }
 0x227   :  { %3371 = vmatpush1.bf16.msra.mxu0 %v6627_v45  ;;  %v421_v44 = vld [vmem:[#allocation5 + $0x878] sm:$0xff]  ;;  %v6445_v45 = vcombine.low %v409_v41, %v413_v47  ;;  %v3577_v47 = vsel %vm3561_vm1, %v8089_v36, %v3569_v34 }
 0x228   :  { %5151 = vmatprep.subr.bf16.mxu0 %v7106_v49  ;;  %v7128_v46 = vld [vmem:[#allocation8 + $0x100] ss:$16 sps:$4 sm:$0xff]   ;;  %v6454_v49 = vcombine.high %v417_v52, %v421_v44  ;;  %v6453_v55 = vcombine.low %v417_v52, %v421_v44  ;;  %v7157_v52 = vld [vmem:[#allocation8 + $0x224] ss:$16 sps:$4 sm:$0xff]  }
 0x229   :  { %3455 = vmatpush1.bf16.msra.mxu1 %v6381_v16  ;;  %v429_v16 = vld [vmem:[#allocation5 + $0x8b8] sm:$0xff] }
 0x22a   :  { %3389 = vmatmul.mubr.bf16.vlgmr.msra.gmra.mrb[4].mxu0 %v8063_v22  ;;  %3456 = vmatprep.subr.bf16.mxu1 %v6390_v59  ;;  %v7115_v22 = vld [vmem:[#allocation8 + $0x64] ss:$16 sps:$4 sm:$0xff]   ;;  %v6462_v59 = vcombine.high %v425_v51, %v429_v16  ;;  %v7140_v13 = vld [vmem:[#allocation8 + $0x180] ss:$16 sps:$4 sm:$0xff]  }
 0x22b   :  { %5152 = vmatpush1.bf16.msra.mxu0 %v7104_v56  ;;  %5183 = vmatprep.mubr.bf16.mxu0 %v8091_v0  ;;  %v7131_v56 = vld [vmem:[#allocation8 + $0x120] ss:$16 sps:$4 sm:$0xff]  }
 0x22c   :  { %5153 = vmatprep.subr.bf16.mxu0 %v7109_v60  ;;  %v7136_v60 = vld [vmem:[#allocation8 + $0x144] ss:$16 sps:$4 sm:$0xff]   ;;  %v7143_v23 = vld [vmem:[#allocation8 + $0x1a0] ss:$16 sps:$4 sm:$0xff]  }
 0x22d   :  { %3457 = vmatpush1.bf16.msra.mxu1 %v6389_v1  ;;  %v437_v63 = vld [vmem:[#allocation5 + $0x8f8] sm:$0xff]  ;;  %v6461_v1 = vcombine.low %v425_v51, %v429_v16 }
 0x22e   :  { %3458 = vmatprep.subr.bf16.mxu1 %v6398_v61  ;;  %v6470_v61 = vcombine.high %v433_v62, %v437_v63  ;;  %v445_v5 = vld [vmem:[#allocation5 + $0x938] sm:$0xff] }
 0x22f   :  { %5154 = vmatpush1.bf16.msra.mxu0 %v7107_v2  ;;  %v7134_v2 = vld [vmem:[#allocation8 + $0x140] ss:$16 sps:$4 sm:$0xff]  }
 0x230   :  { %5155 = vmatprep.subr.bf16.mxu0 %v7112_v4  ;;  %v441_v4 = vld [vmem:[#allocation5 + $0x918] sm:$0xff] }
 0x231   :  { %3459 = vmatpush1.bf16.msra.mxu1 %v6397_v9  ;;  %v6478_v9 = vcombine.high %v441_v4, %v445_v5  ;;  %v6477_v12 = vcombine.low %v441_v4, %v445_v5  ;;  %v7146_v54 = vld [vmem:[#allocation8 + $0x1c0] ss:$16 sps:$4 sm:$0xff]  }
 0x232   :  { %3460 = vmatprep.subr.bf16.mxu1 %v6406_v11  ;;  %v449_v11 = vld [vmem:[#allocation5 + $0x958] sm:$0xff] }
 0x233   :  { %5156 = vmatpush1.bf16.msra.mxu0 %v7110_v10  ;;  %v7142_v10 = vld [vmem:[#allocation8 + $0x184] ss:$16 sps:$4 sm:$0xff]  }
 0x234   :  { %5157 = vmatprep.subr.bf16.mxu0 %v7115_v22  ;;  %v453_v22 = vld [vmem:[#allocation5 + $0x978] sm:$0xff] }
 0x235   :  { %3461 = vmatpush1.bf16.msra.mxu1 %v6405_v14  ;;  %v6486_v14 = vcombine.high %v449_v11, %v453_v22  ;;  %v6485_v20 = vcombine.low %v449_v11, %v453_v22  ;;  %v485_v41 = vld [vmem:[#allocation5 + $0xa78] sm:$0xff] }
 0x236   :  { %3462 = vmatprep.subr.bf16.mxu1 %v6414_v17  ;;  %v457_v17 = vld [vmem:[#allocation5 + $0x998] sm:$0xff] }
 0x237   :  { %5158 = vmatpush1.bf16.msra.mxu0 %v7113_v15  ;;  %v7145_v15 = vld [vmem:[#allocation8 + $0x1a4] ss:$16 sps:$4 sm:$0xff]  }
 0x238   :  { %5159 = vmatprep.subr.bf16.mxu0 %v7118_v18  ;;  %v461_v18 = vld [vmem:[#allocation5 + $0x9b8] sm:$0xff] }
 0x239   :  { %3463 = vmatpush1.bf16.msra.mxu1 %v6413_v24  ;;  %v6494_v24 = vcombine.high %v457_v17, %v461_v18  ;;  %v6493_v27 = vcombine.low %v457_v17, %v461_v18  ;;  %v489_v44 = vld [vmem:[#allocation5 + $0xa98] sm:$0xff] }
 0x23a   :  { %3464 = vmatprep.subr.bf16.mxu1 %v6422_v26  ;;  %v465_v26 = vld [vmem:[#allocation5 + $0x9d8] sm:$0xff] }
 0x23b   :  { %5160 = vmatpush1.bf16.msra.mxu0 %v7116_v25  ;;  %v7148_v25 = vld [vmem:[#allocation8 + $0x1c4] ss:$16 sps:$4 sm:$0xff]  }
 0x23c   :  { %5161 = vmatprep.subr.bf16.mxu0 %v7121_v53  ;;  %v469_v53 = vld [vmem:[#allocation5 + $0x9f8] sm:$0xff] }
 0x23d   :  { %3465 = vmatpush1.bf16.msra.mxu1 %v6421_v29  ;;  %v6502_v29 = vcombine.high %v465_v26, %v469_v53  ;;  %v6501_v35 = vcombine.low %v465_v26, %v469_v53  ;;  %v497_v51 = vld [vmem:[#allocation5 + $0xad8] sm:$0xff] }
 0x23e   :  { %3466 = vmatprep.subr.bf16.mxu1 %v6430_v31  ;;  %v473_v31 = vld [vmem:[#allocation5 + $0xa18] sm:$0xff] }
 0x23f   :  { %5162 = vmatpush1.bf16.msra.mxu0 %v7119_v30  ;;  %v7151_v30 = vld [vmem:[#allocation8 + $0x1e4] ss:$16 sps:$4 sm:$0xff]  }
 0x240   :  { %5163 = vmatprep.subr.bf16.mxu0 %v7124_v32  ;;  %v477_v32 = vld [vmem:[#allocation5 + $0xa38] sm:$0xff] }
 0x241   :  { %3467 = vmatpush1.bf16.msra.mxu1 %v6429_v37  ;;  %v7149_v37 = vld [vmem:[#allocation8 + $0x1e0] ss:$16 sps:$4 sm:$0xff]  }
 0x242   :  { %3468 = vmatprep.subr.bf16.mxu1 %v6438_v39  ;;  %v7154_v39 = vld [vmem:[#allocation8 + $0x204] ss:$16 sps:$4 sm:$0xff]  }
 0x243   :  { %5164 = vmatpush1.bf16.msra.mxu0 %v7122_v38  ;;  %v6510_v38 = vcombine.high %v473_v31, %v477_v32  ;;  %v501_v16 = vld [vmem:[#allocation5 + $0xaf8] sm:$0xff] }
 0x244   :  { %5165 = vmatprep.subr.bf16.mxu0 %v7127_v40  ;;  %v481_v40 = vld [vmem:[#allocation5 + $0xa58] sm:$0xff] }
 0x245   :  { %3469 = vmatpush1.bf16.msra.mxu1 %v6437_v42  ;;  %v6509_v42 = vcombine.low %v473_v31, %v477_v32  ;;  %v513_v4 = vld [vmem:[#allocation5 + $0xb58] sm:$0xff] }
 0x246   :  { %3479 = vmatprep.subr.bf16.mxu1 %v6446_v58  ;;  %v6518_v58 = vcombine.high %v481_v40, %v485_v41  ;;  %v517_v5 = vld [vmem:[#allocation5 + $0xb78] sm:$0xff] }
 0x247   :  { %5166 = vmatpush1.bf16.msra.mxu0 %v7125_v19  ;;  %v7152_v19 = vld [vmem:[#allocation8 + $0x200] ss:$16 sps:$4 sm:$0xff]  }
 0x248   :  { %5167 = vmatprep.subr.bf16.mxu0 %v7130_v43  ;;  %3471 = vmatmul.mubr.bf16.vlgmr.msra.gmra.mrb[8].mxu1 %v8034_v21  ;;  %v7139_v21 = vld [vmem:[#allocation8 + $0x164] ss:$16 sps:$4 sm:$0xff]   ;;  %v8100_v43 = vpack.c.bf16 %v3577_v47, %v3577_v47  ;;  %v7179_v47 = vld [vmem:[#allocation8 + $0x320] ss:$16 sps:$4 sm:$0xff]  }
 0x249   :  { %3480 = vmatpush1.bf16.msra.mxu1 %v6445_v45  ;;  %3511 = vmatprep.mubr.bf16.mxu1 %v8038_v28  ;;  %v6469_v28 = vcombine.low %v433_v62, %v437_v63  ;;  %v493_v45 = vld [vmem:[#allocation5 + $0xab8] sm:$0xff] }
 0x24a   :  { %3481 = vmatprep.subr.bf16.mxu1 %v6454_v49  ;;  %v7155_v49 = vld [vmem:[#allocation8 + $0x220] ss:$16 sps:$4 sm:$0xff]   ;;  %v6526_v36 = vcombine.high %v489_v44, %v493_v45 }
 0x24b   :  { %5168 = vmatpush1.bf16.msra.mxu0 %v7128_v46  ;;  %v6517_v46 = vcombine.low %v481_v40, %v485_v41  ;;  %v505_v62 = vld [vmem:[#allocation5 + $0xb18] sm:$0xff] }
 0x24c   :  { %5169 = vmatprep.subr.bf16.mxu0 %v7133_v50  ;;  %v7160_v50 = vld [vmem:[#allocation8 + $0x244] ss:$16 sps:$4 sm:$0xff]  }
 0x24d   :  { %3482 = vmatpush1.bf16.msra.mxu1 %v6453_v55  ;;  %v6525_v55 = vcombine.low %v489_v44, %v493_v45  ;;  %v509_v63 = vld [vmem:[#allocation5 + $0xb38] sm:$0xff] }
 0x24e   :  { %3483 = vmatprep.subr.bf16.mxu1 %v6462_v59  ;;  %v6534_v59 = vcombine.high %v497_v51, %v501_v16  ;;  %v521_v11 = vld [vmem:[#allocation5 + $0xb98] sm:$0xff] }
 0x24f   :  { %5170 = vmatpush1.bf16.msra.mxu0 %v7131_v56  ;;  %v7158_v56 = vld [vmem:[#allocation8 + $0x240] ss:$16 sps:$4 sm:$0xff]  }
 0x250   :  { %5171 = vmatprep.subr.bf16.mxu0 %v7136_v60  ;;  %v7163_v60 = vld [vmem:[#allocation8 + $0x264] ss:$16 sps:$4 sm:$0xff]   ;;  %v7182_v45 = vld [vmem:[#allocation8 + $0x340] ss:$16 sps:$4 sm:$0xff]  }
 0x251   :  { %3484 = vmatpush1.bf16.msra.mxu1 %v6461_v1  ;;  %v6533_v1 = vcombine.low %v497_v51, %v501_v16  ;;  %v525_v22 = vld [vmem:[#allocation5 + $0xbb8] sm:$0xff] }
 0x252   :  { %3485 = vmatprep.subr.bf16.mxu1 %v6470_v61  ;;  %v6542_v61 = vcombine.high %v505_v62, %v509_v63  ;;  %v529_v17 = vld [vmem:[#allocation5 + $0xbd8] sm:$0xff] }
 0x253   :  { %5172 = vmatpush1.bf16.msra.mxu0 %v7134_v2  ;;  %v7161_v2 = vld [vmem:[#allocation8 + $0x260] ss:$16 sps:$4 sm:$0xff]   ;;  %v7190_v16 = vld [vmem:[#allocation8 + $0x384] ss:$16 sps:$4 sm:$0xff]  }
 0x254   :  { %5173 = vmatprep.subr.bf16.mxu0 %v7139_v21  ;;  %v7166_v21 = vld [vmem:[#allocation8 + $0x284] ss:$16 sps:$4 sm:$0xff]  }
 0x255   :  { %3486 = vmatpush1.bf16.msra.mxu1 %v6469_v28  ;;  %v6541_v28 = vcombine.low %v505_v62, %v509_v63  ;;  %v533_v18 = vld [vmem:[#allocation5 + $0xbf8] sm:$0xff]  ;;  %v614_v62 = vsub.s32 3, %v8073_v57 }
 0x256   :  { %3487 = vmatprep.subr.bf16.mxu1 %v6478_v9  ;;  %v6550_v9 = vcombine.high %v513_v4, %v517_v5  ;;  %v537_v26 = vld [vmem:[#allocation5 + $0xc18] sm:$0xff] }
 0x257   :  { %5174 = vmatpush1.bf16.msra.mxu0 %v7137_v6  ;;  %v7164_v6 = vld [vmem:[#allocation8 + $0x280] ss:$16 sps:$4 sm:$0xff]  }
 0x258   :  { %5175 = vmatprep.subr.bf16.mxu0 %v7142_v10  ;;  %v7169_v10 = vld [vmem:[#allocation8 + $0x2a4] ss:$16 sps:$4 sm:$0xff]   ;;  %v7188_v63 = vld [vmem:[#allocation8 + $0x380] ss:$16 sps:$4 sm:$0xff]  }
 0x259   :  { %3488 = vmatpush1.bf16.msra.mxu1 %v6477_v12  ;;  %v6549_v12 = vcombine.low %v513_v4, %v517_v5  ;;  %v541_v53 = vld [vmem:[#allocation5 + $0xc38] sm:$0xff]  ;;  %v615_v5 = vrot.slane %v8078_v7, %v614_v62 }
 0x25a   :  { %3489 = vmatprep.subr.bf16.mxu1 %v6486_v14  ;;  %v6558_v14 = vcombine.high %v521_v11, %v525_v22  ;;  %v545_v31 = vld [vmem:[#allocation5 + $0xc58] sm:$0xff]  ;;  %v6573_v34 = vcombine.low %v537_v26, %v541_v53 }
 0x25b   :  { %5176 = vmatpush1.bf16.msra.mxu0 %v7140_v13  ;;  %v7167_v13 = vld [vmem:[#allocation8 + $0x2a0] ss:$16 sps:$4 sm:$0xff]  }
 0x25c   :  { %5177 = vmatprep.subr.bf16.mxu0 %v7145_v15  ;;  %v7172_v15 = vld [vmem:[#allocation8 + $0x2c4] ss:$16 sps:$4 sm:$0xff]  }
 0x25d   :  { %3490 = vmatpush1.bf16.msra.mxu1 %v6485_v20  ;;  %v6557_v20 = vcombine.low %v521_v11, %v525_v22  ;;  %v549_v32 = vld [vmem:[#allocation5 + $0xc78] sm:$0xff] }
 0x25e   :  { %3491 = vmatprep.subr.bf16.mxu1 %v6494_v24  ;;  %v6566_v24 = vcombine.high %v529_v17, %v533_v18  ;;  %v557_v40 = vld [vmem:[#allocation5 + $0xcb8] sm:$0xff]  ;;  %v6581_v41 = vcombine.low %v545_v31, %v549_v32 }
 0x25f   :  { %5178 = vmatpush1.bf16.msra.mxu0 %v7143_v23  ;;  %v7170_v23 = vld [vmem:[#allocation8 + $0x2c0] ss:$16 sps:$4 sm:$0xff]   ;;  %v7196_v11 = vld [vmem:[#allocation8 + $0x3c4] ss:$16 sps:$4 sm:$0xff]  }
 0x260   :  { %5179 = vmatprep.subr.bf16.mxu0 %v7148_v25  ;;  %v7175_v25 = vld [vmem:[#allocation8 + $0x2e4] ss:$16 sps:$4 sm:$0xff]  }
 0x261   :  { %3492 = vmatpush1.bf16.msra.mxu1 %v6493_v27  ;;  %v6565_v27 = vcombine.low %v529_v17, %v533_v18  ;;  %v593_v22 = vld [vmem:[#allocation5 + $0xdd8] sm:$0xff] }
 0x262   :  { %3493 = vmatprep.subr.bf16.mxu1 %v6502_v29  ;;  %v6574_v29 = vcombine.high %v537_v26, %v541_v53 }
 0x263   :  { %5180 = vmatpush1.bf16.msra.mxu0 %v7146_v54  ;;  %v7173_v54 = vld [vmem:[#allocation8 + $0x2e0] ss:$16 sps:$4 sm:$0xff]  }
 0x264   :  { %5181 = vmatprep.subr.bf16.mxu0 %v7151_v30  ;;  %v7178_v30 = vld [vmem:[#allocation8 + $0x304] ss:$16 sps:$4 sm:$0xff]  }
 0x265   :  { %3494 = vmatpush1.bf16.msra.mxu1 %v6501_v35  ;;  %v7176_v35 = vld [vmem:[#allocation8 + $0x300] ss:$16 sps:$4 sm:$0xff]  }
 0x266   :  { %3495 = vmatprep.subr.bf16.mxu1 %v6510_v38  ;;  %v7181_v38 = vld [vmem:[#allocation8 + $0x324] ss:$16 sps:$4 sm:$0xff]  }
 0x267   :  { %5182 = vmatpush1.bf16.msra.mxu0 %v7149_v37  ;;  %v6582_v37 = vcombine.high %v545_v31, %v549_v32  ;;  %v7226_v31 = vld [vmem:[#allocation8 + $0x404] ss:$16 sps:$4 sm:$0xff]  }
 0x268   :  { %5192 = vmatprep.subr.bf16.mxu0 %v7154_v39  ;;  %v553_v39 = vld [vmem:[#allocation5 + $0xc98] sm:$0xff] }
 0x269   :  { %3496 = vmatpush1.bf16.msra.mxu1 %v6509_v42  ;;  %v6590_v42 = vcombine.high %v553_v39, %v557_v40  ;;  %v6589_v44 = vcombine.low %v553_v39, %v557_v40  ;;  %v7601_v39 = vld [vmem:[#allocation2 + $0x18] ss:$0 sps:$4 sm:$0xff]  }
 0x26a   :  { %5184 = vmatmul.mubr.bf16.vlgmr.msra.gmra.mrb[8].mxu0 %v8100_v43  ;;  %3497 = vmatprep.subr.bf16.mxu1 %v6518_v58  ;;  %v561_v58 = vld [vmem:[#allocation5 + $0xcd8] sm:$0xff] }
 0x26b   :  { %5193 = vmatpush1.bf16.msra.mxu0 %v7152_v19  ;;  %v7184_v19 = vld [vmem:[#allocation8 + $0x344] ss:$16 sps:$4 sm:$0xff]  }
 0x26c   :  { %5194 = vmatprep.subr.bf16.mxu0 %v7157_v52  ;;  %v565_v52 = vld [vmem:[#allocation5 + $0xcf8] sm:$0xff] }
 0x26d   :  { %3498 = vmatpush1.bf16.msra.mxu1 %v6517_v46  ;;  %v6598_v46 = vcombine.high %v561_v58, %v565_v52  ;;  %v7232_v40 = vld [vmem:[#allocation8 + $0x424] ss:$16 sps:$4 sm:$0xff]  }
 0x26e   :  { %3499 = vmatprep.subr.bf16.mxu1 %v6526_v36  ;;  %v573_v36 = vld [vmem:[#allocation5 + $0xd38] sm:$0xff] }
 0x26f   :  { %5195 = vmatpush1.bf16.msra.mxu0 %v7155_v49  ;;  %v569_v49 = vld [vmem:[#allocation5 + $0xd18] sm:$0xff] }
 0x270   :  { %5196 = vmatprep.subr.bf16.mxu0 %v7160_v50  ;;  %v7185_v50 = vld [vmem:[#allocation8 + $0x360] ss:$16 sps:$4 sm:$0xff]   ;;  %v6606_v51 = vcombine.high %v569_v49, %v573_v36 }
 0x271   :  { %3500 = vmatpush1.bf16.msra.mxu1 %v6525_v55  ;;  %v577_v55 = vld [vmem:[#allocation5 + $0xd58] sm:$0xff] }
 0x272   :  { %3501 = vmatprep.subr.bf16.mxu1 %v6534_v59  ;;  %v610_v59 = vsub.s32 2, %v8073_v57 }
 0x273   :  { %5197 = vmatpush1.bf16.msra.mxu0 %v7158_v56  ;;  %v581_v56 = vld [vmem:[#allocation5 + $0xd78] sm:$0xff] }
 0x274   :  { %5198 = vmatprep.subr.bf16.mxu0 %v7163_v60  ;;  %v6605_v60 = vcombine.low %v569_v49, %v573_v36  ;;  %v611_v4 = vrot.slane %v8078_v7, %v610_v59  ;;  %v7194_v7 = vld [vmem:[#allocation8 + $0x3c0] ss:$16 sps:$4 sm:$0xff]   ;;  %v7250_v49 = vld [vmem:[#allocation8 + $0x484] ss:$16 sps:$4 sm:$0xff]   ;;  %v7212_v36 = vld [vmem:[#allocation8 + $0x88] ss:$16 sps:$4 sm:$0xff]  }
 0x275   :  { %3502 = vmatpush1.bf16.msra.mxu1 %v6533_v1  ;;  %v6614_v1 = vcombine.high %v577_v55, %v581_v56 }
 0x276   :  { %3503 = vmatprep.subr.bf16.mxu1 %v6542_v61  ;;  %v585_v61 = vld [vmem:[#allocation5 + $0xd98] sm:$0xff] }
 0x277   :  { %5199 = vmatpush1.bf16.msra.mxu0 %v7161_v2  ;;  %v7193_v2 = vld [vmem:[#allocation8 + $0x3a4] ss:$16 sps:$4 sm:$0xff]  }
 0x278   :  { %5200 = vmatprep.subr.bf16.mxu0 %v7166_v21  ;;  %v589_v21 = vld [vmem:[#allocation5 + $0xdb8] sm:$0xff] }
 0x279   :  { %3504 = vmatpush1.bf16.msra.mxu1 %v6541_v28  ;;  %v6613_v28 = vcombine.low %v577_v55, %v581_v56  ;;  %v6621_v18 = vcombine.low %v585_v61, %v589_v21  ;;  %v7220_v55 = vld [vmem:[#allocation8 + $0xcc] ss:$16 sps:$4 sm:$0xff]   ;;  %v7254_v56 = vld [vmem:[#allocation8 + $0x4a0] ss:$16 sps:$4 sm:$0xff]  }
 0x27a   :  { %3505 = vmatprep.subr.bf16.mxu1 %v6550_v9  ;;  %v6622_v9 = vcombine.high %v585_v61, %v589_v21  ;;  %v7268_v61 = vld [vmem:[#allocation8 + $0x4e4] ss:$16 sps:$4 sm:$0xff]   ;;  %v7221_v21 = vld [vmem:[#allocation8 + $0xe8] ss:$16 sps:$4 sm:$0xff]  }
 0x27b   :  { %5201 = vmatpush1.bf16.msra.mxu0 %v7164_v6  ;;  %v7191_v6 = vld [vmem:[#allocation8 + $0x3a0] ss:$16 sps:$4 sm:$0xff]  }
 0x27c   :  { %5202 = vmatprep.subr.bf16.mxu0 %v7169_v10 }
 0x27d   :  { %3506 = vmatpush1.bf16.msra.mxu1 %v6549_v12  ;;  %v597_v12 = vld [vmem:[#allocation5 + $0xdf8] sm:$0xff] }
 0x27e   :  { %3507 = vmatprep.subr.bf16.mxu1 %v6558_v14  ;;  %v6629_v53 = vcombine.low %v593_v22, %v597_v12 }
 0x27f   :  { %5203 = vmatpush1.bf16.msra.mxu0 %v7167_v13 }
 0x280   :  { %5204 = vmatprep.subr.bf16.mxu0 %v7172_v15 }
 0x281   :  { %3508 = vmatpush1.bf16.msra.mxu1 %v6557_v20 }
 0x282   :  { %3509 = vmatprep.subr.bf16.mxu1 %v6566_v24 }
 0x283   :  { %5205 = vmatpush1.bf16.msra.mxu0 %v7170_v23  ;;  %v6630_v23 = vcombine.high %v593_v22, %v597_v12  ;;  %v7233_v22 = vld [vmem:[#allocation8 + $0x128] ss:$16 sps:$4 sm:$0xff]   ;;  %v7241_v12 = vld [vmem:[#allocation8 + $0x14c] ss:$16 sps:$4 sm:$0xff]  }
 0x284   :  { %5206 = vmatprep.subr.bf16.mxu0 %v7175_v25  ;;  %v7199_v25 = vld [vmem:[#allocation8 + $0x3e4] ss:$16 sps:$4 sm:$0xff]  }
 0x285   :  { %3510 = vmatpush1.bf16.msra.mxu1 %v6565_v27 }
 0x286   :  { %3520 = vmatprep.subr.bf16.mxu1 %v6574_v29 }
 0x287   :  { %5207 = vmatpush1.bf16.msra.mxu0 %v7173_v54  ;;  %v7197_v54 = vld [vmem:[#allocation8 + $0x3e0] ss:$16 sps:$4 sm:$0xff]  }
 0x288   :  { %5208 = vmatprep.subr.bf16.mxu0 %v7178_v30  ;;  %3512 = vmatmul.mubr.bf16.vlgmr.msra.gmra.mrb[8].mxu1 %v8046_v33  ;;  %v7187_v33 = vld [vmem:[#allocation8 + $0x364] ss:$16 sps:$4 sm:$0xff]   ;;  %v7202_v30 = vld [vmem:[#allocation8 + $0xc] ss:$16 sps:$4 sm:$0xff]  }
 0x289   :  { %3521 = vmatpush1.bf16.msra.mxu1 %v6573_v34  ;;  %3552 = vmatprep.mubr.bf16.mxu1 %v7852_v48  ;;  %v6597_v48 = vcombine.low %v561_v58, %v565_v52  ;;  %v7200_v34 = vld [vmem:[#allocation8 + $0x8] ss:$16 sps:$4 sm:$0xff]   ;;  %v7211_v52 = vld [vmem:[#allocation8 + $0x6c] ss:$16 sps:$4 sm:$0xff]  }
 0x28a   :  { %3522 = vmatprep.subr.bf16.mxu1 %v6582_v37  ;;  %v7206_v58 = vld [vmem:[#allocation8 + $0x48] ss:$16 sps:$4 sm:$0xff]  }
 0x28b   :  { %5209 = vmatpush1.bf16.msra.mxu0 %v7176_v35  ;;  %v7205_v35 = vld [vmem:[#allocation8 + $0x2c] ss:$16 sps:$4 sm:$0xff]  }
 0x28c   :  { %5210 = vmatprep.subr.bf16.mxu0 %v7181_v38  ;;  %v7224_v38 = vld [vmem:[#allocation8 + $0x400] ss:$16 sps:$4 sm:$0xff]  }
 0x28d   :  { %3523 = vmatpush1.bf16.msra.mxu1 %v6581_v41  ;;  %v7203_v41 = vld [vmem:[#allocation8 + $0x28] ss:$16 sps:$4 sm:$0xff]  }
 0x28e   :  { %3524 = vmatprep.subr.bf16.mxu1 %v6590_v42  ;;  %v7230_v42 = vld [vmem:[#allocation8 + $0x420] ss:$16 sps:$4 sm:$0xff]  }
 0x28f   :  { %5211 = vmatpush1.bf16.msra.mxu0 %v7179_v47  ;;  %v7208_v47 = vld [vmem:[#allocation8 + $0x4c] ss:$16 sps:$4 sm:$0xff]  }
 0x290   :  { %5212 = vmatprep.subr.bf16.mxu0 %v7184_v19  ;;  %v7238_v19 = vld [vmem:[#allocation8 + $0x444] ss:$16 sps:$4 sm:$0xff]  }
 0x291   :  { %3525 = vmatpush1.bf16.msra.mxu1 %v6589_v44  ;;  %v7236_v44 = vld [vmem:[#allocation8 + $0x440] ss:$16 sps:$4 sm:$0xff]  }
 0x292   :  { %3526 = vmatprep.subr.bf16.mxu1 %v6598_v46  ;;  %v7209_v46 = vld [vmem:[#allocation8 + $0x68] ss:$16 sps:$4 sm:$0xff]  }
 0x293   :  { %5213 = vmatpush1.bf16.msra.mxu0 %v7182_v45  ;;  %v7244_v45 = vld [vmem:[#allocation8 + $0x464] ss:$16 sps:$4 sm:$0xff]  }
 0x294   :  { %5214 = vmatprep.subr.bf16.mxu0 %v7187_v33  ;;  %v7214_v33 = vld [vmem:[#allocation8 + $0x8c] ss:$16 sps:$4 sm:$0xff]  }
 0x295   :  { %3527 = vmatpush1.bf16.msra.mxu1 %v6597_v48  ;;  %v7217_v48 = vld [vmem:[#allocation8 + $0xac] ss:$16 sps:$4 sm:$0xff]  }
 0x296   :  { %3528 = vmatprep.subr.bf16.mxu1 %v6606_v51  ;;  %v7256_v51 = vld [vmem:[#allocation8 + $0x4a4] ss:$16 sps:$4 sm:$0xff]  }
 0x297   :  { %5215 = vmatpush1.bf16.msra.mxu0 %v7185_v50  ;;  %v7248_v50 = vld [vmem:[#allocation8 + $0x480] ss:$16 sps:$4 sm:$0xff]  }
 0x298   :  { %5216 = vmatprep.subr.bf16.mxu0 %v7190_v16  ;;  %v7215_v16 = vld [vmem:[#allocation8 + $0xa8] ss:$16 sps:$4 sm:$0xff]  }
 0x299   :  { %3529 = vmatpush1.bf16.msra.mxu1 %v6605_v60  ;;  %v7262_v60 = vld [vmem:[#allocation8 + $0x4c4] ss:$16 sps:$4 sm:$0xff]  }
 0x29a   :  { %3530 = vmatprep.subr.bf16.mxu1 %v6614_v1  ;;  %v7223_v1 = vld [vmem:[#allocation8 + $0xec] ss:$16 sps:$4 sm:$0xff]  }
 0x29b   :  { %5217 = vmatpush1.bf16.msra.mxu0 %v7188_v63  ;;  %v3226_v10 = vpop.f32.mrb[4].mxu1  ;;  %v7218_v63 = vld [vmem:[#allocation8 + $0xc8] ss:$16 sps:$4 sm:$0xff]  }
 0x29c   :  { %5218 = vmatprep.subr.bf16.mxu0 %v7193_v2  ;;  %v6994_v13 = vadd.f32 %v3226_v10, %v611_v4  ;;  %v3228_v14 = vpop.f32.mrb[5].mxu1  ;;  %v7260_v2 = vld [vmem:[#allocation8 + $0x4c0] ss:$16 sps:$4 sm:$0xff]   ;;  %v7229_v4 = vld [vmem:[#allocation8 + $0x10c] ss:$16 sps:$4 sm:$0xff]  }
 0x29d   :  { %v6995_v15 = vadd.f32 %v3228_v14, %v615_v5  ;;  %v3230_v17 = vpop.f32.mrb[6].mxu1  ;;  %3531 = vmatpush1.bf16.msra.mxu1 %v6613_v28  ;;  %v7266_v5 = vld [vmem:[#allocation8 + $0x4e0] ss:$16 sps:$4 sm:$0xff]   ;;  %v7274_v28 = vld [vmem:[#allocation8 + $0x504] ss:$16 sps:$4 sm:$0xff]  }
 0x29e   :  { %v3231_v20 = vpop.f32.mrb[7].mxu1  ;;  %3532 = vmatprep.subr.bf16.mxu1 %v6622_v9  ;;  %v3571_v26 = vmul.f32 0.2, %v6994_v13  ;;  %vm3563_vm3 = vcmp.gt.f32.partialorder %v6994_v13, 0.0  ;;  %v7235_v9 = vld [vmem:[#allocation8 + $0x12c] ss:$16 sps:$4 sm:$0xff]  }
 0x29f   :  { %5219 = vmatpush1.bf16.msra.mxu0 %v7191_v6  ;;  %vm3564_vm2 = vcmp.gt.f32.partialorder %v6995_v15, 0.0  ;;  %v3572_v24 = vmul.f32 0.2, %v6995_v15  ;;  %v7227_v6 = vld [vmem:[#allocation8 + $0x108] ss:$16 sps:$4 sm:$0xff]  }
 0x2a0   :  { %5220 = vmatprep.subr.bf16.mxu0 %v7196_v11  ;;  %v3579_v32 = vsel %vm3563_vm3, %v6994_v13, %v3571_v26  ;;  %v7272_v10 = vld [vmem:[#allocation8 + $0x500] ss:$16 sps:$4 sm:$0xff]   ;;  %v7280_v11 = vld [vmem:[#allocation8 + $0x524] ss:$16 sps:$4 sm:$0xff]   ;;  %v7247_v17 = vld [vmem:[#allocation8 + $0x16c] ss:$16 sps:$4 sm:$0xff]  }
 0x2a1   :  { %3533 = vmatpush1.bf16.msra.mxu1 %v6621_v18  ;;  %v3580_v27 = vsel %vm3564_vm2, %v6995_v15, %v3572_v24  ;;  %v8116_v37 = vpack.c.bf16 %v3579_v32, %v3579_v32  ;;  %v7278_v13 = vld [vmem:[#allocation8 + $0x520] ss:$16 sps:$4 sm:$0xff]   ;;  %v7286_v14 = vld [vmem:[#allocation8 + $0x544] ss:$16 sps:$4 sm:$0xff]   ;;  %v7239_v15 = vld [vmem:[#allocation8 + $0x148] ss:$16 sps:$4 sm:$0xff]  }
 0x2a2   :  { %3534 = vmatprep.subr.bf16.mxu1 %v6630_v23  ;;  %v8113_v29 = vpack.c.bf16 %v3580_v27, %v3580_v27  ;;  %v7284_v18 = vld [vmem:[#allocation8 + $0x540] ss:$16 sps:$4 sm:$0xff]   ;;  %v7292_v20 = vld [vmem:[#allocation8 + $0x564] ss:$16 sps:$4 sm:$0xff]   ;;  %v7253_v23 = vld [vmem:[#allocation8 + $0x18c] ss:$16 sps:$4 sm:$0xff]  }
 0x2a3   :  { %5221 = vmatpush1.bf16.msra.mxu0 %v7194_v7  ;;  %v7245_v7 = vld [vmem:[#allocation8 + $0x168] ss:$16 sps:$4 sm:$0xff]   ;;  %v7290_v24 = vld [vmem:[#allocation8 + $0x560] ss:$16 sps:$4 sm:$0xff]  }
 0x2a4   :  { %5222 = vmatprep.subr.bf16.mxu0 %v7199_v25  ;;  %5224 = vmatprep.mubr.bf16.mxu0 %v8113_v29  ;;  %v7298_v25 = vld [vmem:[#allocation8 + $0x584] ss:$16 sps:$4 sm:$0xff]   ;;  %v7251_v26 = vld [vmem:[#allocation8 + $0x188] ss:$16 sps:$4 sm:$0xff]   ;;  %v7296_v27 = vld [vmem:[#allocation8 + $0x580] ss:$16 sps:$4 sm:$0xff]  }
 0x2a5   :  { %3535 = vmatpush1.bf16.msra.mxu1 %v6629_v53  ;;  %v7259_v53 = vld [vmem:[#allocation8 + $0x1ac] ss:$16 sps:$4 sm:$0xff]   ;;  %v7302_v32 = vld [vmem:[#allocation8 + $0x5a0] ss:$16 sps:$4 sm:$0xff]  }
 0x2a6   :  { %5315 = vmatprep.subr.bf16.mxu1 %v7202_v30  ;;  %v7257_v30 = vld [vmem:[#allocation8 + $0x1a8] ss:$16 sps:$4 sm:$0xff]  }
 0x2a7   :  { %5223 = vmatpush1.bf16.msra.mxu0 %v7197_v54  ;;  %v7304_v54 = vld [vmem:[#allocation8 + $0x5a4] ss:$16 sps:$4 sm:$0xff]  }
 0x2a8   :  { %5233 = vmatprep.subr.bf16.mxu0 %v7226_v31  ;;  %3553 = vmatmul.mubr.bf16.vlgmr.msra.gmra.mrb[8].mxu1 %v7601_v39  ;;  %v7265_v31 = vld [vmem:[#allocation8 + $0x1cc] ss:$16 sps:$4 sm:$0xff]   ;;  %v7308_v39 = vld [vmem:[#allocation8 + $0x5c0] ss:$16 sps:$4 sm:$0xff]  }
 0x2a9   :  { %5316 = vmatpush1.bf16.msra.mxu1 %v7200_v34  ;;  %5347 = vmatprep.mubr.bf16.mxu1 %v8091_v0  ;;  %v7242_v0 = vld [vmem:[#allocation8 + $0x460] ss:$16 sps:$4 sm:$0xff]   ;;  %v7310_v34 = vld [vmem:[#allocation8 + $0x5c4] ss:$16 sps:$4 sm:$0xff]  }
 0x2aa   :  { %5225 = vmatmul.mubr.bf16.vlgmr.msra.gmra.mrb[8].mxu0 %v8116_v37  ;;  %5317 = vmatprep.subr.bf16.mxu1 %v7205_v35  ;;  %v7263_v35 = vld [vmem:[#allocation8 + $0x1c8] ss:$16 sps:$4 sm:$0xff]  }
 0x2ab   :  { %5234 = vmatpush1.bf16.msra.mxu0 %v7224_v38  ;;  %v7271_v38 = vld [vmem:[#allocation8 + $0x1ec] ss:$16 sps:$4 sm:$0xff]  }
 0x2ac   :  { %5235 = vmatprep.subr.bf16.mxu0 %v7232_v40  ;;  %v7316_v40 = vld [vmem:[#allocation8 + $0x5e4] ss:$16 sps:$4 sm:$0xff]  }
 0x2ad   :  { %5318 = vmatpush1.bf16.msra.mxu1 %v7203_v41  ;;  %v7269_v41 = vld [vmem:[#allocation8 + $0x1e8] ss:$16 sps:$4 sm:$0xff]  }
 0x2ae   :  { %5319 = vmatprep.subr.bf16.mxu1 %v7208_v47  ;;  %v7277_v47 = vld [vmem:[#allocation8 + $0x20c] ss:$16 sps:$4 sm:$0xff]  }
 0x2af   :  { %5236 = vmatpush1.bf16.msra.mxu0 %v7230_v42  ;;  %v7314_v42 = vld [vmem:[#allocation8 + $0x5e0] ss:$16 sps:$4 sm:$0xff]  }
 0x2b0   :  { %5237 = vmatprep.subr.bf16.mxu0 %v7238_v19  ;;  %v7370_v19 = vld [vmem:[#allocation8 + $0x604] ss:$16 sps:$4 sm:$0xff]  }
 0x2b1   :  { %5320 = vmatpush1.bf16.msra.mxu1 %v7206_v58  ;;  %v7275_v58 = vld [vmem:[#allocation8 + $0x208] ss:$16 sps:$4 sm:$0xff]  }
 0x2b2   :  { %5321 = vmatprep.subr.bf16.mxu1 %v7211_v52  ;;  %v7283_v52 = vld [vmem:[#allocation8 + $0x22c] ss:$16 sps:$4 sm:$0xff]  }
 0x2b3   :  { %5238 = vmatpush1.bf16.msra.mxu0 %v7236_v44  ;;  %v7281_v44 = vld [vmem:[#allocation8 + $0x228] ss:$16 sps:$4 sm:$0xff]  }
 0x2b4   :  { %5239 = vmatprep.subr.bf16.mxu0 %v7244_v45  ;;  %v7289_v45 = vld [vmem:[#allocation8 + $0x24c] ss:$16 sps:$4 sm:$0xff]  }
 0x2b5   :  { %5322 = vmatpush1.bf16.msra.mxu1 %v7209_v46  ;;  %v7287_v46 = vld [vmem:[#allocation8 + $0x248] ss:$16 sps:$4 sm:$0xff]  }
 0x2b6   :  { %5323 = vmatprep.subr.bf16.mxu1 %v7214_v33  ;;  %v7295_v33 = vld [vmem:[#allocation8 + $0x26c] ss:$16 sps:$4 sm:$0xff]  }
 0x2b7   :  { %5240 = vmatpush1.bf16.msra.mxu0 %v7242_v0  ;;  %v7293_v0 = vld [vmem:[#allocation8 + $0x268] ss:$16 sps:$4 sm:$0xff]  }
 0x2b8   :  { %5241 = vmatprep.subr.bf16.mxu0 %v7250_v49  ;;  %v7301_v49 = vld [vmem:[#allocation8 + $0x28c] ss:$16 sps:$4 sm:$0xff]  }
 0x2b9   :  { %5324 = vmatpush1.bf16.msra.mxu1 %v7212_v36  ;;  %v7299_v36 = vld [vmem:[#allocation8 + $0x288] ss:$16 sps:$4 sm:$0xff]  }
 0x2ba   :  { %5325 = vmatprep.subr.bf16.mxu1 %v7217_v48  ;;  %v618_v48 = vsub.s32 4, %v8073_v57 }
 0x2bb   :  { %5242 = vmatpush1.bf16.msra.mxu0 %v7248_v50  ;;  %v7307_v50 = vld [vmem:[#allocation8 + $0x2ac] ss:$16 sps:$4 sm:$0xff]  }
 0x2bc   :  { %5243 = vmatprep.subr.bf16.mxu0 %v7256_v51 }
 0x2bd   :  { %5326 = vmatpush1.bf16.msra.mxu1 %v7215_v16  ;;  %v7305_v16 = vld [vmem:[#allocation8 + $0x2a8] ss:$16 sps:$4 sm:$0xff]  }
 0x2be   :  { %5327 = vmatprep.subr.bf16.mxu1 %v7220_v55 }
 0x2bf   :  { %5244 = vmatpush1.bf16.msra.mxu0 %v7254_v56  ;;  %v7313_v56 = vld [vmem:[#allocation8 + $0x2cc] ss:$16 sps:$4 sm:$0xff]  }
 0x2c0   :  { %5245 = vmatprep.subr.bf16.mxu0 %v7262_v60 }
 0x2c1   :  { %5328 = vmatpush1.bf16.msra.mxu1 %v7218_v63 }
 0x2c2   :  { %5329 = vmatprep.subr.bf16.mxu1 %v7223_v1 }
 0x2c3   :  { %5246 = vmatpush1.bf16.msra.mxu0 %v7260_v2  ;;  %v7311_v2 = vld [vmem:[#allocation8 + $0x2c8] ss:$16 sps:$4 sm:$0xff]  }
 0x2c4   :  { %5247 = vmatprep.subr.bf16.mxu0 %v7268_v61 }
 0x2c5   :  { %5330 = vmatpush1.bf16.msra.mxu1 %v7221_v21 }
 0x2c6   :  { %5331 = vmatprep.subr.bf16.mxu1 %v7229_v4  ;;  %v7319_v4 = vld [vmem:[#allocation8 + $0x2ec] ss:$16 sps:$4 sm:$0xff]  }
 0x2c7   :  { %5248 = vmatpush1.bf16.msra.mxu0 %v7266_v5 }
 0x2c8   :  { %5249 = vmatprep.subr.bf16.mxu0 %v7274_v28 }
 0x2c9   :  { %5332 = vmatpush1.bf16.msra.mxu1 %v7227_v6 }
 0x2ca   :  { %5333 = vmatprep.subr.bf16.mxu1 %v7235_v9 }
 0x2cb   :  { %5250 = vmatpush1.bf16.msra.mxu0 %v7272_v10  ;;  %v7317_v10 = vld [vmem:[#allocation8 + $0x2e8] ss:$16 sps:$4 sm:$0xff]  }
 0x2cc   :  { %5251 = vmatprep.subr.bf16.mxu0 %v7280_v11 }
 0x2cd   :  { %5334 = vmatpush1.bf16.msra.mxu1 %v7233_v22  ;;  %v7322_v22 = vld [vmem:[#allocation8 + $0x30c] ss:$16 sps:$4 sm:$0xff]  }
 0x2ce   :  { %5335 = vmatprep.subr.bf16.mxu1 %v7241_v12 }
 0x2cf   :  { %5252 = vmatpush1.bf16.msra.mxu0 %v7278_v13  ;;  %v7368_v13 = vld [vmem:[#allocation8 + $0x600] ss:$16 sps:$4 sm:$0xff]  }
 0x2d0   :  { %5253 = vmatprep.subr.bf16.mxu0 %v7286_v14 }
 0x2d1   :  { %5336 = vmatpush1.bf16.msra.mxu1 %v7239_v15  ;;  %v7376_v15 = vld [vmem:[#allocation8 + $0x624] ss:$16 sps:$4 sm:$0xff]  }
 0x2d2   :  { %5337 = vmatprep.subr.bf16.mxu1 %v7247_v17  ;;  %v7320_v17 = vld [vmem:[#allocation8 + $0x308] ss:$16 sps:$4 sm:$0xff]  }
 0x2d3   :  { %5254 = vmatpush1.bf16.msra.mxu0 %v7284_v18  ;;  %v7325_v18 = vld [vmem:[#allocation8 + $0x32c] ss:$16 sps:$4 sm:$0xff]  }
 0x2d4   :  { %5255 = vmatprep.subr.bf16.mxu0 %v7292_v20  ;;  %v7374_v20 = vld [vmem:[#allocation8 + $0x620] ss:$16 sps:$4 sm:$0xff]  }
 0x2d5   :  { %5338 = vmatpush1.bf16.msra.mxu1 %v7245_v7  ;;  %v7382_v7 = vld [vmem:[#allocation8 + $0x644] ss:$16 sps:$4 sm:$0xff]  }
 0x2d6   :  { %5339 = vmatprep.subr.bf16.mxu1 %v7253_v23  ;;  %v7323_v23 = vld [vmem:[#allocation8 + $0x328] ss:$16 sps:$4 sm:$0xff]  }
 0x2d7   :  { %5256 = vmatpush1.bf16.msra.mxu0 %v7290_v24  ;;  %v7328_v24 = vld [vmem:[#allocation8 + $0x34c] ss:$16 sps:$4 sm:$0xff]  }
 0x2d8   :  { %5257 = vmatprep.subr.bf16.mxu0 %v7298_v25  ;;  %v7380_v25 = vld [vmem:[#allocation8 + $0x640] ss:$16 sps:$4 sm:$0xff]  }
 0x2d9   :  { %5340 = vmatpush1.bf16.msra.mxu1 %v7251_v26  ;;  %v7388_v26 = vld [vmem:[#allocation8 + $0x664] ss:$16 sps:$4 sm:$0xff]  }
 0x2da   :  { %5341 = vmatprep.subr.bf16.mxu1 %v7259_v53  ;;  %v7326_v53 = vld [vmem:[#allocation8 + $0x348] ss:$16 sps:$4 sm:$0xff]  }
 0x2db   :  { %5258 = vmatpush1.bf16.msra.mxu0 %v7296_v27  ;;  %v7331_v27 = vld [vmem:[#allocation8 + $0x36c] ss:$16 sps:$4 sm:$0xff]  }
 0x2dc   :  { %5259 = vmatprep.subr.bf16.mxu0 %v7304_v54  ;;  %v7386_v54 = vld [vmem:[#allocation8 + $0x660] ss:$16 sps:$4 sm:$0xff]  }
 0x2dd   :  { %5342 = vmatpush1.bf16.msra.mxu1 %v7257_v30  ;;  %v7394_v30 = vld [vmem:[#allocation8 + $0x684] ss:$16 sps:$4 sm:$0xff]  }
 0x2de   :  { %5343 = vmatprep.subr.bf16.mxu1 %v7265_v31  ;;  %v7329_v31 = vld [vmem:[#allocation8 + $0x368] ss:$16 sps:$4 sm:$0xff]  }
 0x2df   :  { %5260 = vmatpush1.bf16.msra.mxu0 %v7302_v32  ;;  %v7334_v32 = vld [vmem:[#allocation8 + $0x38c] ss:$16 sps:$4 sm:$0xff]  }
 0x2e0   :  { %5261 = vmatprep.subr.bf16.mxu0 %v7310_v34  ;;  %v7392_v34 = vld [vmem:[#allocation8 + $0x680] ss:$16 sps:$4 sm:$0xff]  }
 0x2e1   :  { %5344 = vmatpush1.bf16.msra.mxu1 %v7263_v35  ;;  %v7400_v35 = vld [vmem:[#allocation8 + $0x6a4] ss:$16 sps:$4 sm:$0xff]  }
 0x2e2   :  { %5345 = vmatprep.subr.bf16.mxu1 %v7271_v38  ;;  %v7332_v38 = vld [vmem:[#allocation8 + $0x388] ss:$16 sps:$4 sm:$0xff]  }
 0x2e3   :  { %5262 = vmatpush1.bf16.msra.mxu0 %v7308_v39  ;;  %v7337_v39 = vld [vmem:[#allocation8 + $0x3ac] ss:$16 sps:$4 sm:$0xff]  }
 0x2e4   :  { %5263 = vmatprep.subr.bf16.mxu0 %v7316_v40  ;;  %v7398_v40 = vld [vmem:[#allocation8 + $0x6a0] ss:$16 sps:$4 sm:$0xff]  }
 0x2e5   :  { %5346 = vmatpush1.bf16.msra.mxu1 %v7269_v41  ;;  %v7406_v41 = vld [vmem:[#allocation8 + $0x6c4] ss:$16 sps:$4 sm:$0xff]  }
 0x2e6   :  { %5356 = vmatprep.subr.bf16.mxu1 %v7277_v47  ;;  %v7335_v47 = vld [vmem:[#allocation8 + $0x3a8] ss:$16 sps:$4 sm:$0xff]  }
 0x2e7   :  { %5264 = vmatpush1.bf16.msra.mxu0 %v7314_v42  ;;  %v7340_v42 = vld [vmem:[#allocation8 + $0x3cc] ss:$16 sps:$4 sm:$0xff]  }
 0x2e8   :  { %5348 = vmatmul.mubr.bf16.vlgmr.msra.gmra.mrb[12].mxu1 %v8100_v43  ;;  %5274 = vmatprep.subr.bf16.mxu0 %v7370_v19  ;;  %v622_v43 = vsub.s32 5, %v8073_v57  ;;  %v7404_v19 = vld [vmem:[#allocation8 + $0x6c0] ss:$16 sps:$4 sm:$0xff]  }
 0x2e9   :  { %5357 = vmatpush1.bf16.msra.mxu1 %v7275_v58  ;;  %5388 = vmatprep.mubr.bf16.mxu1 %v8113_v29  ;;  %v8124_v29 = vld [vmem:[#allocation7] sm:$0xff]  ;;  %v7412_v58 = vld [vmem:[#allocation8 + $0x6e4] ss:$16 sps:$4 sm:$0xff]  }
 0x2ea   :  { %5358 = vmatprep.subr.bf16.mxu1 %v7283_v52  ;;  %v619_v51 = vrot.slane %v8124_v29, %v618_v48  ;;  %v623_v55 = vrot.slane %v8124_v29, %v622_v43  ;;  %v7338_v52 = vld [vmem:[#allocation8 + $0x3c8] ss:$16 sps:$4 sm:$0xff]   ;;  %v7349_v43 = vld [vmem:[#allocation8 + $0x42c] ss:$16 sps:$4 sm:$0xff]  }
 0x2eb   :  { %v7344_v48 = vld [vmem:[#allocation8 + $0x408] ss:$16 sps:$4 sm:$0xff]  }
 0x2ed   :  { %5359 = vmatpush1.bf16.msra.mxu1 %v7281_v44  ;;  %v7343_v44 = vld [vmem:[#allocation8 + $0x3ec] ss:$16 sps:$4 sm:$0xff]  }
 0x2ee   :  { %5360 = vmatprep.subr.bf16.mxu1 %v7289_v45  ;;  %v7410_v45 = vld [vmem:[#allocation8 + $0x6e0] ss:$16 sps:$4 sm:$0xff]  }
 0x2f1   :  { %5361 = vmatpush1.bf16.msra.mxu1 %v7287_v46  ;;  %v7418_v46 = vld [vmem:[#allocation8 + $0x704] ss:$16 sps:$4 sm:$0xff]  }
 0x2f2   :  { %5362 = vmatprep.subr.bf16.mxu1 %v7295_v33  ;;  %v7341_v33 = vld [vmem:[#allocation8 + $0x3e8] ss:$16 sps:$4 sm:$0xff]  }
 0x2f5   :  { %5363 = vmatpush1.bf16.msra.mxu1 %v7293_v0  ;;  %v7346_v0 = vld [vmem:[#allocation8 + $0x40c] ss:$16 sps:$4 sm:$0xff]  }
 0x2f6   :  { %5364 = vmatprep.subr.bf16.mxu1 %v7301_v49  ;;  %v7416_v49 = vld [vmem:[#allocation8 + $0x700] ss:$16 sps:$4 sm:$0xff]  }
 0x2f9   :  { %5365 = vmatpush1.bf16.msra.mxu1 %v7299_v36  ;;  %v7424_v36 = vld [vmem:[#allocation8 + $0x724] ss:$16 sps:$4 sm:$0xff]  }
 0x2fa   :  { %5366 = vmatprep.subr.bf16.mxu1 %v7307_v50  ;;  %v7422_v50 = vld [vmem:[#allocation8 + $0x720] ss:$16 sps:$4 sm:$0xff]  }
 0x2fd   :  { %v3390_v60 = vpop.f32.mrb[4].mxu0  ;;  %5367 = vmatpush1.bf16.msra.mxu1 %v7305_v16  ;;  %v7347_v16 = vld [vmem:[#allocation8 + $0x428] ss:$16 sps:$4 sm:$0xff]  }
 0x2fe   :  { %v6996_v63 = vadd.f32 %v3390_v60, %v619_v51  ;;  %v3392_v1 = vpop.f32.mrb[5].mxu0  ;;  %5368 = vmatprep.subr.bf16.mxu1 %v7313_v56  ;;  %v7430_v51 = vld [vmem:[#allocation8 + $0x744] ss:$16 sps:$4 sm:$0xff]   ;;  %v7428_v56 = vld [vmem:[#allocation8 + $0x740] ss:$16 sps:$4 sm:$0xff]  }
 0x2ff   :  { %v6997_v61 = vadd.f32 %v3392_v1, %v623_v55  ;;  %v3394_v21 = vpop.f32.mrb[6].mxu0  ;;  %v7352_v55 = vld [vmem:[#allocation8 + $0x44c] ss:$16 sps:$4 sm:$0xff]   ;;  %v7436_v60 = vld [vmem:[#allocation8 + $0x764] ss:$16 sps:$4 sm:$0xff]  }
 0x300   :  { %vm3565_vm4 = vcmp.gt.f32.partialorder %v6996_v63, 0.0  ;;  %v3573_v5 = vmul.f32 0.2, %v6996_v63  ;;  %v3395_v28 = vpop.f32.mrb[7].mxu0  ;;  %v7355_v1 = vld [vmem:[#allocation8 + $0x46c] ss:$16 sps:$4 sm:$0xff]  }
 0x301   :  { %vm3566_vm5 = vcmp.gt.f32.partialorder %v6997_v61, 0.0  ;;  %v3574_v6 = vmul.f32 0.2, %v6997_v61  ;;  %5369 = vmatpush1.bf16.msra.mxu1 %v7311_v2  ;;  %v7434_v2 = vld [vmem:[#allocation8 + $0x760] ss:$16 sps:$4 sm:$0xff]  }
 0x302   :  { %v3581_v9 = vsel %vm3565_vm4, %v6996_v63, %v3573_v5  ;;  %5370 = vmatprep.subr.bf16.mxu1 %v7319_v4  ;;  %v7350_v63 = vld [vmem:[#allocation8 + $0x448] ss:$16 sps:$4 sm:$0xff]   ;;  %v7358_v21 = vld [vmem:[#allocation8 + $0x48c] ss:$16 sps:$4 sm:$0xff]   ;;  %v7440_v4 = vld [vmem:[#allocation8 + $0x780] ss:$16 sps:$4 sm:$0xff]  }
 0x303   :  { %v3582_v11 = vsel %vm3566_vm5, %v6997_v61, %v3574_v6  ;;  %v8130_v14 = vpack.c.bf16 %v3581_v9, %v3581_v9  ;;  %v7353_v61 = vld [vmem:[#allocation8 + $0x468] ss:$16 sps:$4 sm:$0xff]   ;;  %v7448_v5 = vld [vmem:[#allocation8 + $0x7a4] ss:$16 sps:$4 sm:$0xff]   ;;  %v7361_v6 = vld [vmem:[#allocation8 + $0x4ac] ss:$16 sps:$4 sm:$0xff]  }
 0x304   :  { %v8128_v12 = vpack.c.bf16 %v3582_v11, %v3582_v11  ;;  %v7356_v28 = vld [vmem:[#allocation8 + $0x488] ss:$16 sps:$4 sm:$0xff]   ;;  %v7446_v9 = vld [vmem:[#allocation8 + $0x7a0] ss:$16 sps:$4 sm:$0xff]  }
 0x305   :  { %5371 = vmatpush1.bf16.msra.mxu1 %v7317_v10  ;;  %v7454_v10 = vld [vmem:[#allocation8 + $0x7c4] ss:$16 sps:$4 sm:$0xff]   ;;  %v7359_v11 = vld [vmem:[#allocation8 + $0x4a8] ss:$16 sps:$4 sm:$0xff]  }
 0x306   :  { %5265 = vmatprep.mubr.bf16.mxu0 %v8128_v12  ;;  %5372 = vmatprep.subr.bf16.mxu1 %v7322_v22  ;;  %v7364_v22 = vld [vmem:[#allocation8 + $0x4cc] ss:$16 sps:$4 sm:$0xff]  }
 0x307   :  { %5266 = vmatmul.mubr.bf16.vlgmr.msra.gmra.mrb[8].mxu0 %v8130_v14 }
 0x308   :  { %5275 = vmatpush1.bf16.msra.mxu0 %v7368_v13  ;;  %v7460_v13 = vld [vmem:[#allocation8 + $0x7e4] ss:$16 sps:$4 sm:$0xff]  }
 0x309   :  { %5276 = vmatprep.subr.bf16.mxu0 %v7376_v15  ;;  %5373 = vmatpush1.bf16.msra.mxu1 %v7320_v17  ;;  %v7362_v15 = vld [vmem:[#allocation8 + $0x4c8] ss:$16 sps:$4 sm:$0xff]   ;;  %v7367_v17 = vld [vmem:[#allocation8 + $0x4ec] ss:$16 sps:$4 sm:$0xff]  }
 0x30a   :  { %5374 = vmatprep.subr.bf16.mxu1 %v7325_v18  ;;  %v7458_v18 = vld [vmem:[#allocation8 + $0x7e0] ss:$16 sps:$4 sm:$0xff]  }
 0x30c   :  { %5277 = vmatpush1.bf16.msra.mxu0 %v7374_v20  ;;  %v7490_v20 = vld [vmem:[#allocation11 + $0x4] ss:$8 sps:$4 sm:$0xff]  }
 0x30d   :  { %5278 = vmatprep.subr.bf16.mxu0 %v7382_v7  ;;  %5375 = vmatpush1.bf16.msra.mxu1 %v7323_v23  ;;  %v7365_v7 = vld [vmem:[#allocation8 + $0x4e8] ss:$16 sps:$4 sm:$0xff]   ;;  %v7373_v23 = vld [vmem:[#allocation8 + $0x50c] ss:$16 sps:$4 sm:$0xff]  }
 0x30e   :  { %5376 = vmatprep.subr.bf16.mxu1 %v7328_v24  ;;  %v7371_v24 = vld [vmem:[#allocation8 + $0x508] ss:$16 sps:$4 sm:$0xff]  }
 0x310   :  { %5279 = vmatpush1.bf16.msra.mxu0 %v7380_v25  ;;  %v7379_v25 = vld [vmem:[#allocation8 + $0x52c] ss:$16 sps:$4 sm:$0xff]  }
 0x311   :  { %5280 = vmatprep.subr.bf16.mxu0 %v7388_v26  ;;  %5377 = vmatpush1.bf16.msra.mxu1 %v7326_v53  ;;  %v7377_v26 = vld [vmem:[#allocation8 + $0x528] ss:$16 sps:$4 sm:$0xff]   ;;  %v7385_v53 = vld [vmem:[#allocation8 + $0x54c] ss:$16 sps:$4 sm:$0xff]  }
 0x312   :  { %5378 = vmatprep.subr.bf16.mxu1 %v7331_v27  ;;  %v7383_v27 = vld [vmem:[#allocation8 + $0x548] ss:$16 sps:$4 sm:$0xff]  }
 0x314   :  { %5281 = vmatpush1.bf16.msra.mxu0 %v7386_v54  ;;  %v7391_v54 = vld [vmem:[#allocation8 + $0x56c] ss:$16 sps:$4 sm:$0xff]  }
 0x315   :  { %5282 = vmatprep.subr.bf16.mxu0 %v7394_v30  ;;  %5379 = vmatpush1.bf16.msra.mxu1 %v7329_v31  ;;  %v7389_v30 = vld [vmem:[#allocation8 + $0x568] ss:$16 sps:$4 sm:$0xff]   ;;  %v7397_v31 = vld [vmem:[#allocation8 + $0x58c] ss:$16 sps:$4 sm:$0xff]  }
 0x316   :  { %5380 = vmatprep.subr.bf16.mxu1 %v7334_v32  ;;  %v7395_v32 = vld [vmem:[#allocation8 + $0x588] ss:$16 sps:$4 sm:$0xff]  }
 0x318   :  { %5283 = vmatpush1.bf16.msra.mxu0 %v7392_v34  ;;  %v7403_v34 = vld [vmem:[#allocation8 + $0x5ac] ss:$16 sps:$4 sm:$0xff]  }
 0x319   :  { %5284 = vmatprep.subr.bf16.mxu0 %v7400_v35  ;;  %5381 = vmatpush1.bf16.msra.mxu1 %v7332_v38  ;;  %v7401_v35 = vld [vmem:[#allocation8 + $0x5a8] ss:$16 sps:$4 sm:$0xff]   ;;  %v7409_v38 = vld [vmem:[#allocation8 + $0x5cc] ss:$16 sps:$4 sm:$0xff]  }
 0x31a   :  { %5382 = vmatprep.subr.bf16.mxu1 %v7337_v39  ;;  %v7407_v39 = vld [vmem:[#allocation8 + $0x5c8] ss:$16 sps:$4 sm:$0xff]  }
 0x31c   :  { %5285 = vmatpush1.bf16.msra.mxu0 %v7398_v40  ;;  %v7415_v40 = vld [vmem:[#allocation8 + $0x5ec] ss:$16 sps:$4 sm:$0xff]  }
 0x31d   :  { %5286 = vmatprep.subr.bf16.mxu0 %v7406_v41  ;;  %5383 = vmatpush1.bf16.msra.mxu1 %v7335_v47  ;;  %v7413_v41 = vld [vmem:[#allocation8 + $0x5e8] ss:$16 sps:$4 sm:$0xff]   ;;  %v7421_v47 = vld [vmem:[#allocation8 + $0x60c] ss:$16 sps:$4 sm:$0xff]  }
 0x31e   :  { %5384 = vmatprep.subr.bf16.mxu1 %v7340_v42  ;;  %v7419_v42 = vld [vmem:[#allocation8 + $0x608] ss:$16 sps:$4 sm:$0xff]  }
 0x320   :  { %5287 = vmatpush1.bf16.msra.mxu0 %v7404_v19  ;;  %v7427_v19 = vld [vmem:[#allocation8 + $0x62c] ss:$16 sps:$4 sm:$0xff]  }
 0x321   :  { %5288 = vmatprep.subr.bf16.mxu0 %v7412_v58  ;;  %5385 = vmatpush1.bf16.msra.mxu1 %v7338_v52  ;;  %v7425_v58 = vld [vmem:[#allocation8 + $0x628] ss:$16 sps:$4 sm:$0xff]   ;;  %v7433_v52 = vld [vmem:[#allocation8 + $0x64c] ss:$16 sps:$4 sm:$0xff]  }
 0x322   :  { %5386 = vmatprep.subr.bf16.mxu1 %v7343_v44  ;;  %v7431_v44 = vld [vmem:[#allocation8 + $0x648] ss:$16 sps:$4 sm:$0xff]  }
 0x324   :  { %5289 = vmatpush1.bf16.msra.mxu0 %v7410_v45  ;;  %v7439_v45 = vld [vmem:[#allocation8 + $0x66c] ss:$16 sps:$4 sm:$0xff]  }
 0x325   :  { %5290 = vmatprep.subr.bf16.mxu0 %v7418_v46  ;;  %5387 = vmatpush1.bf16.msra.mxu1 %v7341_v33  ;;  %v7437_v46 = vld [vmem:[#allocation8 + $0x668] ss:$16 sps:$4 sm:$0xff]   ;;  %v7445_v33 = vld [vmem:[#allocation8 + $0x68c] ss:$16 sps:$4 sm:$0xff]  }
 0x326   :  { %5397 = vmatprep.subr.bf16.mxu1 %v7346_v0  ;;  %v626_v0 = vsub.s32 6, %v8073_v57 }
 0x328   :  { %5291 = vmatpush1.bf16.msra.mxu0 %v7416_v49  ;;  %5389 = vmatmul.mubr.bf16.vlgmr.msra.gmra.mrb[12].mxu1 %v8116_v37  ;;  %v7442_v37 = vld [vmem:[#allocation8 + $0x784] ss:$16 sps:$4 sm:$0xff]   ;;  %v7443_v49 = vld [vmem:[#allocation8 + $0x688] ss:$16 sps:$4 sm:$0xff]  }
 0x329   :  { %5292 = vmatprep.subr.bf16.mxu0 %v7424_v36  ;;  %5398 = vmatpush1.bf16.msra.mxu1 %v7344_v48  ;;  %v630_v36 = vsub.s32 7, %v8073_v57  ;;  %v627_v48 = vrot.slane %v8124_v29, %v626_v0  ;;  %v7518_v0 = vld [vmem:[#allocation11 + $0xa0] ss:$8 sps:$4 sm:$0xff]   ;;  %v7596_v57 = vld [vmem:[#allocation14 + $0x70] sm:$0xff]  }
 0x32a   :  { %5429 = vmatprep.mubr.bf16.mxu1 %v8128_v12  ;;  %5399 = vmatprep.subr.bf16.mxu1 %v7349_v43  ;;  %v7452_v12 = vld [vmem:[#allocation8 + $0x7c0] ss:$16 sps:$4 sm:$0xff]  }
 0x32b   :  { %v631_v43 = vrot.slane %v8124_v29, %v630_v36  ;;  %v7521_v36 = vld [vmem:[#allocation11 + $0xb0] ss:$8 sps:$4 sm:$0xff]  }
 0x32c   :  { %5293 = vmatpush1.bf16.msra.mxu0 %v7422_v50  ;;  %v7449_v50 = vld [vmem:[#allocation8 + $0x6a8] ss:$16 sps:$4 sm:$0xff]  }
 0x32d   :  { %5294 = vmatprep.subr.bf16.mxu0 %v7430_v51  ;;  %5400 = vmatpush1.bf16.msra.mxu1 %v7347_v16  ;;  %v7457_v51 = vld [vmem:[#allocation8 + $0x6cc] ss:$16 sps:$4 sm:$0xff]  }
 0x32e   :  { %5401 = vmatprep.subr.bf16.mxu1 %v7352_v55 }
 0x330   :  { %5295 = vmatpush1.bf16.msra.mxu0 %v7428_v56 }
 0x331   :  { %5296 = vmatprep.subr.bf16.mxu0 %v7436_v60  ;;  %5402 = vmatpush1.bf16.msra.mxu1 %v7350_v63 }
 0x332   :  { %5403 = vmatprep.subr.bf16.mxu1 %v7355_v1  ;;  %v7455_v1 = vld [vmem:[#allocation8 + $0x6c8] ss:$16 sps:$4 sm:$0xff]  }
 0x334   :  { %5297 = vmatpush1.bf16.msra.mxu0 %v7434_v2 }
 0x335   :  { %5298 = vmatprep.subr.bf16.mxu0 %v7442_v37  ;;  %5404 = vmatpush1.bf16.msra.mxu1 %v7353_v61  ;;  %v7463_v61 = vld [vmem:[#allocation8 + $0x6ec] ss:$16 sps:$4 sm:$0xff]  }
 0x336   :  { %5405 = vmatprep.subr.bf16.mxu1 %v7358_v21 }
 0x338   :  { %5299 = vmatpush1.bf16.msra.mxu0 %v7440_v4 }
 0x339   :  { %5300 = vmatprep.subr.bf16.mxu0 %v7448_v5  ;;  %5406 = vmatpush1.bf16.msra.mxu1 %v7356_v28  ;;  %v7461_v5 = vld [vmem:[#allocation8 + $0x6e8] ss:$16 sps:$4 sm:$0xff]  }
 0x33a   :  { %5407 = vmatprep.subr.bf16.mxu1 %v7361_v6  ;;  %v7466_v6 = vld [vmem:[#allocation8 + $0x70c] ss:$16 sps:$4 sm:$0xff]  }
 0x33c   :  { %5301 = vmatpush1.bf16.msra.mxu0 %v7446_v9  ;;  %v7488_v9 = vld [vmem:[#allocation11] ss:$8 sps:$4 sm:$0xff]  }
 0x33d   :  { %5302 = vmatprep.subr.bf16.mxu0 %v7454_v10  ;;  %5408 = vmatpush1.bf16.msra.mxu1 %v7359_v11  ;;  %v7493_v11 = vld [vmem:[#allocation11 + $0x14] ss:$8 sps:$4 sm:$0xff]  }
 0x33e   :  { %5409 = vmatprep.subr.bf16.mxu1 %v7364_v22  ;;  %v7464_v22 = vld [vmem:[#allocation8 + $0x708] ss:$16 sps:$4 sm:$0xff]  }
 0x340   :  { %5303 = vmatpush1.bf16.msra.mxu0 %v7452_v12  ;;  %v7469_v12 = vld [vmem:[#allocation8 + $0x72c] ss:$16 sps:$4 sm:$0xff]  }
 0x341   :  { %5304 = vmatprep.subr.bf16.mxu0 %v7460_v13  ;;  %5410 = vmatpush1.bf16.msra.mxu1 %v7362_v15  ;;  %v7491_v13 = vld [vmem:[#allocation11 + $0x10] ss:$8 sps:$4 sm:$0xff]   ;;  %v7496_v15 = vld [vmem:[#allocation11 + $0x24] ss:$8 sps:$4 sm:$0xff]  }
 0x342   :  { %5411 = vmatprep.subr.bf16.mxu1 %v7367_v17  ;;  %v7467_v17 = vld [vmem:[#allocation8 + $0x728] ss:$16 sps:$4 sm:$0xff]  }
 0x344   :  { %5305 = vmatpush1.bf16.msra.mxu0 %v7458_v18  ;;  %v7472_v18 = vld [vmem:[#allocation8 + $0x74c] ss:$16 sps:$4 sm:$0xff]  }
 0x345   :  { %5891 = vmatprep.subr.bf16.mxu0 %v7490_v20  ;;  %5412 = vmatpush1.bf16.msra.mxu1 %v7365_v7  ;;  %v7494_v20 = vld [vmem:[#allocation11 + $0x20] ss:$8 sps:$4 sm:$0xff]   ;;  %v7499_v7 = vld [vmem:[#allocation11 + $0x34] ss:$8 sps:$4 sm:$0xff]  }
 0x346   :  { %5413 = vmatprep.subr.bf16.mxu1 %v7373_v23  ;;  %v7470_v23 = vld [vmem:[#allocation8 + $0x748] ss:$16 sps:$4 sm:$0xff]  }
 0x349   :  { %5414 = vmatpush1.bf16.msra.mxu1 %v7371_v24  ;;  %v7475_v24 = vld [vmem:[#allocation8 + $0x76c] ss:$16 sps:$4 sm:$0xff]  }
 0x34a   :  { %5415 = vmatprep.subr.bf16.mxu1 %v7379_v25  ;;  %v7497_v25 = vld [vmem:[#allocation11 + $0x30] ss:$8 sps:$4 sm:$0xff]  }
 0x34d   :  { %5416 = vmatpush1.bf16.msra.mxu1 %v7377_v26  ;;  %v7502_v26 = vld [vmem:[#allocation11 + $0x44] ss:$8 sps:$4 sm:$0xff]  }
 0x34e   :  { %5417 = vmatprep.subr.bf16.mxu1 %v7385_v53  ;;  %v7473_v53 = vld [vmem:[#allocation8 + $0x768] ss:$16 sps:$4 sm:$0xff]  }
 0x351   :  { %5418 = vmatpush1.bf16.msra.mxu1 %v7383_v27  ;;  %v7478_v27 = vld [vmem:[#allocation8 + $0x78c] ss:$16 sps:$4 sm:$0xff]  }
 0x352   :  { %5419 = vmatprep.subr.bf16.mxu1 %v7391_v54  ;;  %v7500_v54 = vld [vmem:[#allocation11 + $0x40] ss:$8 sps:$4 sm:$0xff]  }
 0x355   :  { %5420 = vmatpush1.bf16.msra.mxu1 %v7389_v30  ;;  %v7505_v30 = vld [vmem:[#allocation11 + $0x54] ss:$8 sps:$4 sm:$0xff]  }
 0x356   :  { %5421 = vmatprep.subr.bf16.mxu1 %v7397_v31  ;;  %v7476_v31 = vld [vmem:[#allocation8 + $0x788] ss:$16 sps:$4 sm:$0xff]  }
 0x359   :  { %5422 = vmatpush1.bf16.msra.mxu1 %v7395_v32  ;;  %v7481_v32 = vld [vmem:[#allocation8 + $0x7ac] ss:$16 sps:$4 sm:$0xff]  }
 0x35a   :  { %5423 = vmatprep.subr.bf16.mxu1 %v7403_v34  ;;  %v7503_v34 = vld [vmem:[#allocation11 + $0x50] ss:$8 sps:$4 sm:$0xff]  }
 0x35d   :  { %5424 = vmatpush1.bf16.msra.mxu1 %v7401_v35  ;;  %v7508_v35 = vld [vmem:[#allocation11 + $0x64] ss:$8 sps:$4 sm:$0xff]  }
 0x35e   :  { %5425 = vmatprep.subr.bf16.mxu1 %v7409_v38  ;;  %v7479_v38 = vld [vmem:[#allocation8 + $0x7a8] ss:$16 sps:$4 sm:$0xff]  }
 0x361   :  { %5426 = vmatpush1.bf16.msra.mxu1 %v7407_v39  ;;  %v7484_v39 = vld [vmem:[#allocation8 + $0x7cc] ss:$16 sps:$4 sm:$0xff]  }
 0x362   :  { %5427 = vmatprep.subr.bf16.mxu1 %v7415_v40  ;;  %v7506_v40 = vld [vmem:[#allocation11 + $0x60] ss:$8 sps:$4 sm:$0xff]  }
 0x365   :  { %5428 = vmatpush1.bf16.msra.mxu1 %v7413_v41  ;;  %v7511_v41 = vld [vmem:[#allocation11 + $0x74] ss:$8 sps:$4 sm:$0xff]  }
 0x366   :  { %5438 = vmatprep.subr.bf16.mxu1 %v7421_v47  ;;  %v7482_v47 = vld [vmem:[#allocation8 + $0x7c8] ss:$16 sps:$4 sm:$0xff]  }
 0x368   :  { %5430 = vmatmul.mubr.bf16.vlgmr.msra.gmra.mrb[12].mxu1 %v8130_v14  ;;  %v7451_v14 = vld [vmem:[#allocation8 + $0x6ac] ss:$16 sps:$4 sm:$0xff]  }
 0x369   :  { %5439 = vmatpush1.bf16.msra.mxu1 %v7419_v42  ;;  %v7487_v42 = vld [vmem:[#allocation8 + $0x7ec] ss:$16 sps:$4 sm:$0xff]  }
 0x36a   :  { %5440 = vmatprep.subr.bf16.mxu1 %v7427_v19  ;;  %v7509_v19 = vld [vmem:[#allocation11 + $0x70] ss:$8 sps:$4 sm:$0xff]  }
 0x36d   :  { %5441 = vmatpush1.bf16.msra.mxu1 %v7425_v58  ;;  %v7514_v58 = vld [vmem:[#allocation11 + $0x84] ss:$8 sps:$4 sm:$0xff]  }
 0x36e   :  { %5442 = vmatprep.subr.bf16.mxu1 %v7433_v52  ;;  %v7485_v52 = vld [vmem:[#allocation8 + $0x7e8] ss:$16 sps:$4 sm:$0xff]  }
 0x371   :  { %5443 = vmatpush1.bf16.msra.mxu1 %v7431_v44  ;;  %v7512_v44 = vld [vmem:[#allocation11 + $0x80] ss:$8 sps:$4 sm:$0xff]  }
 0x372   :  { %5444 = vmatprep.subr.bf16.mxu1 %v7439_v45  ;;  %v7517_v45 = vld [vmem:[#allocation11 + $0x94] ss:$8 sps:$4 sm:$0xff]  }
 0x375   :  { %5445 = vmatpush1.bf16.msra.mxu1 %v7437_v46  ;;  %v7515_v46 = vld [vmem:[#allocation11 + $0x90] ss:$8 sps:$4 sm:$0xff]  }
 0x376   :  { %5446 = vmatprep.subr.bf16.mxu1 %v7445_v33  ;;  %v7520_v33 = vld [vmem:[#allocation11 + $0xa4] ss:$8 sps:$4 sm:$0xff]  }
 0x379   :  { %5447 = vmatpush1.bf16.msra.mxu1 %v7443_v49  ;;  %v7523_v49 = vld [vmem:[#allocation11 + $0xb4] ss:$8 sps:$4 sm:$0xff]  }
 0x37a   :  { %5448 = vmatprep.subr.bf16.mxu1 %v7451_v14  ;;  %v7526_v14 = vld [vmem:[#allocation11 + $0xc4] ss:$8 sps:$4 sm:$0xff]  }
 0x37b   :  { %v3554_v16 = vpop.f32.mrb[8].mxu1 }
 0x37c   :  { %v6998_v55 = vadd.f32 %v3554_v16, %v627_v48  ;;  %v3556_v56 = vpop.f32.mrb[9].mxu1  ;;  %v7524_v48 = vld [vmem:[#allocation11 + $0xc0] ss:$8 sps:$4 sm:$0xff]  }
 0x37d   :  { %v6999_v60 = vadd.f32 %v3556_v56, %v631_v43  ;;  %v3558_v63 = vpop.f32.mrb[10].mxu1  ;;  %5449 = vmatpush1.bf16.msra.mxu1 %v7449_v50  ;;  %v7529_v43 = vld [vmem:[#allocation11 + $0xd4] ss:$8 sps:$4 sm:$0xff]   ;;  %v7527_v50 = vld [vmem:[#allocation11 + $0xd0] ss:$8 sps:$4 sm:$0xff]  }
 0x37e   :  { %vm3567_vm6 = vcmp.gt.f32.partialorder %v6998_v55, 0.0  ;;  %v3575_v2 = vmul.f32 0.2, %v6998_v55  ;;  %v3559_v37 = vpop.f32.mrb[11].mxu1  ;;  %5450 = vmatprep.subr.bf16.mxu1 %v7457_v51  ;;  %v7532_v51 = vld [vmem:[#allocation11 + $0xe4] ss:$8 sps:$4 sm:$0xff]  }
 0x37f   :  { %vm3568_vm7 = vcmp.gt.f32.partialorder %v6999_v60, 0.0  ;;  %v3576_v21 = vmul.f32 0.2, %v6999_v60  ;;  %v7530_v16 = vld [vmem:[#allocation11 + $0xe0] ss:$8 sps:$4 sm:$0xff]  }
 0x380   :  { %v3583_v4 = vsel %vm3567_vm6, %v6998_v55, %v3575_v2  ;;  %v7535_v55 = vld [vmem:[#allocation11 + $0xf4] ss:$8 sps:$4 sm:$0xff]   ;;  %v7533_v56 = vld [vmem:[#allocation11 + $0xf0] ss:$8 sps:$4 sm:$0xff]   ;;  %v7584_v63 = vld [vmem:[#allocation14 + $0x40] sm:$0xff]  }
 0x381   :  { %5451 = vmatpush1.bf16.msra.mxu1 %v7455_v1  ;;  %v3584_v29 = vsel %vm3568_vm7, %v6999_v60, %v3576_v21  ;;  %v8141_v10 = vpack.c.bf16 %v3583_v4, %v3583_v4  ;;  %v7538_v60 = vld [vmem:[#allocation11 + $0x104] ss:$8 sps:$4 sm:$0xff]   ;;  %v7589_v21 = vld [vmem:[#allocation14 + $0x10] sm:$0xff]   ;;  %v7590_v4 = vld [vmem:[#allocation14 + $0x58] sm:$0xff]  }
 0x382   :  { %v3592_v28 = vpack.c.bf16 %v3584_v29, %v3584_v29  ;;  %5452 = vmatprep.subr.bf16.mxu1 %v7463_v61  ;;  %v7585_v1 = vld [vmem:[#allocation14] sm:$0xff]   ;;  %v7586_v2 = vld [vmem:[#allocation14 + $0x48] sm:$0xff]   ;;  %v7588_v61 = vld [vmem:[#allocation14 + $0x50] sm:$0xff]  }
 0x383   :  { %v7587_v37 = vld [vmem:[#allocation14 + $0x8] sm:$0xff]   ;;  %v7591_v29 = vld [vmem:[#allocation14 + $0x18] sm:$0xff]  }
 0x384   :  { %5306 = vmatprep.mubr.bf16.mxu0 %v3592_v28  ;;  %5470 = vmatprep.mubr.bf16.mxu1 %v3592_v28  ;;  %v7593_v28 = vld [vmem:[#allocation14 + $0x20] sm:$0xff]  }
 0x385   :  { %5307 = vmatmul.mubr.bf16.vlgmr.msra.gmra.mrb[8].mxu0 %v8141_v10  ;;  %5453 = vmatpush1.bf16.msra.mxu1 %v7461_v5  ;;  %v7592_v5 = vld [vmem:[#allocation14 + $0x60] sm:$0xff]  }
 0x386   :  { %5454 = vmatprep.subr.bf16.mxu1 %v7466_v6  ;;  %5892 = vmatpush1.bf16.msra.mxu0 %v7488_v9  ;;  %v7594_v6 = vld [vmem:[#allocation14 + $0x68] sm:$0xff]  }
 0x387   :  { %5893 = vmatprep.subr.bf16.mxu0 %v7493_v11  ;;  %v7595_v9 = vld [vmem:[#allocation14 + $0x28] sm:$0xff]  }
 0x389   :  { %5455 = vmatpush1.bf16.msra.mxu1 %v7464_v22 }
 0x38a   :  { %5456 = vmatprep.subr.bf16.mxu1 %v7469_v12  ;;  %5894 = vmatpush1.bf16.msra.mxu0 %v7491_v13 }
 0x38b   :  { %5895 = vmatprep.subr.bf16.mxu0 %v7496_v15 }
 0x38d   :  { %5457 = vmatpush1.bf16.msra.mxu1 %v7467_v17 }
 0x38e   :  { %5458 = vmatprep.subr.bf16.mxu1 %v7472_v18  ;;  %5896 = vmatpush1.bf16.msra.mxu0 %v7494_v20 }
 0x38f   :  { %5897 = vmatprep.subr.bf16.mxu0 %v7499_v7 }
 0x391   :  { %5459 = vmatpush1.bf16.msra.mxu1 %v7470_v23 }
 0x392   :  { %5460 = vmatprep.subr.bf16.mxu1 %v7475_v24  ;;  %5898 = vmatpush1.bf16.msra.mxu0 %v7497_v25 }
 0x393   :  { %5899 = vmatprep.subr.bf16.mxu0 %v7502_v26 }
 0x395   :  { %5461 = vmatpush1.bf16.msra.mxu1 %v7473_v53  ;;  %v7536_v53 = vld [vmem:[#allocation11 + $0x100] ss:$8 sps:$4 sm:$0xff]  }
 0x396   :  { %5462 = vmatprep.subr.bf16.mxu1 %v7478_v27  ;;  %5900 = vmatpush1.bf16.msra.mxu0 %v7500_v54  ;;  %v7541_v54 = vld [vmem:[#allocation11 + $0x114] ss:$8 sps:$4 sm:$0xff]  }
 0x397   :  { %5901 = vmatprep.subr.bf16.mxu0 %v7505_v30  ;;  %v7539_v30 = vld [vmem:[#allocation11 + $0x110] ss:$8 sps:$4 sm:$0xff]  }
 0x399   :  { %5463 = vmatpush1.bf16.msra.mxu1 %v7476_v31  ;;  %v7544_v31 = vld [vmem:[#allocation11 + $0x124] ss:$8 sps:$4 sm:$0xff]  }
 0x39a   :  { %5464 = vmatprep.subr.bf16.mxu1 %v7481_v32  ;;  %5902 = vmatpush1.bf16.msra.mxu0 %v7503_v34  ;;  %v7542_v32 = vld [vmem:[#allocation11 + $0x120] ss:$8 sps:$4 sm:$0xff]   ;;  %v7547_v34 = vld [vmem:[#allocation11 + $0x134] ss:$8 sps:$4 sm:$0xff]  }
 0x39b   :  { %5903 = vmatprep.subr.bf16.mxu0 %v7508_v35  ;;  %v7545_v35 = vld [vmem:[#allocation11 + $0x130] ss:$8 sps:$4 sm:$0xff]  }
 0x39d   :  { %5465 = vmatpush1.bf16.msra.mxu1 %v7479_v38  ;;  %v7550_v38 = vld [vmem:[#allocation11 + $0x144] ss:$8 sps:$4 sm:$0xff]  }
 0x39e   :  { %5466 = vmatprep.subr.bf16.mxu1 %v7484_v39  ;;  %5904 = vmatpush1.bf16.msra.mxu0 %v7506_v40  ;;  %v7548_v39 = vld [vmem:[#allocation11 + $0x140] ss:$8 sps:$4 sm:$0xff]   ;;  %v7553_v40 = vld [vmem:[#allocation11 + $0x154] ss:$8 sps:$4 sm:$0xff]  }
 0x39f   :  { %5905 = vmatprep.subr.bf16.mxu0 %v7511_v41  ;;  %v7551_v41 = vld [vmem:[#allocation11 + $0x150] ss:$8 sps:$4 sm:$0xff]  }
 0x3a1   :  { %5467 = vmatpush1.bf16.msra.mxu1 %v7482_v47  ;;  %v7556_v47 = vld [vmem:[#allocation11 + $0x164] ss:$8 sps:$4 sm:$0xff]  }
 0x3a2   :  { %5468 = vmatprep.subr.bf16.mxu1 %v7487_v42  ;;  %5906 = vmatpush1.bf16.msra.mxu0 %v7509_v19  ;;  %v7554_v42 = vld [vmem:[#allocation11 + $0x160] ss:$8 sps:$4 sm:$0xff]   ;;  %v7559_v19 = vld [vmem:[#allocation11 + $0x174] ss:$8 sps:$4 sm:$0xff]  }
 0x3a3   :  { %5907 = vmatprep.subr.bf16.mxu0 %v7514_v58 }
 0x3a5   :  { %5469 = vmatpush1.bf16.msra.mxu1 %v7485_v52 }
 0x3a6   :  { %5908 = vmatpush1.bf16.msra.mxu0 %v7512_v44  ;;  %6968 = vmatprep.subr.bf16.mxu1 %v7584_v63  ;;  %v7557_v44 = vld [vmem:[#allocation11 + $0x170] ss:$8 sps:$4 sm:$0xff]   ;;  %v7572_v63 = vld [vmem:[#allocation11 + $0x1c0] ss:$8 sps:$4 sm:$0xff]  }
 0x3a7   :  { %5909 = vmatprep.subr.bf16.mxu0 %v7517_v45 }
 0x3a8   :  { %5471 = vmatmul.mubr.bf16.vlgmr.msra.gmra.mrb[12].mxu1 %v8141_v10  ;;  %v8145_v10 = vld [vmem:[#allocation10] sm:$0xf] }
 0x3a9   :  { %6969 = vmatpush3.bf16.msra.mxu1 %v7585_v1  ;;  %v3854_v11 = vrot.slane %v8145_v10, %v8076_v3  ;;  %v3858_v22 = vrot.slane %v8145_v10, %v8081_v8  ;;  %v3866_v58 = vrot.slane %v8145_v10, %v614_v62  ;;  %v7568_v62 = vld [vmem:[#allocation11 + $0x1a4] ss:$8 sps:$4 sm:$0xff]   ;;  %v7577_v1 = vld [vmem:[#allocation11 + $0x1d4] ss:$8 sps:$4 sm:$0xff]  }
 0x3aa   :  { %5910 = vmatpush1.bf16.msra.mxu0 %v7515_v46  ;;  %6970 = vmatprep.subr.bf16.mxu1 %v7586_v2  ;;  %v7562_v46 = vld [vmem:[#allocation11 + $0x184] ss:$8 sps:$4 sm:$0xff]   ;;  %v3862_v2 = vrot.slane %v8145_v10, %v610_v59  ;;  %v7597_v59 = vld [vmem:[#allocation14 + $0x30] sm:$0xff]   ;;  %v7598_v10 = vld [vmem:[#allocation14 + $0x78] sm:$0xff]  }
 0x3ab   :  { %5911 = vmatprep.subr.bf16.mxu0 %v7520_v33 }
 0x3ad   :  { %6971 = vmatpush3.bf16.msra.mxu1 %v7587_v37  ;;  %v7575_v37 = vld [vmem:[#allocation11 + $0x1d0] ss:$8 sps:$4 sm:$0xff]  }
 0x3ae   :  { %5912 = vmatpush1.bf16.msra.mxu0 %v7518_v0  ;;  %6972 = vmatprep.subr.bf16.mxu1 %v7588_v61  ;;  %v7580_v61 = vld [vmem:[#allocation11 + $0x1e4] ss:$8 sps:$4 sm:$0xff]  }
 0x3af   :  { %5913 = vmatprep.subr.bf16.mxu0 %v7523_v49 }
 0x3b1   :  { %6973 = vmatpush3.bf16.msra.mxu1 %v7589_v21 }
 0x3b2   :  { %5914 = vmatpush1.bf16.msra.mxu0 %v7521_v36  ;;  %6974 = vmatprep.subr.bf16.mxu1 %v7590_v4  ;;  %v7578_v4 = vld [vmem:[#allocation11 + $0x1e0] ss:$8 sps:$4 sm:$0xff]  }
 0x3b3   :  { %5915 = vmatprep.subr.bf16.mxu0 %v7526_v14  ;;  %v7560_v14 = vld [vmem:[#allocation11 + $0x180] ss:$8 sps:$4 sm:$0xff]  }
 0x3b5   :  { %6975 = vmatpush3.bf16.msra.mxu1 %v7591_v29  ;;  %v7583_v29 = vld [vmem:[#allocation11 + $0x1f4] ss:$8 sps:$4 sm:$0xff]  }
 0x3b6   :  { %5916 = vmatpush1.bf16.msra.mxu0 %v7524_v48  ;;  %6976 = vmatprep.subr.bf16.mxu1 %v7592_v5  ;;  %v7565_v48 = vld [vmem:[#allocation11 + $0x194] ss:$8 sps:$4 sm:$0xff]  }
 0x3b7   :  { %5917 = vmatprep.subr.bf16.mxu0 %v7529_v43 }
 0x3b9   :  { %6977 = vmatpush3.bf16.msra.mxu1 %v7593_v28  ;;  %v7581_v28 = vld [vmem:[#allocation11 + $0x1f0] ss:$8 sps:$4 sm:$0xff]  }
 0x3ba   :  { %5918 = vmatpush1.bf16.msra.mxu0 %v7527_v50  ;;  %6978 = vmatprep.subr.bf16.mxu1 %v7594_v6 }
 0x3bb   :  { %5919 = vmatprep.subr.bf16.mxu0 %v7532_v51  ;;  %v7563_v51 = vld [vmem:[#allocation11 + $0x190] ss:$8 sps:$4 sm:$0xff]  }
 0x3bd   :  { %6979 = vmatpush3.bf16.msra.mxu1 %v7595_v9 }
 0x3be   :  { %5920 = vmatpush1.bf16.msra.mxu0 %v7530_v16  ;;  %v7566_v16 = vld [vmem:[#allocation11 + $0x1a0] ss:$8 sps:$4 sm:$0xff]   ;;  %6980 = vmatprep.subr.bf16.mxu1 %v7596_v57 }
 0x3bf   :  { %5921 = vmatprep.subr.bf16.mxu0 %v7535_v55  ;;  %v7571_v55 = vld [vmem:[#allocation11 + $0x1b4] ss:$8 sps:$4 sm:$0xff]  }
 0x3c1   :  { %6981 = vmatpush3.bf16.msra.mxu1 %v7597_v59 }
 0x3c2   :  { %5922 = vmatpush1.bf16.msra.mxu0 %v7533_v56  ;;  %v7569_v56 = vld [vmem:[#allocation11 + $0x1b0] ss:$8 sps:$4 sm:$0xff]   ;;  %6982 = vmatprep.subr.bf16.mxu1 %v7598_v10 }
 0x3c3   :  { %5932 = vmatprep.subr.bf16.mxu0 %v7538_v60  ;;  %v7574_v60 = vld [vmem:[#allocation11 + $0x1c4] ss:$8 sps:$4 sm:$0xff]  }
 0x458   :  { %v5308_v12 = vpop.f32.mrb[8].mxu0 }
 0x459   :  { %v7000_v13 = vadd.f32 %v5308_v12, %v3854_v11  ;;  %v5310_v15 = vpop.f32.mrb[9].mxu0  ;;  %v7599_v11 = vld [vmem:[#allocation14 + $0x38] sm:$0xff]  }
 0x45a   :  { %v7001_v17 = vadd.f32 %v5310_v15, %v3858_v22  ;;  %v5312_v18 = vpop.f32.mrb[10].mxu0  ;;  %6983 = vmatpush3.bf16.msra.mxu1 %v7599_v11  ;;  %v5559_v22 = vld [vmem:[#allocation13] sm:$0x3] }
 0x45b   :  { %vm5479_vm8 = vcmp.gt.f32.partialorder %v7000_v13, 0.0  ;;  %v5483_v20 = vmul.f32 0.2, %v7000_v13  ;;  %v5313_v7 = vpop.f32.mrb[11].mxu0  ;;  %v5564_v12 = vrot.slane %v5559_v22, %v8076_v3  ;;  %v6951_v3 = vld [vmem:[#allocation16] ss:$0 sm:$0xff] }
 0x45c   :  { %vm5480_vm9 = vcmp.gt.f32.partialorder %v7001_v17, 0.0  ;;  %v5484_v23 = vmul.f32 0.2, %v7001_v17 }
 0x45d   :  { %v5487_v24 = vsel %vm5479_vm8, %v7000_v13, %v5483_v20  ;;  %v5568_v13 = vrot.slane %v5559_v22, %v8081_v8 }
 0x45e   :  { %v5488_v25 = vsel %vm5480_vm9, %v7001_v17, %v5484_v23  ;;  %v5491_v27 = vpack.c.bf16 %v5487_v24, %v5487_v24 }
 0x45f   :  { %v5492_v26 = vpack.c.bf16 %v5488_v25, %v5488_v25 }
 0x461   :  { %5923 = vmatprep.mubr.bf16.mxu0 %v5492_v26 }
 0x462   :  { %5924 = vmatmul.mubr.bf16.vlgmr.msra.gmra.mrb[12].mxu0 %v5491_v27 }
 0x463   :  { %5933 = vmatpush1.bf16.msra.mxu0 %v7536_v53 }
 0x464   :  { %5934 = vmatprep.subr.bf16.mxu0 %v7541_v54 }
 0x467   :  { %5935 = vmatpush1.bf16.msra.mxu0 %v7539_v30 }
 0x468   :  { %5936 = vmatprep.subr.bf16.mxu0 %v7544_v31 }
 0x46b   :  { %5937 = vmatpush1.bf16.msra.mxu0 %v7542_v32 }
 0x46c   :  { %5938 = vmatprep.subr.bf16.mxu0 %v7547_v34 }
 0x46f   :  { %5939 = vmatpush1.bf16.msra.mxu0 %v7545_v35 }
 0x470   :  { %5940 = vmatprep.subr.bf16.mxu0 %v7550_v38 }
 0x473   :  { %5941 = vmatpush1.bf16.msra.mxu0 %v7548_v39 }
 0x474   :  { %5942 = vmatprep.subr.bf16.mxu0 %v7553_v40 }
 0x477   :  { %5943 = vmatpush1.bf16.msra.mxu0 %v7551_v41 }
 0x478   :  { %5944 = vmatprep.subr.bf16.mxu0 %v7556_v47 }
 0x47b   :  { %5945 = vmatpush1.bf16.msra.mxu0 %v7554_v42  ;;  %v5472_v52 = vpop.f32.mrb[12].mxu1 }
 0x47c   :  { %v5474_v45 = vpop.f32.mrb[13].mxu1  ;;  %5946 = vmatprep.subr.bf16.mxu0 %v7559_v19  ;;  %v7002_v21 = vadd.f32 %v5472_v52, %v3862_v2 }
 0x47d   :  { %v7003_v33 = vadd.f32 %v5474_v45, %v3866_v58  ;;  %v5476_v0 = vpop.f32.mrb[14].mxu1 }
 0x47e   :  { %v5477_v49 = vpop.f32.mrb[15].mxu1  ;;  %v5485_v5 = vmul.f32 0.2, %v7002_v21  ;;  %vm5481_vm11 = vcmp.gt.f32.partialorder %v7002_v21, 0.0 }
 0x47f   :  { %vm5482_vm10 = vcmp.gt.f32.partialorder %v7003_v33, 0.0  ;;  %v5486_v36 = vmul.f32 0.2, %v7003_v33  ;;  %5947 = vmatpush1.bf16.msra.mxu0 %v7557_v44 }
 0x480   :  { %5948 = vmatprep.subr.bf16.mxu0 %v7562_v46  ;;  %v5489_v6 = vsel %vm5481_vm11, %v7002_v21, %v5485_v5 }
 0x481   :  { %v5490_v43 = vsel %vm5482_vm10, %v7003_v33, %v5486_v36  ;;  %v5493_v9 = vpack.c.bf16 %v5489_v6, %v5489_v6 }
 0x482   :  { %v5494_v50 = vpack.c.bf16 %v5490_v43, %v5490_v43 }
 0x483   :  { %5949 = vmatpush1.bf16.msra.mxu0 %v7560_v14 }
 0x484   :  { %5964 = vmatprep.mubr.bf16.mxu0 %v5494_v50  ;;  %5950 = vmatprep.subr.bf16.mxu0 %v7565_v48 }
 0x487   :  { %5951 = vmatpush1.bf16.msra.mxu0 %v7563_v51 }
 0x488   :  { %5952 = vmatprep.subr.bf16.mxu0 %v7568_v62 }
 0x48b   :  { %5953 = vmatpush1.bf16.msra.mxu0 %v7566_v16 }
 0x48c   :  { %5954 = vmatprep.subr.bf16.mxu0 %v7571_v55 }
 0x48f   :  { %5955 = vmatpush1.bf16.msra.mxu0 %v7569_v56 }
 0x490   :  { %5956 = vmatprep.subr.bf16.mxu0 %v7574_v60 }
 0x493   :  { %5957 = vmatpush1.bf16.msra.mxu0 %v7572_v63 }
 0x494   :  { %5958 = vmatprep.subr.bf16.mxu0 %v7577_v1 }
 0x497   :  { %5959 = vmatpush1.bf16.msra.mxu0 %v7575_v37 }
 0x498   :  { %5960 = vmatprep.subr.bf16.mxu0 %v7580_v61 }
 0x49b   :  { %5961 = vmatpush1.bf16.msra.mxu0 %v7578_v4 }
 0x49c   :  { %5962 = vmatprep.subr.bf16.mxu0 %v7583_v29 }
 0x49f   :  { %5963 = vmatpush1.bf16.msra.mxu0 %v7581_v28 }
 0x4a2   :  { %5965 = vmatmul.mubr.bf16.vlgmr.msra.gmra.mrb[12].mxu0 %v5493_v9 }
 0x575   :  { %v5966_v15 = vpop.f32.mrb[12].mxu0 }
 0x576   :  { %v7004_v17 = vadd.f32 %v5966_v15, %v5564_v12  ;;  %v5968_v18 = vpop.f32.mrb[13].mxu0 }
 0x577   :  { %v7005_v20 = vadd.f32 %v5968_v18, %v5568_v13  ;;  %v5970_v7 = vpop.f32.mrb[14].mxu0 }
 0x578   :  { %vm5973_vm12 = vcmp.gt.f32.partialorder %v7004_v17, 0.0  ;;  %v5975_v23 = vmul.f32 0.2, %v7004_v17  ;;  %v5971_v24 = vpop.f32.mrb[15].mxu0 }
 0x579   :  { %vm5974_vm13 = vcmp.gt.f32.partialorder %v7005_v20, 0.0  ;;  %v5976_v25 = vmul.f32 0.2, %v7005_v20 }
 0x57a   :  { %v5977_v26 = vsel %vm5973_vm12, %v7004_v17, %v5975_v23 }
 0x57b   :  { %v5978_v53 = vsel %vm5974_vm13, %v7005_v20, %v5976_v25  ;;  %v5979_v54 = vpack.c.bf16 %v5977_v26, %v5977_v26 }
 0x57c   :  { %v5980_v27 = vpack.c.bf16 %v5978_v53, %v5978_v53 }
 0x57e   :  { %6148 = vmatprep.mubr.bf16.mxu1 %v5980_v27 }
 0x57f   :  { %6149 = vmatmul.mubr.bf16.vlgmr.msra.gmra.mrb[16].mxu1 %v5979_v54 }
 0x652   :  { %v6984_v30 = vpop.f32.mrb[16].mxu1 }
 0x653   :  { %v6985_v31 = vpop.f32.mrb[17].mxu1 }
 0x654   :  { %v6986_v8 = vadd.f32 %v6985_v31, %v6984_v30  ;;  %v6987_v32 = vpop.f32.mrb[18].mxu1 }
 0x655   :  { %v6988_v34 = vpop.f32.mrb[19].mxu1 }
 0x656   :  { %v6151_v35 = vadd.f32 %v6986_v8, %v6951_v3 }
 0x658   :  { %6156 = vst [vmem:[#allocation17] sm:$0xff] %v6151_v35 }
 0x659   :  { %7812 = shalt.err (!%p7809_p6)
}
 0x65a   :  { %s7813_s22 = scalar_lea.hbm %s8180_s9, 128 }
 0x65b   :  { %p7814_p7 = scmp.ne.s32.totalorder %s8180_s9, %s7813_s22  ;;  %p7817_p8 = scmp.lt.u32.totalorder %s7813_s22, %s8180_s9 }
 0x65d   :  { %p7819_p9 = pnand %p7817_p8, %p7814_p7 }
 0x65f   :  { %7822 = shalt.err (!%p7819_p9)
}
 0x660   :  { %6166 = dma.vmem_to_hbm [thread:$0]  %s6164_s24, 128, %s8180_s9, [#allocation4]  }
 0x661   :  { %7833 = dma.done.wait [#allocation4], 128  }
 0x662   :  { %7834 = vsyncadd [#allocation4], 4294967168 }
 0x663   :  { %6170 = vsyncpa [#allocation3], 1 }
 0x664   :  { %6171 = vsyncpa [#allocation6], 1 }
 0x665   :  { %6172 = vsyncpa [#allocation9], 1 }
 0x666   :  { %6173 = vsyncpa [#allocation12], 1 }
 0x667   :  { %6174 = vsyncpa [#allocation15], 1 }
 0x668   :  { %6175 = vsyncpa [#allocation4], 1 }

</bundles_post_ra>
